<compile_context>
chip_gen: v6e
topology: v6e:2x2x1
jax: 0.10.0
libtpu: 0.0.40
codegen_flags: <defaults>
</compile_context>

<pallas_src>
import functools

import jax
import jax.numpy as jnp
from jax.experimental import pallas as pl
from jax.experimental.pallas import tpu as pltpu

_MIN_PALLAS_ELEMS = 1 << 19            # below this, plain XLA fusion wins
_TARGET_BLOCK_BYTES = 4 * 1024 * 1024  # ~4 MiB per block per buffer
_VMEM_LIMIT_BYTES = 32 * 1024 * 1024   # explicit scoped-VMEM limit (all gens)
_MIN_GRID_STEPS = 4                    # keep both v7x TCs + pipeline busy


def _round_down(x: int, m: int) -> int:
    return (x // m) * m


@functools.lru_cache(maxsize=1)
def _bf16_compute_native() -> bool:
    """True iff the VPU/EUP handle bf16 natively (v6e and newer)."""
    try:
        kind = jax.devices()[0].device_kind.lower()
    except Exception:  # pragma: no cover - defensive; default to native
        return True
    return not any(old in kind for old in ("v2", "v3", "v4", "v5"))


def _cloud_identity_kernel(pred_ref, out_ref, *, squash: bool, compute_dtype):
    # tanh goes to the EUP; the scale/shift is cheap VPU work.
    x = pred_ref[...].astype(compute_dtype)
    y = jnp.tanh(x)
    if squash:
        # Python scalars are weak-typed: stays in compute_dtype.
        y = y * 0.5 - 0.5
    out_ref[...] = y.astype(out_ref.dtype)


def _xla_forward(x: jax.Array, squash: bool, compute_dtype) -> jax.Array:
    y = jnp.tanh(x.astype(compute_dtype))
    if squash:
        y = y * 0.5 - 0.5
    return y.astype(x.dtype)


def cloud_identity(cloudy_input: jax.Array, cloud_pred: jax.Array,
                   squash: bool = True) -> jax.Array:
    """Pallas equivalent of CloudIdentity.forward(cloudy_input, cloud_pred)."""
    del cloudy_input  # unused by the reference forward pass
    x = cloud_pred
    size = int(x.size)
    if size == 0:
        return x

    if x.dtype == jnp.bfloat16 and _bf16_compute_native():
        compute_dtype = jnp.dtype(jnp.bfloat16)   # native bf16 EUP on v6e/v7x
    else:
        compute_dtype = jnp.dtype(jnp.float32)    # f32 elsewhere (incl. v5e bf16)

    # Tiny tensors: kernel dispatch + per-step overhead dwarfs the work; XLA's
    # fused elementwise op is already at the HBM roofline.
    if size < _MIN_PALLAS_ELEMS:
        return _xla_forward(x, squash, compute_dtype)

    # --- Zero-copy 2D view: collapse leading dims, keep last dim as lanes. ---
    if x.ndim >= 2:
        lanes = x.shape[-1]
        rows = size // lanes
    else:
        rows, lanes = 1, size
    x2d = x.reshape(rows, lanes)

    itemsize = jnp.dtype(x.dtype).itemsize
    # Column (lane) block: use the full last dim when modest, otherwise a big
    # multiple of 128 (long contiguous DMA bursts; partial edge block is fine).
    max_bc = max(128, _round_down(_TARGET_BLOCK_BYTES // (8 * itemsize), 128))
    bc = lanes if lanes <= max_bc else max_bc
    # Row block from the byte budget (multiple of 8, or the full dim if < 8).
    if rows <= 8:
        br = rows
    else:
        br_budget = max(8, _round_down(_TARGET_BLOCK_BYTES // (bc * itemsize), 8))
        br = max(8, min(br_budget, _round_down(rows, 8)))

    row_steps = pl.cdiv(rows, br)
    col_steps = pl.cdiv(lanes, bc)
    # Guarantee a few grid steps so megacore sharding + pipelining engage.
    if row_steps * col_steps < _MIN_GRID_STEPS:
        if rows >= _MIN_GRID_STEPS * 8:
            br = max(8, _round_down(rows // _MIN_GRID_STEPS, 8))
            row_steps = pl.cdiv(rows, br)
        elif bc == lanes and lanes >= _MIN_GRID_STEPS * 128:
            bc = max(128, _round_down(lanes // _MIN_GRID_STEPS, 128))
            col_steps = pl.cdiv(lanes, bc)

    kernel = functools.partial(
        _cloud_identity_kernel, squash=squash, compute_dtype=compute_dtype)

    out2d = pl.pallas_call(
        kernel,
        out_shape=jax.ShapeDtypeStruct((rows, lanes), x.dtype),
        grid=(row_steps, col_steps),
        in_specs=[pl.BlockSpec((br, bc), lambda i, j: (i, j))],
        out_specs=pl.BlockSpec((br, bc), lambda i, j: (i, j)),
        compiler_params=pltpu.CompilerParams(
            dimension_semantics=("parallel", "parallel"),
            vmem_limit_bytes=_VMEM_LIMIT_BYTES),
    )(x2d)
    return out2d.reshape(x.shape)


if __name__ == "__main__":
    key = jax.random.PRNGKey(0)
    k1, k2, k3, k4, k5, k6, k7, k8 = jax.random.split(key, 8)

    def ref(pred):
        return jnp.tanh(pred.astype(jnp.float32)) * 0.5 - 0.5

    # 1) Small NCHW input matching the module's typical usage.
    #    (Goes through the fused-XLA fast path by design.)
    cloudy_small = jax.random.normal(k1, (2, 4, 16, 16), dtype=jnp.float32)
    pred_small = jax.random.normal(k2, (2, 4, 16, 16), dtype=jnp.float32)
    out_small = jax.block_until_ready(cloud_identity(cloudy_small, pred_small))
    assert out_small.shape == pred_small.shape
    assert jnp.allclose(out_small, ref(pred_small), atol=1e-5, rtol=1e-5)

    # 2) Larger, lane-aligned input: zero-copy Pallas path, grid >= 4 steps.
    cloudy_big = jax.random.normal(k3, (4, 8, 256, 256), dtype=jnp.float32)
    pred_big = jax.random.normal(k4, (4, 8, 256, 256), dtype=jnp.float32)
    out_big = jax.block_until_ready(cloud_identity(cloudy_big, pred_big))
    assert out_big.shape == pred_big.shape
    assert jnp.allclose(out_big, ref(pred_big), atol=1e-5, rtol=1e-5)

    # 3) Ragged last dim (not a multiple of 128): zero-copy collapsed-2D path
    #    with a full-width lane block (no pad, no output slice).
    cloudy_odd = jax.random.normal(k5, (3, 5, 96, 1000), dtype=jnp.float32)
    pred_odd = jax.random.normal(k6, (3, 5, 96, 1000), dtype=jnp.float32)
    out_odd = jax.block_until_ready(cloud_identity(cloudy_odd, pred_odd))
    assert out_odd.shape == pred_odd.shape
    assert jnp.allclose(out_odd, ref(pred_odd), atol=1e-5, rtol=1e-5)

    # 4) bf16 input: native bf16 compute on v6e/v7x, f32 compute on v5e.
    cloudy_bf = jax.random.normal(k7, (8, 16, 128, 128), dtype=jnp.bfloat16)
    pred_bf = jax.random.normal(k8, (8, 16, 128, 128), dtype=jnp.bfloat16)
    out_bf = jax.block_until_ready(cloud_identity(cloudy_bf, pred_bf))
    assert out_bf.shape == pred_bf.shape
    assert out_bf.dtype == jnp.bfloat16
    assert jnp.allclose(out_bf.astype(jnp.float32), ref(pred_bf), atol=3e-2)

    print("KERNEL_OK")
</pallas_src>

<mosaic_0001>
module attributes {stable_mosaic.version = 11 : i64} {
  func.func @_cloud_identity_kernel(%arg0: i32, %arg1: i32, %arg2: memref<2048x256xf32, #tpu.memory_space<vmem>>, %arg3: memref<2048x256xf32, #tpu.memory_space<vmem>>) attributes {dimension_semantics = [#tpu.dimension_semantics<parallel>, #tpu.dimension_semantics<parallel>], iteration_bounds = array<i64: 4, 1>, scalar_prefetch = 0 : i64, scratch_operands = 0 : i64, tpu.core_type = #tpu.core_type<tc>, window_params = [{transform_indices = @transform_0, window_bounds = array<i64: 2048, 256>}, {transform_indices = @transform_1, window_bounds = array<i64: 2048, 256>}]} {
    %c0 = arith.constant 0 : index
    %c0_0 = arith.constant 0 : index
    %0 = vector.load %arg2[%c0, %c0_0] : memref<2048x256xf32, #tpu.memory_space<vmem>>, vector<2048x256xf32>
    %1 = math.tanh %0 : vector<2048x256xf32>
    %cst = arith.constant 5.000000e-01 : f32
    %2 = vector.broadcast %cst : f32 to vector<2048x256xf32>
    %3 = arith.mulf %1, %2 : vector<2048x256xf32>
    %cst_1 = arith.constant 5.000000e-01 : f32
    %4 = vector.broadcast %cst_1 : f32 to vector<2048x256xf32>
    %5 = arith.subf %3, %4 : vector<2048x256xf32>
    %c0_2 = arith.constant 0 : index
    %c0_3 = arith.constant 0 : index
    %6 = vector.load %arg3[%c0_2, %c0_3] : memref<2048x256xf32, #tpu.memory_space<vmem>>, vector<2048x256xf32>
    tpu.vector_store %arg3[%c0_2, %c0_3], %5 {strides = array<i32>} : memref<2048x256xf32, #tpu.memory_space<vmem>>, vector<2048x256xf32>,
    return
  }
  func.func @transform_0(%arg0: i32, %arg1: i32) -> (i32, i32) {
    %c0_i32 = arith.constant 0 : i32
    return %arg0, %arg1 : i32, i32
  }
  func.func @transform_1(%arg0: i32, %arg1: i32) -> (i32, i32) {
    %c0_i32 = arith.constant 0 : i32
    return %arg0, %arg1 : i32, i32
  }
}

</mosaic_0001>

<bundles_post_ra>
// kernel: tpu_custom_call.1
= control target key start
LH: loop header
LB: loop body
LE: loop exit
PB: predicated region body
PF: predicated region fallthrough
CT: control target
= control target key end

     0   :  { %6 = vsyncpa [#allocation3], 0  ;;  %s5748_s0 = inlined_call_operand.hbm [shape: f32[8192,256], index: 0, kind: input, shape index: {}]   ;;  %s5749_s1 = inlined_call_operand.hbm [shape: f32[8192,256], index: 1, kind: output, shape index: {}]  }
   0x1   :  { %8 = vsyncpa [#allocation3 + $0x1], 0 }
   0x2   :  { %9 = vsyncpa [#allocation4], 0 }
   0x3   :  { %11 = vsyncpa [#allocation4 + $0x1], 0  ;;  %s4571_s6 = smov 0   ;;  %s4573_s7 = smov 0  }
   0x4   :  { %s4575_s8 = smov 0   ;;  %s4577_s9 = smov 0  }
   0x5   :  { %s4579_s10 = smov 0   ;;  %s4581_s11 = smov 0  }
   0x6 LB: > { %s2822_s12 = sadd.s32 4294967295, %s4553_s11   ;;  %s2823_s13 = sadd.s32 4294967294, %s4553_s11   ;;  %s4553_s11 = sphi %s4581_s11, %s17_s11   ;;  %s4549_s10 = sphi %s4579_s10, %s5759_s10   ;;  %s4545_s9 = sphi %s4577_s9, %s5758_s9   ;;  %s4541_s8 = sphi %s4575_s8, %s5757_s8   ;;  %s4537_s7 = sphi %s4573_s7, %s5756_s7   ;;  %s4533_s6 = sphi %s4571_s6, %s5755_s6  }
   0x7   : > { %s29_s14 = sadd.s32 1, %s4549_s10  ;;  %s38_s15 = sadd.s32 1, %s4541_s8 }
   0x8   : > { %p31_p0 = scmp.ge.s32.totalorder %s29_s14, 4  ;;  %p45_p1 = scmp.ne.s32.totalorder %s4541_s8, %s4537_s7 }
   0x9   : > { %p46_p2 = scmp.eq.s32.totalorder %s4553_s11, 0  ;;  %p51_p3 = scmp.ne.s32.totalorder %s4537_s7, %s4533_s6 }
   0xa   : > { %s5761_s14 = smov (%p31_p0, %s29_s14), 0  ;;  %p52_p5 = scmp.eq.s32.totalorder %s2822_s12, 0 }
   0xb   : > { %p4612_p4 = por %p46_p2, %p45_p1  ;;  %s33_s17 = ssub.s32 %s4549_s10, %s5761_s14 }
   0xc   : > { %p77_p6 = scmp.eq.s32.totalorder %s2822_s12, 3  ;;  %p36_p7 = scmp.eq.s32.totalorder %s33_s17, 0 }
   0xd   : > { %p4618_p8 = por %p52_p5, %p51_p3  ;;  %p83_p10 = scmp.eq.s32.totalorder %s2823_s13, 3 }
   0xe   : > { %p4622_p9 = por %p77_p6, %p45_p1  ;;  %p3367_p12 = scmp.lt.s32.totalorder %s4553_s11, 4 }
   0xf   : > { %s4627_s20 = scalar_select %p36_p7, %s4541_s8, %s38_s15  }
  0x10   : > { %p4629_p11 = por %p83_p10, %p51_p3  ;;  %s103_s22 = sand.u32 1, %s4541_s8  }
  0x11   : > { %s2826_s23 = sshll.u32 %s103_s22, 12  ;;  %s3352_s24 = sshll.u32 %s4549_s10, 16 }
  0x12   : > { %s116_s27 = scalar_lea.hbm %s5748_s0, %s3352_s24  ;;  %s107_s28 = scalar_lea.vmem [#allocation2], %s2826_s23 }
  0x13   : > { %s117_s29 = sshll.u32 %s107_s28, 4  ;;  %p4641_p13 = pnand %p3367_p12, %p4612_p4  ;;  %s118_s29 = int_to_ptr.vmem [resolvable:$true] %s117_s29 }
  0x14   : > { %p2830_p0 = scmp.ge.s32.totalorder %s4553_s11, 1  ;;  %s104_s2 = scalar_lea.sflag [#allocation3], %s103_s22 }
  0x15   : > { %p4447_p1 = pneg %p4641_p13  ;;  %s4458_s3 = scalar_lea.vmem %s118_s29, 65536 }
  0x16   : > { %p4459_p2 = scmp.ne.s32.totalorder %s118_s29, %s4458_s3  ;;  %s4555_s4 = smov [#allocation2]  }
  0x17   : > { %s4463_s5 = sshll.u32 %s4555_s4, 4  ;;  %s4464_s5 = int_to_ptr.vmem [resolvable:$false] %s4463_s5 }
  0x18   : > { %p4461_p3 = pnand %p4459_p2, %p4447_p1  ;;  %s4465_s12 = scalar_lea.vmem %s4464_s5, 131072 }
  0x19   : > { %p4466_p6 = scmp.lt.s32.totalorder %s118_s29, %s4464_s5  ;;  %p4467_p7 = scmp.lt.s32.totalorder %s4465_s12, %s4458_s3 }
  0x1a   : > { %p4462_p5 = pneg %p4461_p3 }
  0x1b   : > { %p4468_p10 = por %p4467_p7, %p4466_p6 }
  0x1d   : > { %p4469_p4 = pnand %p4468_p10, %p4462_p5 }
  0x1f   : > { %4472 = shalt.err (!%p4469_p4)
}
  0x20   : > { %s4556_s13 = smov 256   ;;  %s4557_s15 = smov 16  }
  0x21   : > { %3362 = dma.hbm_to_vmem [thread:$0]  (!%p4641_p13), %s116_s27, 65536, %s118_s29, %s104_s2, %s4556_s13, %s4556_s13, %s4557_s15  }
  0x22   : > { %p125_p12 = scmp.lt.s32.totalorder %s4553_s11, 5 }
  0x24   : > { %p126_p1 = pnand %p2830_p0, %p125_p12 }
  0x25   : > { %s4654_s16 = sand.u32 (!%p126_p1), 1, %s4537_s7  }
  0x26   : > { %129 = sbr.rel (%p126_p1) target bundleno = 588 (0x24c), region = 24  ;;  %s2831_s17 = sshll.u32 (!%p126_p1), %s4654_s16, 12 }
  0x27   : > { %s132_s22 = scalar_lea.sflag (!%p126_p1), [#allocation3], %s4654_s16  ;;  %s4660_s23 = scalar_lea.vmem (!%p126_p1), [#allocation2], %s2831_s17 }
  0x2b   : > { %4524 = dma.done.wait (%p4618_p8), %s132_s22, 65536  }
  0x2c   : > { %4526 = vsyncadd (%p4618_p8), %s132_s22, 4294901760  ;;  %v158_v0 = vld [vmem:[%s4660_s23] sm:$0xff]  ;;  %v159_v1 = vld [vmem:[%s4660_s23 + $0x8] sm:$0xff]  ;;  %s4689_s18 = scalar_lea.vmem [#allocation5], %s2831_s17  ;;  %s3354_s24 = sshll.u32 %s4545_s9, 16 }
  0x2d   : > { %v160_v2 = vld [vmem:[%s4660_s23 + $0x10] sm:$0xff]  ;;  %3421 = vtanh.f32 %v158_v0  ;;  %v161_v3 = vld [vmem:[%s4660_s23 + $0x18] sm:$0xff]  ;;  %v162_v4 = vld [vmem:[%s4660_s23 + $0x20] sm:$0xff]  ;;  %s2735_s25 = sshll.u32 %s4689_s18, 4  ;;  %s5696_s28 = scalar_lea.hbm %s5749_s1, %s3354_s24  ;;  %s5698_s25 = int_to_ptr.vmem [resolvable:$true] %s2735_s25 }
  0x2e   : > { %3423 = vtanh.f32 %v159_v1  ;;  %v163_v5 = vld [vmem:[%s4660_s23 + $0x28] sm:$0xff]  ;;  %v164_v6 = vld [vmem:[%s4660_s23 + $0x30] sm:$0xff]  ;;  %v165_v7 = vld [vmem:[%s4660_s23 + $0x38] sm:$0xff]  ;;  %s2719_s9 = scalar_lea.sflag [#allocation4], %s4654_s16  ;;  %s4473_s29 = scalar_lea.vmem %s5698_s25, 65536 }
  0x2f   : > { %3425 = vtanh.f32 %v160_v2  ;;  %v166_v8 = vld [vmem:[%s4660_s23 + $0x40] sm:$0xff]  ;;  %v167_v9 = vld [vmem:[%s4660_s23 + $0x48] sm:$0xff]  ;;  %v168_v10 = vld [vmem:[%s4660_s23 + $0x50] sm:$0xff]  ;;  %p4474_p8 = scmp.ne.s32.totalorder %s5698_s25, %s4473_s29  ;;  %s4558_s30 = smov [#allocation5]  }
  0x30   : > { %3427 = vtanh.f32 %v161_v3  ;;  %v169_v11 = vld [vmem:[%s4660_s23 + $0x58] sm:$0xff]  ;;  %v170_v12 = vld [vmem:[%s4660_s23 + $0x60] sm:$0xff]  ;;  %v171_v13 = vld [vmem:[%s4660_s23 + $0x68] sm:$0xff]  ;;  %s4477_s2 = sshll.u32 %s4558_s30, 4  ;;  %s4478_s2 = int_to_ptr.vmem [resolvable:$false] %s4477_s2 }
  0x31   : > { %3429 = vtanh.f32 %v162_v4  ;;  %v172_v14 = vld [vmem:[%s4660_s23 + $0x70] sm:$0xff]  ;;  %v173_v15 = vld [vmem:[%s4660_s23 + $0x78] sm:$0xff]  ;;  %v174_v17 = vld [vmem:[%s4660_s23 + $0x80] sm:$0xff]  ;;  %p4475_p13 = pnand %p4474_p8, %p4622_p9  ;;  %s4479_s3 = scalar_lea.vmem %s4478_s2, 131072 }
  0x32   : > { %3431 = vtanh.f32 %v163_v5  ;;  %v175_v20 = vld [vmem:[%s4660_s23 + $0x88] sm:$0xff]  ;;  %v176_v23 = vld [vmem:[%s4660_s23 + $0x90] sm:$0xff]  ;;  %v177_v27 = vld [vmem:[%s4660_s23 + $0x98] sm:$0xff]  ;;  %p4480_p2 = scmp.lt.s32.totalorder %s5698_s25, %s4478_s2  ;;  %p4481_p3 = scmp.lt.s32.totalorder %s4479_s3, %s4473_s29 }
  0x33   : > { %3433 = vtanh.f32 %v164_v6  ;;  %v178_v31 = vld [vmem:[%s4660_s23 + $0xa0] sm:$0xff]  ;;  %v179_v35 = vld [vmem:[%s4660_s23 + $0xa8] sm:$0xff]  ;;  %v180_v39 = vld [vmem:[%s4660_s23 + $0xb0] sm:$0xff]  ;;  %p4476_p0 = pneg %p4475_p13 }
  0x34   : > { %3435 = vtanh.f32 %v165_v7  ;;  %v181_v43 = vld [vmem:[%s4660_s23 + $0xb8] sm:$0xff]  ;;  %v182_v47 = vld [vmem:[%s4660_s23 + $0xc0] sm:$0xff]  ;;  %v183_v51 = vld [vmem:[%s4660_s23 + $0xc8] sm:$0xff]  ;;  %p4482_p5 = por %p4481_p3, %p4480_p2 }
  0x35   : > { %3437 = vtanh.f32 %v166_v8  ;;  %v184_v55 = vld [vmem:[%s4660_s23 + $0xd0] sm:$0xff]  ;;  %v185_v59 = vld [vmem:[%s4660_s23 + $0xd8] sm:$0xff]  ;;  %v186_v63 = vld [vmem:[%s4660_s23 + $0xe0] sm:$0xff] }
  0x36   : > { %3439 = vtanh.f32 %v167_v9  ;;  %v187_v3 = vld [vmem:[%s4660_s23 + $0xe8] sm:$0xff]  ;;  %v188_v7 = vld [vmem:[%s4660_s23 + $0xf0] sm:$0xff]  ;;  %p4483_p6 = pnand %p4482_p5, %p4476_p0 }
  0x37   : > { %3441 = vtanh.f32 %v168_v10 }
  0x38   : > { %3443 = vtanh.f32 %v169_v11  ;;  %v189_v11 = vld [vmem:[%s4660_s23 + $0xf8] sm:$0xff] }
  0x39   : > { %3445 = vtanh.f32 %v170_v12 }
  0x3a   : > { %v3422_v16 = vpop.eup %3421  ;;  %3447 = vtanh.f32 %v171_v13 }
  0x3b   : > { %v3424_v18 = vpop.eup %3423  ;;  %v1182_v19 = vmul.f32 0.5, %v3422_v16  ;;  %3449 = vtanh.f32 %v172_v14 }
  0x3c   : > { %v3426_v21 = vpop.eup %3425  ;;  %v1183_v22 = vmul.f32 0.5, %v3424_v18  ;;  %3451 = vtanh.f32 %v173_v15  ;;  %v190_v15 = vld [vmem:[%s4660_s23 + $0x100] sm:$0xff] }
  0x3d   : > { %v3428_v24 = vpop.eup %3427  ;;  %v2833_v25 = vadd.f32 -0.5, %v1182_v19  ;;  %v1184_v26 = vmul.f32 0.5, %v3426_v21  ;;  %3453 = vtanh.f32 %v174_v17  ;;  %v191_v19 = vld [vmem:[%s4660_s23 + $0x108] sm:$0xff] }
  0x3e   : > { %v3430_v28 = vpop.eup %3429  ;;  %v2834_v29 = vadd.f32 -0.5, %v1183_v22  ;;  %v1185_v30 = vmul.f32 0.5, %v3428_v24  ;;  %3455 = vtanh.f32 %v175_v20 }
  0x3f   : > { %v3432_v32 = vpop.eup %3431  ;;  %2206 = vst [vmem:[%s4689_s18] sm:$0xff] %v2833_v25  ;;  %v2835_v33 = vadd.f32 -0.5, %v1184_v26  ;;  %v1186_v34 = vmul.f32 0.5, %v3430_v28  ;;  %3457 = vtanh.f32 %v176_v23  ;;  %v192_v23 = vld [vmem:[%s4660_s23 + $0x110] sm:$0xff] }
  0x40   : > { %v3434_v36 = vpop.eup %3433  ;;  %2207 = vst [vmem:[%s4689_s18 + $0x8] sm:$0xff] %v2834_v29  ;;  %v2836_v37 = vadd.f32 -0.5, %v1185_v30  ;;  %v1187_v38 = vmul.f32 0.5, %v3432_v32  ;;  %3459 = vtanh.f32 %v177_v27  ;;  %v193_v27 = vld [vmem:[%s4660_s23 + $0x118] sm:$0xff] }
  0x41   : > { %v3436_v40 = vpop.eup %3435  ;;  %2208 = vst [vmem:[%s4689_s18 + $0x10] sm:$0xff] %v2835_v33  ;;  %v2837_v41 = vadd.f32 -0.5, %v1186_v34  ;;  %v1188_v42 = vmul.f32 0.5, %v3434_v36  ;;  %3461 = vtanh.f32 %v178_v31  ;;  %v194_v31 = vld [vmem:[%s4660_s23 + $0x120] sm:$0xff] }
  0x42   : > { %v3438_v44 = vpop.eup %3437  ;;  %2209 = vst [vmem:[%s4689_s18 + $0x18] sm:$0xff] %v2836_v37  ;;  %v2838_v45 = vadd.f32 -0.5, %v1187_v38  ;;  %v1189_v46 = vmul.f32 0.5, %v3436_v40  ;;  %3463 = vtanh.f32 %v179_v35  ;;  %v195_v35 = vld [vmem:[%s4660_s23 + $0x128] sm:$0xff] }
  0x43   : > { %v3440_v48 = vpop.eup %3439  ;;  %2210 = vst [vmem:[%s4689_s18 + $0x20] sm:$0xff] %v2837_v41  ;;  %v2839_v49 = vadd.f32 -0.5, %v1188_v42  ;;  %v1190_v50 = vmul.f32 0.5, %v3438_v44  ;;  %3465 = vtanh.f32 %v180_v39  ;;  %v196_v39 = vld [vmem:[%s4660_s23 + $0x130] sm:$0xff] }
  0x44   : > { %v3442_v52 = vpop.eup %3441  ;;  %2211 = vst [vmem:[%s4689_s18 + $0x28] sm:$0xff] %v2838_v45  ;;  %v2840_v53 = vadd.f32 -0.5, %v1189_v46  ;;  %v1191_v54 = vmul.f32 0.5, %v3440_v48  ;;  %3467 = vtanh.f32 %v181_v43  ;;  %v197_v43 = vld [vmem:[%s4660_s23 + $0x138] sm:$0xff] }
  0x45   : > { %v3444_v56 = vpop.eup %3443  ;;  %2212 = vst [vmem:[%s4689_s18 + $0x30] sm:$0xff] %v2839_v49  ;;  %v2841_v57 = vadd.f32 -0.5, %v1190_v50  ;;  %v1192_v58 = vmul.f32 0.5, %v3442_v52  ;;  %3469 = vtanh.f32 %v182_v47  ;;  %v198_v47 = vld [vmem:[%s4660_s23 + $0x140] sm:$0xff] }
  0x46   : > { %v3446_v60 = vpop.eup %3445  ;;  %2213 = vst [vmem:[%s4689_s18 + $0x38] sm:$0xff] %v2840_v53  ;;  %v2842_v61 = vadd.f32 -0.5, %v1191_v54  ;;  %v1193_v62 = vmul.f32 0.5, %v3444_v56  ;;  %3471 = vtanh.f32 %v183_v51  ;;  %v199_v51 = vld [vmem:[%s4660_s23 + $0x148] sm:$0xff] }
  0x47   : > { %v3448_v0 = vpop.eup %3447  ;;  %2214 = vst [vmem:[%s4689_s18 + $0x40] sm:$0xff] %v2841_v57  ;;  %v2843_v1 = vadd.f32 -0.5, %v1192_v58  ;;  %v1194_v2 = vmul.f32 0.5, %v3446_v60  ;;  %3473 = vtanh.f32 %v184_v55  ;;  %v200_v55 = vld [vmem:[%s4660_s23 + $0x150] sm:$0xff] }
  0x48   : > { %v3450_v4 = vpop.eup %3449  ;;  %2215 = vst [vmem:[%s4689_s18 + $0x48] sm:$0xff] %v2842_v61  ;;  %v2844_v5 = vadd.f32 -0.5, %v1193_v62  ;;  %v1195_v6 = vmul.f32 0.5, %v3448_v0  ;;  %3475 = vtanh.f32 %v185_v59  ;;  %v201_v59 = vld [vmem:[%s4660_s23 + $0x158] sm:$0xff] }
  0x49   : > { %v3452_v8 = vpop.eup %3451  ;;  %2216 = vst [vmem:[%s4689_s18 + $0x50] sm:$0xff] %v2843_v1  ;;  %v2845_v9 = vadd.f32 -0.5, %v1194_v2  ;;  %v1196_v10 = vmul.f32 0.5, %v3450_v4  ;;  %3477 = vtanh.f32 %v186_v63  ;;  %v202_v63 = vld [vmem:[%s4660_s23 + $0x160] sm:$0xff] }
  0x4a   : > { %v3454_v12 = vpop.eup %3453  ;;  %2217 = vst [vmem:[%s4689_s18 + $0x58] sm:$0xff] %v2844_v5  ;;  %v2846_v13 = vadd.f32 -0.5, %v1195_v6  ;;  %v1197_v14 = vmul.f32 0.5, %v3452_v8  ;;  %3479 = vtanh.f32 %v187_v3  ;;  %v203_v3 = vld [vmem:[%s4660_s23 + $0x168] sm:$0xff] }
  0x4b   : > { %v3456_v16 = vpop.eup %3455  ;;  %2218 = vst [vmem:[%s4689_s18 + $0x60] sm:$0xff] %v2845_v9  ;;  %v2847_v17 = vadd.f32 -0.5, %v1196_v10  ;;  %v1198_v18 = vmul.f32 0.5, %v3454_v12  ;;  %3481 = vtanh.f32 %v188_v7  ;;  %v204_v7 = vld [vmem:[%s4660_s23 + $0x170] sm:$0xff] }
  0x4c   : > { %v3458_v20 = vpop.eup %3457  ;;  %2219 = vst [vmem:[%s4689_s18 + $0x68] sm:$0xff] %v2846_v13  ;;  %v2848_v21 = vadd.f32 -0.5, %v1197_v14  ;;  %v1199_v22 = vmul.f32 0.5, %v3456_v16  ;;  %3483 = vtanh.f32 %v189_v11  ;;  %v205_v11 = vld [vmem:[%s4660_s23 + $0x178] sm:$0xff] }
  0x4d   : > { %v3460_v24 = vpop.eup %3459  ;;  %2220 = vst [vmem:[%s4689_s18 + $0x70] sm:$0xff] %v2847_v17  ;;  %v2849_v25 = vadd.f32 -0.5, %v1198_v18  ;;  %v1200_v26 = vmul.f32 0.5, %v3458_v20  ;;  %3485 = vtanh.f32 %v190_v15  ;;  %v206_v15 = vld [vmem:[%s4660_s23 + $0x180] sm:$0xff] }
  0x4e   : > { %v3462_v28 = vpop.eup %3461  ;;  %2221 = vst [vmem:[%s4689_s18 + $0x78] sm:$0xff] %v2848_v21  ;;  %v2850_v29 = vadd.f32 -0.5, %v1199_v22  ;;  %v1201_v30 = vmul.f32 0.5, %v3460_v24  ;;  %3487 = vtanh.f32 %v191_v19  ;;  %v207_v19 = vld [vmem:[%s4660_s23 + $0x188] sm:$0xff] }
  0x4f   : > { %v3464_v32 = vpop.eup %3463  ;;  %2222 = vst [vmem:[%s4689_s18 + $0x80] sm:$0xff] %v2849_v25  ;;  %v2851_v33 = vadd.f32 -0.5, %v1200_v26  ;;  %v1202_v34 = vmul.f32 0.5, %v3462_v28  ;;  %3489 = vtanh.f32 %v192_v23  ;;  %v208_v23 = vld [vmem:[%s4660_s23 + $0x190] sm:$0xff] }
  0x50   : > { %v3466_v36 = vpop.eup %3465  ;;  %2223 = vst [vmem:[%s4689_s18 + $0x88] sm:$0xff] %v2850_v29  ;;  %v2852_v37 = vadd.f32 -0.5, %v1201_v30  ;;  %v1203_v38 = vmul.f32 0.5, %v3464_v32  ;;  %3491 = vtanh.f32 %v193_v27  ;;  %v209_v27 = vld [vmem:[%s4660_s23 + $0x198] sm:$0xff] }
  0x51   : > { %v3468_v40 = vpop.eup %3467  ;;  %2224 = vst [vmem:[%s4689_s18 + $0x90] sm:$0xff] %v2851_v33  ;;  %v2853_v41 = vadd.f32 -0.5, %v1202_v34  ;;  %v1204_v42 = vmul.f32 0.5, %v3466_v36  ;;  %3493 = vtanh.f32 %v194_v31  ;;  %v210_v31 = vld [vmem:[%s4660_s23 + $0x1a0] sm:$0xff] }
  0x52   : > { %v3470_v44 = vpop.eup %3469  ;;  %2225 = vst [vmem:[%s4689_s18 + $0x98] sm:$0xff] %v2852_v37  ;;  %v2854_v45 = vadd.f32 -0.5, %v1203_v38  ;;  %v1205_v46 = vmul.f32 0.5, %v3468_v40  ;;  %3495 = vtanh.f32 %v195_v35  ;;  %v211_v35 = vld [vmem:[%s4660_s23 + $0x1a8] sm:$0xff] }
  0x53   : > { %v3472_v48 = vpop.eup %3471  ;;  %2226 = vst [vmem:[%s4689_s18 + $0xa0] sm:$0xff] %v2853_v41  ;;  %v2855_v49 = vadd.f32 -0.5, %v1204_v42  ;;  %v1206_v50 = vmul.f32 0.5, %v3470_v44  ;;  %3497 = vtanh.f32 %v196_v39  ;;  %v212_v39 = vld [vmem:[%s4660_s23 + $0x1b0] sm:$0xff] }
  0x54   : > { %v3474_v52 = vpop.eup %3473  ;;  %2227 = vst [vmem:[%s4689_s18 + $0xa8] sm:$0xff] %v2854_v45  ;;  %v2856_v53 = vadd.f32 -0.5, %v1205_v46  ;;  %v1207_v54 = vmul.f32 0.5, %v3472_v48  ;;  %3499 = vtanh.f32 %v197_v43  ;;  %v213_v43 = vld [vmem:[%s4660_s23 + $0x1b8] sm:$0xff] }
  0x55   : > { %v3476_v56 = vpop.eup %3475  ;;  %2228 = vst [vmem:[%s4689_s18 + $0xb0] sm:$0xff] %v2855_v49  ;;  %v2857_v57 = vadd.f32 -0.5, %v1206_v50  ;;  %v1208_v58 = vmul.f32 0.5, %v3474_v52  ;;  %3501 = vtanh.f32 %v198_v47  ;;  %v214_v47 = vld [vmem:[%s4660_s23 + $0x1c0] sm:$0xff] }
  0x56   : > { %v3478_v60 = vpop.eup %3477  ;;  %2229 = vst [vmem:[%s4689_s18 + $0xb8] sm:$0xff] %v2856_v53  ;;  %v2858_v61 = vadd.f32 -0.5, %v1207_v54  ;;  %v1209_v62 = vmul.f32 0.5, %v3476_v56  ;;  %3503 = vtanh.f32 %v199_v51  ;;  %v215_v51 = vld [vmem:[%s4660_s23 + $0x1c8] sm:$0xff] }
  0x57   : > { %v3480_v0 = vpop.eup %3479  ;;  %2230 = vst [vmem:[%s4689_s18 + $0xc0] sm:$0xff] %v2857_v57  ;;  %v2859_v1 = vadd.f32 -0.5, %v1208_v58  ;;  %v1210_v2 = vmul.f32 0.5, %v3478_v60  ;;  %3505 = vtanh.f32 %v200_v55  ;;  %v216_v55 = vld [vmem:[%s4660_s23 + $0x1d0] sm:$0xff] }
  0x58   : > { %v3482_v4 = vpop.eup %3481  ;;  %2231 = vst [vmem:[%s4689_s18 + $0xc8] sm:$0xff] %v2858_v61  ;;  %v2860_v5 = vadd.f32 -0.5, %v1209_v62  ;;  %v1211_v6 = vmul.f32 0.5, %v3480_v0  ;;  %3507 = vtanh.f32 %v201_v59  ;;  %v217_v59 = vld [vmem:[%s4660_s23 + $0x1d8] sm:$0xff] }
  0x59   : > { %v3484_v8 = vpop.eup %3483  ;;  %2232 = vst [vmem:[%s4689_s18 + $0xd0] sm:$0xff] %v2859_v1  ;;  %v2861_v9 = vadd.f32 -0.5, %v1210_v2  ;;  %v1212_v10 = vmul.f32 0.5, %v3482_v4  ;;  %3509 = vtanh.f32 %v202_v63  ;;  %v218_v63 = vld [vmem:[%s4660_s23 + $0x1e0] sm:$0xff] }
  0x5a   : > { %v3486_v12 = vpop.eup %3485  ;;  %2233 = vst [vmem:[%s4689_s18 + $0xd8] sm:$0xff] %v2860_v5  ;;  %v2862_v13 = vadd.f32 -0.5, %v1211_v6  ;;  %v1213_v14 = vmul.f32 0.5, %v3484_v8  ;;  %3511 = vtanh.f32 %v203_v3  ;;  %v219_v3 = vld [vmem:[%s4660_s23 + $0x1e8] sm:$0xff] }
  0x5b   : > { %v3488_v16 = vpop.eup %3487  ;;  %2234 = vst [vmem:[%s4689_s18 + $0xe0] sm:$0xff] %v2861_v9  ;;  %v2863_v17 = vadd.f32 -0.5, %v1212_v10  ;;  %v1214_v18 = vmul.f32 0.5, %v3486_v12  ;;  %3513 = vtanh.f32 %v204_v7  ;;  %v220_v7 = vld [vmem:[%s4660_s23 + $0x1f0] sm:$0xff] }
  0x5c   : > { %v3490_v20 = vpop.eup %3489  ;;  %2235 = vst [vmem:[%s4689_s18 + $0xe8] sm:$0xff] %v2862_v13  ;;  %v2864_v21 = vadd.f32 -0.5, %v1213_v14  ;;  %v1215_v22 = vmul.f32 0.5, %v3488_v16  ;;  %3515 = vtanh.f32 %v205_v11  ;;  %v221_v11 = vld [vmem:[%s4660_s23 + $0x1f8] sm:$0xff] }
  0x5d   : > { %v3492_v24 = vpop.eup %3491  ;;  %2236 = vst [vmem:[%s4689_s18 + $0xf0] sm:$0xff] %v2863_v17  ;;  %v2865_v25 = vadd.f32 -0.5, %v1214_v18  ;;  %v1216_v26 = vmul.f32 0.5, %v3490_v20  ;;  %3517 = vtanh.f32 %v206_v15  ;;  %v222_v15 = vld [vmem:[%s4660_s23 + $0x200] sm:$0xff] }
  0x5e   : > { %v3494_v28 = vpop.eup %3493  ;;  %2237 = vst [vmem:[%s4689_s18 + $0xf8] sm:$0xff] %v2864_v21  ;;  %v2866_v29 = vadd.f32 -0.5, %v1215_v22  ;;  %v1217_v30 = vmul.f32 0.5, %v3492_v24  ;;  %3519 = vtanh.f32 %v207_v19  ;;  %v223_v19 = vld [vmem:[%s4660_s23 + $0x208] sm:$0xff] }
  0x5f   : > { %v3496_v32 = vpop.eup %3495  ;;  %2238 = vst [vmem:[%s4689_s18 + $0x100] sm:$0xff] %v2865_v25  ;;  %v2867_v33 = vadd.f32 -0.5, %v1216_v26  ;;  %v1218_v34 = vmul.f32 0.5, %v3494_v28  ;;  %3521 = vtanh.f32 %v208_v23  ;;  %v224_v23 = vld [vmem:[%s4660_s23 + $0x210] sm:$0xff] }
  0x60   : > { %v3498_v36 = vpop.eup %3497  ;;  %2239 = vst [vmem:[%s4689_s18 + $0x108] sm:$0xff] %v2866_v29  ;;  %v2868_v37 = vadd.f32 -0.5, %v1217_v30  ;;  %v1219_v38 = vmul.f32 0.5, %v3496_v32  ;;  %3523 = vtanh.f32 %v209_v27  ;;  %v225_v27 = vld [vmem:[%s4660_s23 + $0x218] sm:$0xff] }
  0x61   : > { %v3500_v40 = vpop.eup %3499  ;;  %2240 = vst [vmem:[%s4689_s18 + $0x110] sm:$0xff] %v2867_v33  ;;  %v2869_v41 = vadd.f32 -0.5, %v1218_v34  ;;  %v1220_v42 = vmul.f32 0.5, %v3498_v36  ;;  %3525 = vtanh.f32 %v210_v31  ;;  %v226_v31 = vld [vmem:[%s4660_s23 + $0x220] sm:$0xff] }
  0x62   : > { %v3502_v44 = vpop.eup %3501  ;;  %2241 = vst [vmem:[%s4689_s18 + $0x118] sm:$0xff] %v2868_v37  ;;  %v2870_v45 = vadd.f32 -0.5, %v1219_v38  ;;  %v1221_v46 = vmul.f32 0.5, %v3500_v40  ;;  %3527 = vtanh.f32 %v211_v35  ;;  %v227_v35 = vld [vmem:[%s4660_s23 + $0x228] sm:$0xff] }
  0x63   : > { %v3504_v48 = vpop.eup %3503  ;;  %2242 = vst [vmem:[%s4689_s18 + $0x120] sm:$0xff] %v2869_v41  ;;  %v2871_v49 = vadd.f32 -0.5, %v1220_v42  ;;  %v1222_v50 = vmul.f32 0.5, %v3502_v44  ;;  %3529 = vtanh.f32 %v212_v39  ;;  %v228_v39 = vld [vmem:[%s4660_s23 + $0x230] sm:$0xff] }
  0x64   : > { %v3506_v52 = vpop.eup %3505  ;;  %2243 = vst [vmem:[%s4689_s18 + $0x128] sm:$0xff] %v2870_v45  ;;  %v2872_v53 = vadd.f32 -0.5, %v1221_v46  ;;  %v1223_v54 = vmul.f32 0.5, %v3504_v48  ;;  %3531 = vtanh.f32 %v213_v43  ;;  %v229_v43 = vld [vmem:[%s4660_s23 + $0x238] sm:$0xff] }
  0x65   : > { %v3508_v56 = vpop.eup %3507  ;;  %2244 = vst [vmem:[%s4689_s18 + $0x130] sm:$0xff] %v2871_v49  ;;  %v2873_v57 = vadd.f32 -0.5, %v1222_v50  ;;  %v1224_v58 = vmul.f32 0.5, %v3506_v52  ;;  %3533 = vtanh.f32 %v214_v47  ;;  %v230_v47 = vld [vmem:[%s4660_s23 + $0x240] sm:$0xff] }
  0x66   : > { %v3510_v60 = vpop.eup %3509  ;;  %2245 = vst [vmem:[%s4689_s18 + $0x138] sm:$0xff] %v2872_v53  ;;  %v2874_v61 = vadd.f32 -0.5, %v1223_v54  ;;  %v1225_v62 = vmul.f32 0.5, %v3508_v56  ;;  %3535 = vtanh.f32 %v215_v51  ;;  %v231_v51 = vld [vmem:[%s4660_s23 + $0x248] sm:$0xff] }
  0x67   : > { %v3512_v0 = vpop.eup %3511  ;;  %2246 = vst [vmem:[%s4689_s18 + $0x140] sm:$0xff] %v2873_v57  ;;  %v2875_v1 = vadd.f32 -0.5, %v1224_v58  ;;  %v1226_v2 = vmul.f32 0.5, %v3510_v60  ;;  %3537 = vtanh.f32 %v216_v55  ;;  %v232_v55 = vld [vmem:[%s4660_s23 + $0x250] sm:$0xff] }
  0x68   : > { %v3514_v4 = vpop.eup %3513  ;;  %2247 = vst [vmem:[%s4689_s18 + $0x148] sm:$0xff] %v2874_v61  ;;  %v2876_v5 = vadd.f32 -0.5, %v1225_v62  ;;  %v1227_v6 = vmul.f32 0.5, %v3512_v0  ;;  %3539 = vtanh.f32 %v217_v59  ;;  %v233_v59 = vld [vmem:[%s4660_s23 + $0x258] sm:$0xff] }
  0x69   : > { %v3516_v8 = vpop.eup %3515  ;;  %2248 = vst [vmem:[%s4689_s18 + $0x150] sm:$0xff] %v2875_v1  ;;  %v2877_v9 = vadd.f32 -0.5, %v1226_v2  ;;  %v1228_v10 = vmul.f32 0.5, %v3514_v4  ;;  %3541 = vtanh.f32 %v218_v63  ;;  %v234_v63 = vld [vmem:[%s4660_s23 + $0x260] sm:$0xff] }
  0x6a   : > { %v3518_v12 = vpop.eup %3517  ;;  %2249 = vst [vmem:[%s4689_s18 + $0x158] sm:$0xff] %v2876_v5  ;;  %v2878_v13 = vadd.f32 -0.5, %v1227_v6  ;;  %v1229_v14 = vmul.f32 0.5, %v3516_v8  ;;  %3543 = vtanh.f32 %v219_v3  ;;  %v235_v3 = vld [vmem:[%s4660_s23 + $0x268] sm:$0xff] }
  0x6b   : > { %v3520_v16 = vpop.eup %3519  ;;  %2250 = vst [vmem:[%s4689_s18 + $0x160] sm:$0xff] %v2877_v9  ;;  %v2879_v17 = vadd.f32 -0.5, %v1228_v10  ;;  %v1230_v18 = vmul.f32 0.5, %v3518_v12  ;;  %3545 = vtanh.f32 %v220_v7  ;;  %v236_v7 = vld [vmem:[%s4660_s23 + $0x270] sm:$0xff] }
  0x6c   : > { %v3522_v20 = vpop.eup %3521  ;;  %2251 = vst [vmem:[%s4689_s18 + $0x168] sm:$0xff] %v2878_v13  ;;  %v2880_v21 = vadd.f32 -0.5, %v1229_v14  ;;  %v1231_v22 = vmul.f32 0.5, %v3520_v16  ;;  %3547 = vtanh.f32 %v221_v11  ;;  %v237_v11 = vld [vmem:[%s4660_s23 + $0x278] sm:$0xff] }
  0x6d   : > { %v3524_v24 = vpop.eup %3523  ;;  %2252 = vst [vmem:[%s4689_s18 + $0x170] sm:$0xff] %v2879_v17  ;;  %v2881_v25 = vadd.f32 -0.5, %v1230_v18  ;;  %v1232_v26 = vmul.f32 0.5, %v3522_v20  ;;  %3549 = vtanh.f32 %v222_v15  ;;  %v238_v15 = vld [vmem:[%s4660_s23 + $0x280] sm:$0xff] }
  0x6e   : > { %v3526_v28 = vpop.eup %3525  ;;  %2253 = vst [vmem:[%s4689_s18 + $0x178] sm:$0xff] %v2880_v21  ;;  %v2882_v29 = vadd.f32 -0.5, %v1231_v22  ;;  %v1233_v30 = vmul.f32 0.5, %v3524_v24  ;;  %3551 = vtanh.f32 %v223_v19  ;;  %v239_v19 = vld [vmem:[%s4660_s23 + $0x288] sm:$0xff] }
  0x6f   : > { %v3528_v32 = vpop.eup %3527  ;;  %2254 = vst [vmem:[%s4689_s18 + $0x180] sm:$0xff] %v2881_v25  ;;  %v2883_v33 = vadd.f32 -0.5, %v1232_v26  ;;  %v1234_v34 = vmul.f32 0.5, %v3526_v28  ;;  %3553 = vtanh.f32 %v224_v23  ;;  %v240_v23 = vld [vmem:[%s4660_s23 + $0x290] sm:$0xff] }
  0x70   : > { %v3530_v36 = vpop.eup %3529  ;;  %2255 = vst [vmem:[%s4689_s18 + $0x188] sm:$0xff] %v2882_v29  ;;  %v2884_v37 = vadd.f32 -0.5, %v1233_v30  ;;  %v1235_v38 = vmul.f32 0.5, %v3528_v32  ;;  %3555 = vtanh.f32 %v225_v27  ;;  %v241_v27 = vld [vmem:[%s4660_s23 + $0x298] sm:$0xff] }
  0x71   : > { %v3532_v40 = vpop.eup %3531  ;;  %2256 = vst [vmem:[%s4689_s18 + $0x190] sm:$0xff] %v2883_v33  ;;  %v2885_v41 = vadd.f32 -0.5, %v1234_v34  ;;  %v1236_v42 = vmul.f32 0.5, %v3530_v36  ;;  %3557 = vtanh.f32 %v226_v31  ;;  %v242_v31 = vld [vmem:[%s4660_s23 + $0x2a0] sm:$0xff] }
  0x72   : > { %v3534_v44 = vpop.eup %3533  ;;  %2257 = vst [vmem:[%s4689_s18 + $0x198] sm:$0xff] %v2884_v37  ;;  %v2886_v45 = vadd.f32 -0.5, %v1235_v38  ;;  %v1237_v46 = vmul.f32 0.5, %v3532_v40  ;;  %3559 = vtanh.f32 %v227_v35  ;;  %v243_v35 = vld [vmem:[%s4660_s23 + $0x2a8] sm:$0xff] }
  0x73   : > { %v3536_v48 = vpop.eup %3535  ;;  %2258 = vst [vmem:[%s4689_s18 + $0x1a0] sm:$0xff] %v2885_v41  ;;  %v2887_v49 = vadd.f32 -0.5, %v1236_v42  ;;  %v1238_v50 = vmul.f32 0.5, %v3534_v44  ;;  %3561 = vtanh.f32 %v228_v39  ;;  %v244_v39 = vld [vmem:[%s4660_s23 + $0x2b0] sm:$0xff] }
  0x74   : > { %v3538_v52 = vpop.eup %3537  ;;  %2259 = vst [vmem:[%s4689_s18 + $0x1a8] sm:$0xff] %v2886_v45  ;;  %v2888_v53 = vadd.f32 -0.5, %v1237_v46  ;;  %v1239_v54 = vmul.f32 0.5, %v3536_v48  ;;  %3563 = vtanh.f32 %v229_v43  ;;  %v245_v43 = vld [vmem:[%s4660_s23 + $0x2b8] sm:$0xff] }
  0x75   : > { %v3540_v56 = vpop.eup %3539  ;;  %2260 = vst [vmem:[%s4689_s18 + $0x1b0] sm:$0xff] %v2887_v49  ;;  %v2889_v57 = vadd.f32 -0.5, %v1238_v50  ;;  %v1240_v58 = vmul.f32 0.5, %v3538_v52  ;;  %3565 = vtanh.f32 %v230_v47  ;;  %v246_v47 = vld [vmem:[%s4660_s23 + $0x2c0] sm:$0xff] }
  0x76   : > { %v3542_v60 = vpop.eup %3541  ;;  %2261 = vst [vmem:[%s4689_s18 + $0x1b8] sm:$0xff] %v2888_v53  ;;  %v2890_v61 = vadd.f32 -0.5, %v1239_v54  ;;  %v1241_v62 = vmul.f32 0.5, %v3540_v56  ;;  %3567 = vtanh.f32 %v231_v51  ;;  %v247_v51 = vld [vmem:[%s4660_s23 + $0x2c8] sm:$0xff] }
  0x77   : > { %v3544_v0 = vpop.eup %3543  ;;  %2262 = vst [vmem:[%s4689_s18 + $0x1c0] sm:$0xff] %v2889_v57  ;;  %v2891_v1 = vadd.f32 -0.5, %v1240_v58  ;;  %v1242_v2 = vmul.f32 0.5, %v3542_v60  ;;  %3569 = vtanh.f32 %v232_v55  ;;  %v248_v55 = vld [vmem:[%s4660_s23 + $0x2d0] sm:$0xff] }
  0x78   : > { %v3546_v4 = vpop.eup %3545  ;;  %2263 = vst [vmem:[%s4689_s18 + $0x1c8] sm:$0xff] %v2890_v61  ;;  %v2892_v5 = vadd.f32 -0.5, %v1241_v62  ;;  %v1243_v6 = vmul.f32 0.5, %v3544_v0  ;;  %3571 = vtanh.f32 %v233_v59  ;;  %v249_v59 = vld [vmem:[%s4660_s23 + $0x2d8] sm:$0xff] }
  0x79   : > { %v3548_v8 = vpop.eup %3547  ;;  %2264 = vst [vmem:[%s4689_s18 + $0x1d0] sm:$0xff] %v2891_v1  ;;  %v2893_v9 = vadd.f32 -0.5, %v1242_v2  ;;  %v1244_v10 = vmul.f32 0.5, %v3546_v4  ;;  %3573 = vtanh.f32 %v234_v63  ;;  %v250_v63 = vld [vmem:[%s4660_s23 + $0x2e0] sm:$0xff] }
  0x7a   : > { %v3550_v12 = vpop.eup %3549  ;;  %2265 = vst [vmem:[%s4689_s18 + $0x1d8] sm:$0xff] %v2892_v5  ;;  %v2894_v13 = vadd.f32 -0.5, %v1243_v6  ;;  %v1245_v14 = vmul.f32 0.5, %v3548_v8  ;;  %3575 = vtanh.f32 %v235_v3  ;;  %v251_v3 = vld [vmem:[%s4660_s23 + $0x2e8] sm:$0xff] }
  0x7b   : > { %v3552_v16 = vpop.eup %3551  ;;  %2266 = vst [vmem:[%s4689_s18 + $0x1e0] sm:$0xff] %v2893_v9  ;;  %v2895_v17 = vadd.f32 -0.5, %v1244_v10  ;;  %v1246_v18 = vmul.f32 0.5, %v3550_v12  ;;  %3577 = vtanh.f32 %v236_v7  ;;  %v252_v7 = vld [vmem:[%s4660_s23 + $0x2f0] sm:$0xff] }
  0x7c   : > { %v3554_v20 = vpop.eup %3553  ;;  %2267 = vst [vmem:[%s4689_s18 + $0x1e8] sm:$0xff] %v2894_v13  ;;  %v2896_v21 = vadd.f32 -0.5, %v1245_v14  ;;  %v1247_v22 = vmul.f32 0.5, %v3552_v16  ;;  %3579 = vtanh.f32 %v237_v11  ;;  %v253_v11 = vld [vmem:[%s4660_s23 + $0x2f8] sm:$0xff] }
  0x7d   : > { %v3556_v24 = vpop.eup %3555  ;;  %2268 = vst [vmem:[%s4689_s18 + $0x1f0] sm:$0xff] %v2895_v17  ;;  %v2897_v25 = vadd.f32 -0.5, %v1246_v18  ;;  %v1248_v26 = vmul.f32 0.5, %v3554_v20  ;;  %3581 = vtanh.f32 %v238_v15  ;;  %v254_v15 = vld [vmem:[%s4660_s23 + $0x300] sm:$0xff] }
  0x7e   : > { %v3558_v28 = vpop.eup %3557  ;;  %2269 = vst [vmem:[%s4689_s18 + $0x1f8] sm:$0xff] %v2896_v21  ;;  %v2898_v29 = vadd.f32 -0.5, %v1247_v22  ;;  %v1249_v30 = vmul.f32 0.5, %v3556_v24  ;;  %3583 = vtanh.f32 %v239_v19  ;;  %v255_v19 = vld [vmem:[%s4660_s23 + $0x308] sm:$0xff] }
  0x7f   : > { %v3560_v32 = vpop.eup %3559  ;;  %2270 = vst [vmem:[%s4689_s18 + $0x200] sm:$0xff] %v2897_v25  ;;  %v2899_v33 = vadd.f32 -0.5, %v1248_v26  ;;  %v1250_v34 = vmul.f32 0.5, %v3558_v28  ;;  %3585 = vtanh.f32 %v240_v23  ;;  %v256_v23 = vld [vmem:[%s4660_s23 + $0x310] sm:$0xff] }
  0x80   : > { %v3562_v36 = vpop.eup %3561  ;;  %2271 = vst [vmem:[%s4689_s18 + $0x208] sm:$0xff] %v2898_v29  ;;  %v2900_v37 = vadd.f32 -0.5, %v1249_v30  ;;  %v1251_v38 = vmul.f32 0.5, %v3560_v32  ;;  %3587 = vtanh.f32 %v241_v27  ;;  %v257_v27 = vld [vmem:[%s4660_s23 + $0x318] sm:$0xff] }
  0x81   : > { %v3564_v40 = vpop.eup %3563  ;;  %2272 = vst [vmem:[%s4689_s18 + $0x210] sm:$0xff] %v2899_v33  ;;  %v2901_v41 = vadd.f32 -0.5, %v1250_v34  ;;  %v1252_v42 = vmul.f32 0.5, %v3562_v36  ;;  %3589 = vtanh.f32 %v242_v31  ;;  %v258_v31 = vld [vmem:[%s4660_s23 + $0x320] sm:$0xff] }
  0x82   : > { %v3566_v44 = vpop.eup %3565  ;;  %2273 = vst [vmem:[%s4689_s18 + $0x218] sm:$0xff] %v2900_v37  ;;  %v2902_v45 = vadd.f32 -0.5, %v1251_v38  ;;  %v1253_v46 = vmul.f32 0.5, %v3564_v40  ;;  %3591 = vtanh.f32 %v243_v35  ;;  %v259_v35 = vld [vmem:[%s4660_s23 + $0x328] sm:$0xff] }
  0x83   : > { %v3568_v48 = vpop.eup %3567  ;;  %2274 = vst [vmem:[%s4689_s18 + $0x220] sm:$0xff] %v2901_v41  ;;  %v2903_v49 = vadd.f32 -0.5, %v1252_v42  ;;  %v1254_v50 = vmul.f32 0.5, %v3566_v44  ;;  %3593 = vtanh.f32 %v244_v39  ;;  %v260_v39 = vld [vmem:[%s4660_s23 + $0x330] sm:$0xff] }
  0x84   : > { %v3570_v52 = vpop.eup %3569  ;;  %2275 = vst [vmem:[%s4689_s18 + $0x228] sm:$0xff] %v2902_v45  ;;  %v2904_v53 = vadd.f32 -0.5, %v1253_v46  ;;  %v1255_v54 = vmul.f32 0.5, %v3568_v48  ;;  %3595 = vtanh.f32 %v245_v43  ;;  %v261_v43 = vld [vmem:[%s4660_s23 + $0x338] sm:$0xff] }
  0x85   : > { %v3572_v56 = vpop.eup %3571  ;;  %2276 = vst [vmem:[%s4689_s18 + $0x230] sm:$0xff] %v2903_v49  ;;  %v2905_v57 = vadd.f32 -0.5, %v1254_v50  ;;  %v1256_v58 = vmul.f32 0.5, %v3570_v52  ;;  %3597 = vtanh.f32 %v246_v47  ;;  %v262_v47 = vld [vmem:[%s4660_s23 + $0x340] sm:$0xff] }
  0x86   : > { %v3574_v60 = vpop.eup %3573  ;;  %2277 = vst [vmem:[%s4689_s18 + $0x238] sm:$0xff] %v2904_v53  ;;  %v2906_v61 = vadd.f32 -0.5, %v1255_v54  ;;  %v1257_v62 = vmul.f32 0.5, %v3572_v56  ;;  %3599 = vtanh.f32 %v247_v51  ;;  %v263_v51 = vld [vmem:[%s4660_s23 + $0x348] sm:$0xff] }
  0x87   : > { %v3576_v0 = vpop.eup %3575  ;;  %2278 = vst [vmem:[%s4689_s18 + $0x240] sm:$0xff] %v2905_v57  ;;  %v2907_v1 = vadd.f32 -0.5, %v1256_v58  ;;  %v1258_v2 = vmul.f32 0.5, %v3574_v60  ;;  %3601 = vtanh.f32 %v248_v55  ;;  %v264_v55 = vld [vmem:[%s4660_s23 + $0x350] sm:$0xff] }
  0x88   : > { %v3578_v4 = vpop.eup %3577  ;;  %2279 = vst [vmem:[%s4689_s18 + $0x248] sm:$0xff] %v2906_v61  ;;  %v2908_v5 = vadd.f32 -0.5, %v1257_v62  ;;  %v1259_v6 = vmul.f32 0.5, %v3576_v0  ;;  %3603 = vtanh.f32 %v249_v59  ;;  %v265_v59 = vld [vmem:[%s4660_s23 + $0x358] sm:$0xff] }
  0x89   : > { %v3580_v8 = vpop.eup %3579  ;;  %2280 = vst [vmem:[%s4689_s18 + $0x250] sm:$0xff] %v2907_v1  ;;  %v2909_v9 = vadd.f32 -0.5, %v1258_v2  ;;  %v1260_v10 = vmul.f32 0.5, %v3578_v4  ;;  %3605 = vtanh.f32 %v250_v63  ;;  %v266_v63 = vld [vmem:[%s4660_s23 + $0x360] sm:$0xff] }
  0x8a   : > { %v3582_v12 = vpop.eup %3581  ;;  %2281 = vst [vmem:[%s4689_s18 + $0x258] sm:$0xff] %v2908_v5  ;;  %v2910_v13 = vadd.f32 -0.5, %v1259_v6  ;;  %v1261_v14 = vmul.f32 0.5, %v3580_v8  ;;  %3607 = vtanh.f32 %v251_v3  ;;  %v267_v3 = vld [vmem:[%s4660_s23 + $0x368] sm:$0xff] }
  0x8b   : > { %v3584_v16 = vpop.eup %3583  ;;  %2282 = vst [vmem:[%s4689_s18 + $0x260] sm:$0xff] %v2909_v9  ;;  %v2911_v17 = vadd.f32 -0.5, %v1260_v10  ;;  %v1262_v18 = vmul.f32 0.5, %v3582_v12  ;;  %3609 = vtanh.f32 %v252_v7  ;;  %v268_v7 = vld [vmem:[%s4660_s23 + $0x370] sm:$0xff] }
  0x8c   : > { %v3586_v20 = vpop.eup %3585  ;;  %2283 = vst [vmem:[%s4689_s18 + $0x268] sm:$0xff] %v2910_v13  ;;  %v2912_v21 = vadd.f32 -0.5, %v1261_v14  ;;  %v1263_v22 = vmul.f32 0.5, %v3584_v16  ;;  %3611 = vtanh.f32 %v253_v11  ;;  %v269_v11 = vld [vmem:[%s4660_s23 + $0x378] sm:$0xff] }
  0x8d   : > { %v3588_v24 = vpop.eup %3587  ;;  %2284 = vst [vmem:[%s4689_s18 + $0x270] sm:$0xff] %v2911_v17  ;;  %v2913_v25 = vadd.f32 -0.5, %v1262_v18  ;;  %v1264_v26 = vmul.f32 0.5, %v3586_v20  ;;  %3613 = vtanh.f32 %v254_v15  ;;  %v270_v15 = vld [vmem:[%s4660_s23 + $0x380] sm:$0xff] }
  0x8e   : > { %v3590_v28 = vpop.eup %3589  ;;  %2285 = vst [vmem:[%s4689_s18 + $0x278] sm:$0xff] %v2912_v21  ;;  %v2914_v29 = vadd.f32 -0.5, %v1263_v22  ;;  %v1265_v30 = vmul.f32 0.5, %v3588_v24  ;;  %3615 = vtanh.f32 %v255_v19  ;;  %v271_v19 = vld [vmem:[%s4660_s23 + $0x388] sm:$0xff] }
  0x8f   : > { %v3592_v32 = vpop.eup %3591  ;;  %2286 = vst [vmem:[%s4689_s18 + $0x280] sm:$0xff] %v2913_v25  ;;  %v2915_v33 = vadd.f32 -0.5, %v1264_v26  ;;  %v1266_v34 = vmul.f32 0.5, %v3590_v28  ;;  %3617 = vtanh.f32 %v256_v23  ;;  %v272_v23 = vld [vmem:[%s4660_s23 + $0x390] sm:$0xff] }
  0x90   : > { %v3594_v36 = vpop.eup %3593  ;;  %2287 = vst [vmem:[%s4689_s18 + $0x288] sm:$0xff] %v2914_v29  ;;  %v2916_v37 = vadd.f32 -0.5, %v1265_v30  ;;  %v1267_v38 = vmul.f32 0.5, %v3592_v32  ;;  %3619 = vtanh.f32 %v257_v27  ;;  %v273_v27 = vld [vmem:[%s4660_s23 + $0x398] sm:$0xff] }
  0x91   : > { %v3596_v40 = vpop.eup %3595  ;;  %2288 = vst [vmem:[%s4689_s18 + $0x290] sm:$0xff] %v2915_v33  ;;  %v2917_v41 = vadd.f32 -0.5, %v1266_v34  ;;  %v1268_v42 = vmul.f32 0.5, %v3594_v36  ;;  %3621 = vtanh.f32 %v258_v31  ;;  %v274_v31 = vld [vmem:[%s4660_s23 + $0x3a0] sm:$0xff] }
  0x92   : > { %v3598_v44 = vpop.eup %3597  ;;  %2289 = vst [vmem:[%s4689_s18 + $0x298] sm:$0xff] %v2916_v37  ;;  %v2918_v45 = vadd.f32 -0.5, %v1267_v38  ;;  %v1269_v46 = vmul.f32 0.5, %v3596_v40  ;;  %3623 = vtanh.f32 %v259_v35  ;;  %v275_v35 = vld [vmem:[%s4660_s23 + $0x3a8] sm:$0xff] }
  0x93   : > { %v3600_v48 = vpop.eup %3599  ;;  %2290 = vst [vmem:[%s4689_s18 + $0x2a0] sm:$0xff] %v2917_v41  ;;  %v2919_v49 = vadd.f32 -0.5, %v1268_v42  ;;  %v1270_v50 = vmul.f32 0.5, %v3598_v44  ;;  %3625 = vtanh.f32 %v260_v39  ;;  %v276_v39 = vld [vmem:[%s4660_s23 + $0x3b0] sm:$0xff] }
  0x94   : > { %v3602_v52 = vpop.eup %3601  ;;  %2291 = vst [vmem:[%s4689_s18 + $0x2a8] sm:$0xff] %v2918_v45  ;;  %v2920_v53 = vadd.f32 -0.5, %v1269_v46  ;;  %v1271_v54 = vmul.f32 0.5, %v3600_v48  ;;  %3627 = vtanh.f32 %v261_v43  ;;  %v277_v43 = vld [vmem:[%s4660_s23 + $0x3b8] sm:$0xff] }
  0x95   : > { %v3604_v56 = vpop.eup %3603  ;;  %2292 = vst [vmem:[%s4689_s18 + $0x2b0] sm:$0xff] %v2919_v49  ;;  %v2921_v57 = vadd.f32 -0.5, %v1270_v50  ;;  %v1272_v58 = vmul.f32 0.5, %v3602_v52  ;;  %3629 = vtanh.f32 %v262_v47  ;;  %v278_v47 = vld [vmem:[%s4660_s23 + $0x3c0] sm:$0xff] }
  0x96   : > { %v3606_v60 = vpop.eup %3605  ;;  %2293 = vst [vmem:[%s4689_s18 + $0x2b8] sm:$0xff] %v2920_v53  ;;  %v2922_v61 = vadd.f32 -0.5, %v1271_v54  ;;  %v1273_v62 = vmul.f32 0.5, %v3604_v56  ;;  %3631 = vtanh.f32 %v263_v51  ;;  %v279_v51 = vld [vmem:[%s4660_s23 + $0x3c8] sm:$0xff] }
  0x97   : > { %v3608_v0 = vpop.eup %3607  ;;  %2294 = vst [vmem:[%s4689_s18 + $0x2c0] sm:$0xff] %v2921_v57  ;;  %v2923_v1 = vadd.f32 -0.5, %v1272_v58  ;;  %v1274_v2 = vmul.f32 0.5, %v3606_v60  ;;  %3633 = vtanh.f32 %v264_v55  ;;  %v280_v55 = vld [vmem:[%s4660_s23 + $0x3d0] sm:$0xff] }
  0x98   : > { %v3610_v4 = vpop.eup %3609  ;;  %2295 = vst [vmem:[%s4689_s18 + $0x2c8] sm:$0xff] %v2922_v61  ;;  %v2924_v5 = vadd.f32 -0.5, %v1273_v62  ;;  %v1275_v6 = vmul.f32 0.5, %v3608_v0  ;;  %3635 = vtanh.f32 %v265_v59  ;;  %v281_v59 = vld [vmem:[%s4660_s23 + $0x3d8] sm:$0xff] }
  0x99   : > { %v3612_v8 = vpop.eup %3611  ;;  %2296 = vst [vmem:[%s4689_s18 + $0x2d0] sm:$0xff] %v2923_v1  ;;  %v2925_v9 = vadd.f32 -0.5, %v1274_v2  ;;  %v1276_v10 = vmul.f32 0.5, %v3610_v4  ;;  %3637 = vtanh.f32 %v266_v63  ;;  %v282_v63 = vld [vmem:[%s4660_s23 + $0x3e0] sm:$0xff] }
  0x9a   : > { %v3614_v12 = vpop.eup %3613  ;;  %2297 = vst [vmem:[%s4689_s18 + $0x2d8] sm:$0xff] %v2924_v5  ;;  %v2926_v13 = vadd.f32 -0.5, %v1275_v6  ;;  %v1277_v14 = vmul.f32 0.5, %v3612_v8  ;;  %3639 = vtanh.f32 %v267_v3  ;;  %v283_v3 = vld [vmem:[%s4660_s23 + $0x3e8] sm:$0xff] }
  0x9b   : > { %v3616_v16 = vpop.eup %3615  ;;  %2298 = vst [vmem:[%s4689_s18 + $0x2e0] sm:$0xff] %v2925_v9  ;;  %v2927_v17 = vadd.f32 -0.5, %v1276_v10  ;;  %v1278_v18 = vmul.f32 0.5, %v3614_v12  ;;  %3641 = vtanh.f32 %v268_v7  ;;  %v284_v7 = vld [vmem:[%s4660_s23 + $0x3f0] sm:$0xff] }
  0x9c   : > { %v3618_v20 = vpop.eup %3617  ;;  %2299 = vst [vmem:[%s4689_s18 + $0x2e8] sm:$0xff] %v2926_v13  ;;  %v2928_v21 = vadd.f32 -0.5, %v1277_v14  ;;  %v1279_v22 = vmul.f32 0.5, %v3616_v16  ;;  %3643 = vtanh.f32 %v269_v11  ;;  %v285_v11 = vld [vmem:[%s4660_s23 + $0x3f8] sm:$0xff] }
  0x9d   : > { %v3620_v24 = vpop.eup %3619  ;;  %2300 = vst [vmem:[%s4689_s18 + $0x2f0] sm:$0xff] %v2927_v17  ;;  %v2929_v25 = vadd.f32 -0.5, %v1278_v18  ;;  %v1280_v26 = vmul.f32 0.5, %v3618_v20  ;;  %3645 = vtanh.f32 %v270_v15  ;;  %v286_v15 = vld [vmem:[%s4660_s23 + $0x400] sm:$0xff] }
  0x9e   : > { %v3622_v28 = vpop.eup %3621  ;;  %2301 = vst [vmem:[%s4689_s18 + $0x2f8] sm:$0xff] %v2928_v21  ;;  %v2930_v29 = vadd.f32 -0.5, %v1279_v22  ;;  %v1281_v30 = vmul.f32 0.5, %v3620_v24  ;;  %3647 = vtanh.f32 %v271_v19  ;;  %v287_v19 = vld [vmem:[%s4660_s23 + $0x408] sm:$0xff] }
  0x9f   : > { %v3624_v32 = vpop.eup %3623  ;;  %2302 = vst [vmem:[%s4689_s18 + $0x300] sm:$0xff] %v2929_v25  ;;  %v2931_v33 = vadd.f32 -0.5, %v1280_v26  ;;  %v1282_v34 = vmul.f32 0.5, %v3622_v28  ;;  %3649 = vtanh.f32 %v272_v23  ;;  %v288_v23 = vld [vmem:[%s4660_s23 + $0x410] sm:$0xff] }
  0xa0   : > { %v3626_v36 = vpop.eup %3625  ;;  %2303 = vst [vmem:[%s4689_s18 + $0x308] sm:$0xff] %v2930_v29  ;;  %v2932_v37 = vadd.f32 -0.5, %v1281_v30  ;;  %v1283_v38 = vmul.f32 0.5, %v3624_v32  ;;  %3651 = vtanh.f32 %v273_v27  ;;  %v289_v27 = vld [vmem:[%s4660_s23 + $0x418] sm:$0xff] }
  0xa1   : > { %v3628_v40 = vpop.eup %3627  ;;  %2304 = vst [vmem:[%s4689_s18 + $0x310] sm:$0xff] %v2931_v33  ;;  %v2933_v41 = vadd.f32 -0.5, %v1282_v34  ;;  %v1284_v42 = vmul.f32 0.5, %v3626_v36  ;;  %3653 = vtanh.f32 %v274_v31  ;;  %v290_v31 = vld [vmem:[%s4660_s23 + $0x420] sm:$0xff] }
  0xa2   : > { %v3630_v44 = vpop.eup %3629  ;;  %2305 = vst [vmem:[%s4689_s18 + $0x318] sm:$0xff] %v2932_v37  ;;  %v2934_v45 = vadd.f32 -0.5, %v1283_v38  ;;  %v1285_v46 = vmul.f32 0.5, %v3628_v40  ;;  %3655 = vtanh.f32 %v275_v35  ;;  %v291_v35 = vld [vmem:[%s4660_s23 + $0x428] sm:$0xff] }
  0xa3   : > { %v3632_v48 = vpop.eup %3631  ;;  %2306 = vst [vmem:[%s4689_s18 + $0x320] sm:$0xff] %v2933_v41  ;;  %v2935_v49 = vadd.f32 -0.5, %v1284_v42  ;;  %v1286_v50 = vmul.f32 0.5, %v3630_v44  ;;  %3657 = vtanh.f32 %v276_v39  ;;  %v292_v39 = vld [vmem:[%s4660_s23 + $0x430] sm:$0xff] }
  0xa4   : > { %v3634_v52 = vpop.eup %3633  ;;  %2307 = vst [vmem:[%s4689_s18 + $0x328] sm:$0xff] %v2934_v45  ;;  %v2936_v53 = vadd.f32 -0.5, %v1285_v46  ;;  %v1287_v54 = vmul.f32 0.5, %v3632_v48  ;;  %3659 = vtanh.f32 %v277_v43  ;;  %v293_v43 = vld [vmem:[%s4660_s23 + $0x438] sm:$0xff] }
  0xa5   : > { %v3636_v56 = vpop.eup %3635  ;;  %2308 = vst [vmem:[%s4689_s18 + $0x330] sm:$0xff] %v2935_v49  ;;  %v2937_v57 = vadd.f32 -0.5, %v1286_v50  ;;  %v1288_v58 = vmul.f32 0.5, %v3634_v52  ;;  %3661 = vtanh.f32 %v278_v47  ;;  %v294_v47 = vld [vmem:[%s4660_s23 + $0x440] sm:$0xff] }
  0xa6   : > { %v3638_v60 = vpop.eup %3637  ;;  %2309 = vst [vmem:[%s4689_s18 + $0x338] sm:$0xff] %v2936_v53  ;;  %v2938_v61 = vadd.f32 -0.5, %v1287_v54  ;;  %v1289_v62 = vmul.f32 0.5, %v3636_v56  ;;  %3663 = vtanh.f32 %v279_v51  ;;  %v295_v51 = vld [vmem:[%s4660_s23 + $0x448] sm:$0xff] }
  0xa7   : > { %v3640_v0 = vpop.eup %3639  ;;  %2310 = vst [vmem:[%s4689_s18 + $0x340] sm:$0xff] %v2937_v57  ;;  %v2939_v1 = vadd.f32 -0.5, %v1288_v58  ;;  %v1290_v2 = vmul.f32 0.5, %v3638_v60  ;;  %3665 = vtanh.f32 %v280_v55  ;;  %v296_v55 = vld [vmem:[%s4660_s23 + $0x450] sm:$0xff] }
  0xa8   : > { %v3642_v4 = vpop.eup %3641  ;;  %2311 = vst [vmem:[%s4689_s18 + $0x348] sm:$0xff] %v2938_v61  ;;  %v2940_v5 = vadd.f32 -0.5, %v1289_v62  ;;  %v1291_v6 = vmul.f32 0.5, %v3640_v0  ;;  %3667 = vtanh.f32 %v281_v59  ;;  %v297_v59 = vld [vmem:[%s4660_s23 + $0x458] sm:$0xff] }
  0xa9   : > { %v3644_v8 = vpop.eup %3643  ;;  %2312 = vst [vmem:[%s4689_s18 + $0x350] sm:$0xff] %v2939_v1  ;;  %v2941_v9 = vadd.f32 -0.5, %v1290_v2  ;;  %v1292_v10 = vmul.f32 0.5, %v3642_v4  ;;  %3669 = vtanh.f32 %v282_v63  ;;  %v298_v63 = vld [vmem:[%s4660_s23 + $0x460] sm:$0xff] }
  0xaa   : > { %v3646_v12 = vpop.eup %3645  ;;  %2313 = vst [vmem:[%s4689_s18 + $0x358] sm:$0xff] %v2940_v5  ;;  %v2942_v13 = vadd.f32 -0.5, %v1291_v6  ;;  %v1293_v14 = vmul.f32 0.5, %v3644_v8  ;;  %3671 = vtanh.f32 %v283_v3  ;;  %v299_v3 = vld [vmem:[%s4660_s23 + $0x468] sm:$0xff] }
  0xab   : > { %v3648_v16 = vpop.eup %3647  ;;  %2314 = vst [vmem:[%s4689_s18 + $0x360] sm:$0xff] %v2941_v9  ;;  %v2943_v17 = vadd.f32 -0.5, %v1292_v10  ;;  %v1294_v18 = vmul.f32 0.5, %v3646_v12  ;;  %3673 = vtanh.f32 %v284_v7  ;;  %v300_v7 = vld [vmem:[%s4660_s23 + $0x470] sm:$0xff] }
  0xac   : > { %v3650_v20 = vpop.eup %3649  ;;  %2315 = vst [vmem:[%s4689_s18 + $0x368] sm:$0xff] %v2942_v13  ;;  %v2944_v21 = vadd.f32 -0.5, %v1293_v14  ;;  %v1295_v22 = vmul.f32 0.5, %v3648_v16  ;;  %3675 = vtanh.f32 %v285_v11  ;;  %v301_v11 = vld [vmem:[%s4660_s23 + $0x478] sm:$0xff] }
  0xad   : > { %v3652_v24 = vpop.eup %3651  ;;  %2316 = vst [vmem:[%s4689_s18 + $0x370] sm:$0xff] %v2943_v17  ;;  %v2945_v25 = vadd.f32 -0.5, %v1294_v18  ;;  %v1296_v26 = vmul.f32 0.5, %v3650_v20  ;;  %3677 = vtanh.f32 %v286_v15  ;;  %v302_v15 = vld [vmem:[%s4660_s23 + $0x480] sm:$0xff] }
  0xae   : > { %v3654_v28 = vpop.eup %3653  ;;  %2317 = vst [vmem:[%s4689_s18 + $0x378] sm:$0xff] %v2944_v21  ;;  %v2946_v29 = vadd.f32 -0.5, %v1295_v22  ;;  %v1297_v30 = vmul.f32 0.5, %v3652_v24  ;;  %3679 = vtanh.f32 %v287_v19  ;;  %v303_v19 = vld [vmem:[%s4660_s23 + $0x488] sm:$0xff] }
  0xaf   : > { %v3656_v32 = vpop.eup %3655  ;;  %2318 = vst [vmem:[%s4689_s18 + $0x380] sm:$0xff] %v2945_v25  ;;  %v2947_v33 = vadd.f32 -0.5, %v1296_v26  ;;  %v1298_v34 = vmul.f32 0.5, %v3654_v28  ;;  %3681 = vtanh.f32 %v288_v23  ;;  %v304_v23 = vld [vmem:[%s4660_s23 + $0x490] sm:$0xff] }
  0xb0   : > { %v3658_v36 = vpop.eup %3657  ;;  %2319 = vst [vmem:[%s4689_s18 + $0x388] sm:$0xff] %v2946_v29  ;;  %v2948_v37 = vadd.f32 -0.5, %v1297_v30  ;;  %v1299_v38 = vmul.f32 0.5, %v3656_v32  ;;  %3683 = vtanh.f32 %v289_v27  ;;  %v305_v27 = vld [vmem:[%s4660_s23 + $0x498] sm:$0xff] }
  0xb1   : > { %v3660_v40 = vpop.eup %3659  ;;  %2320 = vst [vmem:[%s4689_s18 + $0x390] sm:$0xff] %v2947_v33  ;;  %v2949_v41 = vadd.f32 -0.5, %v1298_v34  ;;  %v1300_v42 = vmul.f32 0.5, %v3658_v36  ;;  %3685 = vtanh.f32 %v290_v31  ;;  %v306_v31 = vld [vmem:[%s4660_s23 + $0x4a0] sm:$0xff] }
  0xb2   : > { %v3662_v44 = vpop.eup %3661  ;;  %2321 = vst [vmem:[%s4689_s18 + $0x398] sm:$0xff] %v2948_v37  ;;  %v2950_v45 = vadd.f32 -0.5, %v1299_v38  ;;  %v1301_v46 = vmul.f32 0.5, %v3660_v40  ;;  %3687 = vtanh.f32 %v291_v35  ;;  %v307_v35 = vld [vmem:[%s4660_s23 + $0x4a8] sm:$0xff] }
  0xb3   : > { %v3664_v48 = vpop.eup %3663  ;;  %2322 = vst [vmem:[%s4689_s18 + $0x3a0] sm:$0xff] %v2949_v41  ;;  %v2951_v49 = vadd.f32 -0.5, %v1300_v42  ;;  %v1302_v50 = vmul.f32 0.5, %v3662_v44  ;;  %3689 = vtanh.f32 %v292_v39  ;;  %v308_v39 = vld [vmem:[%s4660_s23 + $0x4b0] sm:$0xff] }
  0xb4   : > { %v3666_v52 = vpop.eup %3665  ;;  %2323 = vst [vmem:[%s4689_s18 + $0x3a8] sm:$0xff] %v2950_v45  ;;  %v2952_v53 = vadd.f32 -0.5, %v1301_v46  ;;  %v1303_v54 = vmul.f32 0.5, %v3664_v48  ;;  %3691 = vtanh.f32 %v293_v43  ;;  %v309_v43 = vld [vmem:[%s4660_s23 + $0x4b8] sm:$0xff] }
  0xb5   : > { %v3668_v56 = vpop.eup %3667  ;;  %2324 = vst [vmem:[%s4689_s18 + $0x3b0] sm:$0xff] %v2951_v49  ;;  %v2953_v57 = vadd.f32 -0.5, %v1302_v50  ;;  %v1304_v58 = vmul.f32 0.5, %v3666_v52  ;;  %3693 = vtanh.f32 %v294_v47  ;;  %v310_v47 = vld [vmem:[%s4660_s23 + $0x4c0] sm:$0xff] }
  0xb6   : > { %v3670_v60 = vpop.eup %3669  ;;  %2325 = vst [vmem:[%s4689_s18 + $0x3b8] sm:$0xff] %v2952_v53  ;;  %v2954_v61 = vadd.f32 -0.5, %v1303_v54  ;;  %v1305_v62 = vmul.f32 0.5, %v3668_v56  ;;  %3695 = vtanh.f32 %v295_v51  ;;  %v311_v51 = vld [vmem:[%s4660_s23 + $0x4c8] sm:$0xff] }
  0xb7   : > { %v3672_v0 = vpop.eup %3671  ;;  %2326 = vst [vmem:[%s4689_s18 + $0x3c0] sm:$0xff] %v2953_v57  ;;  %v2955_v1 = vadd.f32 -0.5, %v1304_v58  ;;  %v1306_v2 = vmul.f32 0.5, %v3670_v60  ;;  %3697 = vtanh.f32 %v296_v55  ;;  %v312_v55 = vld [vmem:[%s4660_s23 + $0x4d0] sm:$0xff] }
  0xb8   : > { %v3674_v4 = vpop.eup %3673  ;;  %2327 = vst [vmem:[%s4689_s18 + $0x3c8] sm:$0xff] %v2954_v61  ;;  %v2956_v5 = vadd.f32 -0.5, %v1305_v62  ;;  %v1307_v6 = vmul.f32 0.5, %v3672_v0  ;;  %3699 = vtanh.f32 %v297_v59  ;;  %v313_v59 = vld [vmem:[%s4660_s23 + $0x4d8] sm:$0xff] }
  0xb9   : > { %v3676_v8 = vpop.eup %3675  ;;  %2328 = vst [vmem:[%s4689_s18 + $0x3d0] sm:$0xff] %v2955_v1  ;;  %v2957_v9 = vadd.f32 -0.5, %v1306_v2  ;;  %v1308_v10 = vmul.f32 0.5, %v3674_v4  ;;  %3701 = vtanh.f32 %v298_v63  ;;  %v314_v63 = vld [vmem:[%s4660_s23 + $0x4e0] sm:$0xff] }
  0xba   : > { %v3678_v12 = vpop.eup %3677  ;;  %2329 = vst [vmem:[%s4689_s18 + $0x3d8] sm:$0xff] %v2956_v5  ;;  %v2958_v13 = vadd.f32 -0.5, %v1307_v6  ;;  %v1309_v14 = vmul.f32 0.5, %v3676_v8  ;;  %3703 = vtanh.f32 %v299_v3  ;;  %v315_v3 = vld [vmem:[%s4660_s23 + $0x4e8] sm:$0xff] }
  0xbb   : > { %v3680_v16 = vpop.eup %3679  ;;  %2330 = vst [vmem:[%s4689_s18 + $0x3e0] sm:$0xff] %v2957_v9  ;;  %v2959_v17 = vadd.f32 -0.5, %v1308_v10  ;;  %v1310_v18 = vmul.f32 0.5, %v3678_v12  ;;  %3705 = vtanh.f32 %v300_v7  ;;  %v316_v7 = vld [vmem:[%s4660_s23 + $0x4f0] sm:$0xff] }
  0xbc   : > { %v3682_v20 = vpop.eup %3681  ;;  %2331 = vst [vmem:[%s4689_s18 + $0x3e8] sm:$0xff] %v2958_v13  ;;  %v2960_v21 = vadd.f32 -0.5, %v1309_v14  ;;  %v1311_v22 = vmul.f32 0.5, %v3680_v16  ;;  %3707 = vtanh.f32 %v301_v11  ;;  %v317_v11 = vld [vmem:[%s4660_s23 + $0x4f8] sm:$0xff] }
  0xbd   : > { %v3684_v24 = vpop.eup %3683  ;;  %2332 = vst [vmem:[%s4689_s18 + $0x3f0] sm:$0xff] %v2959_v17  ;;  %v2961_v25 = vadd.f32 -0.5, %v1310_v18  ;;  %v1312_v26 = vmul.f32 0.5, %v3682_v20  ;;  %3709 = vtanh.f32 %v302_v15  ;;  %v318_v15 = vld [vmem:[%s4660_s23 + $0x500] sm:$0xff] }
  0xbe   : > { %v3686_v28 = vpop.eup %3685  ;;  %2333 = vst [vmem:[%s4689_s18 + $0x3f8] sm:$0xff] %v2960_v21  ;;  %v2962_v29 = vadd.f32 -0.5, %v1311_v22  ;;  %v1313_v30 = vmul.f32 0.5, %v3684_v24  ;;  %3711 = vtanh.f32 %v303_v19  ;;  %v319_v19 = vld [vmem:[%s4660_s23 + $0x508] sm:$0xff] }
  0xbf   : > { %v3688_v32 = vpop.eup %3687  ;;  %2334 = vst [vmem:[%s4689_s18 + $0x400] sm:$0xff] %v2961_v25  ;;  %v2963_v33 = vadd.f32 -0.5, %v1312_v26  ;;  %v1314_v34 = vmul.f32 0.5, %v3686_v28  ;;  %3713 = vtanh.f32 %v304_v23  ;;  %v320_v23 = vld [vmem:[%s4660_s23 + $0x510] sm:$0xff] }
  0xc0   : > { %v3690_v36 = vpop.eup %3689  ;;  %2335 = vst [vmem:[%s4689_s18 + $0x408] sm:$0xff] %v2962_v29  ;;  %v2964_v37 = vadd.f32 -0.5, %v1313_v30  ;;  %v1315_v38 = vmul.f32 0.5, %v3688_v32  ;;  %3715 = vtanh.f32 %v305_v27  ;;  %v321_v27 = vld [vmem:[%s4660_s23 + $0x518] sm:$0xff] }
  0xc1   : > { %v3692_v40 = vpop.eup %3691  ;;  %2336 = vst [vmem:[%s4689_s18 + $0x410] sm:$0xff] %v2963_v33  ;;  %v2965_v41 = vadd.f32 -0.5, %v1314_v34  ;;  %v1316_v42 = vmul.f32 0.5, %v3690_v36  ;;  %3717 = vtanh.f32 %v306_v31  ;;  %v322_v31 = vld [vmem:[%s4660_s23 + $0x520] sm:$0xff] }
  0xc2   : > { %v3694_v44 = vpop.eup %3693  ;;  %2337 = vst [vmem:[%s4689_s18 + $0x418] sm:$0xff] %v2964_v37  ;;  %v2966_v45 = vadd.f32 -0.5, %v1315_v38  ;;  %v1317_v46 = vmul.f32 0.5, %v3692_v40  ;;  %3719 = vtanh.f32 %v307_v35  ;;  %v323_v35 = vld [vmem:[%s4660_s23 + $0x528] sm:$0xff] }
  0xc3   : > { %v3696_v48 = vpop.eup %3695  ;;  %2338 = vst [vmem:[%s4689_s18 + $0x420] sm:$0xff] %v2965_v41  ;;  %v2967_v49 = vadd.f32 -0.5, %v1316_v42  ;;  %v1318_v50 = vmul.f32 0.5, %v3694_v44  ;;  %3721 = vtanh.f32 %v308_v39  ;;  %v324_v39 = vld [vmem:[%s4660_s23 + $0x530] sm:$0xff] }
  0xc4   : > { %v3698_v52 = vpop.eup %3697  ;;  %2339 = vst [vmem:[%s4689_s18 + $0x428] sm:$0xff] %v2966_v45  ;;  %v2968_v53 = vadd.f32 -0.5, %v1317_v46  ;;  %v1319_v54 = vmul.f32 0.5, %v3696_v48  ;;  %3723 = vtanh.f32 %v309_v43  ;;  %v325_v43 = vld [vmem:[%s4660_s23 + $0x538] sm:$0xff] }
  0xc5   : > { %v3700_v56 = vpop.eup %3699  ;;  %2340 = vst [vmem:[%s4689_s18 + $0x430] sm:$0xff] %v2967_v49  ;;  %v2969_v57 = vadd.f32 -0.5, %v1318_v50  ;;  %v1320_v58 = vmul.f32 0.5, %v3698_v52  ;;  %3725 = vtanh.f32 %v310_v47  ;;  %v326_v47 = vld [vmem:[%s4660_s23 + $0x540] sm:$0xff] }
  0xc6   : > { %v3702_v60 = vpop.eup %3701  ;;  %2341 = vst [vmem:[%s4689_s18 + $0x438] sm:$0xff] %v2968_v53  ;;  %v2970_v61 = vadd.f32 -0.5, %v1319_v54  ;;  %v1321_v62 = vmul.f32 0.5, %v3700_v56  ;;  %3727 = vtanh.f32 %v311_v51  ;;  %v327_v51 = vld [vmem:[%s4660_s23 + $0x548] sm:$0xff] }
  0xc7   : > { %v3704_v0 = vpop.eup %3703  ;;  %2342 = vst [vmem:[%s4689_s18 + $0x440] sm:$0xff] %v2969_v57  ;;  %v2971_v1 = vadd.f32 -0.5, %v1320_v58  ;;  %v1322_v2 = vmul.f32 0.5, %v3702_v60  ;;  %3729 = vtanh.f32 %v312_v55  ;;  %v328_v55 = vld [vmem:[%s4660_s23 + $0x550] sm:$0xff] }
  0xc8   : > { %v3706_v4 = vpop.eup %3705  ;;  %2343 = vst [vmem:[%s4689_s18 + $0x448] sm:$0xff] %v2970_v61  ;;  %v2972_v5 = vadd.f32 -0.5, %v1321_v62  ;;  %v1323_v6 = vmul.f32 0.5, %v3704_v0  ;;  %3731 = vtanh.f32 %v313_v59  ;;  %v329_v59 = vld [vmem:[%s4660_s23 + $0x558] sm:$0xff] }
  0xc9   : > { %v3708_v8 = vpop.eup %3707  ;;  %2344 = vst [vmem:[%s4689_s18 + $0x450] sm:$0xff] %v2971_v1  ;;  %v2973_v9 = vadd.f32 -0.5, %v1322_v2  ;;  %v1324_v10 = vmul.f32 0.5, %v3706_v4  ;;  %3733 = vtanh.f32 %v314_v63  ;;  %v330_v63 = vld [vmem:[%s4660_s23 + $0x560] sm:$0xff] }
  0xca   : > { %v3710_v12 = vpop.eup %3709  ;;  %2345 = vst [vmem:[%s4689_s18 + $0x458] sm:$0xff] %v2972_v5  ;;  %v2974_v13 = vadd.f32 -0.5, %v1323_v6  ;;  %v1325_v14 = vmul.f32 0.5, %v3708_v8  ;;  %3735 = vtanh.f32 %v315_v3  ;;  %v331_v3 = vld [vmem:[%s4660_s23 + $0x568] sm:$0xff] }
  0xcb   : > { %v3712_v16 = vpop.eup %3711  ;;  %2346 = vst [vmem:[%s4689_s18 + $0x460] sm:$0xff] %v2973_v9  ;;  %v2975_v17 = vadd.f32 -0.5, %v1324_v10  ;;  %v1326_v18 = vmul.f32 0.5, %v3710_v12  ;;  %3737 = vtanh.f32 %v316_v7  ;;  %v332_v7 = vld [vmem:[%s4660_s23 + $0x570] sm:$0xff] }
  0xcc   : > { %v3714_v20 = vpop.eup %3713  ;;  %2347 = vst [vmem:[%s4689_s18 + $0x468] sm:$0xff] %v2974_v13  ;;  %v2976_v21 = vadd.f32 -0.5, %v1325_v14  ;;  %v1327_v22 = vmul.f32 0.5, %v3712_v16  ;;  %3739 = vtanh.f32 %v317_v11  ;;  %v333_v11 = vld [vmem:[%s4660_s23 + $0x578] sm:$0xff] }
  0xcd   : > { %v3716_v24 = vpop.eup %3715  ;;  %2348 = vst [vmem:[%s4689_s18 + $0x470] sm:$0xff] %v2975_v17  ;;  %v2977_v25 = vadd.f32 -0.5, %v1326_v18  ;;  %v1328_v26 = vmul.f32 0.5, %v3714_v20  ;;  %3741 = vtanh.f32 %v318_v15  ;;  %v334_v15 = vld [vmem:[%s4660_s23 + $0x580] sm:$0xff] }
  0xce   : > { %v3718_v28 = vpop.eup %3717  ;;  %2349 = vst [vmem:[%s4689_s18 + $0x478] sm:$0xff] %v2976_v21  ;;  %v2978_v29 = vadd.f32 -0.5, %v1327_v22  ;;  %v1329_v30 = vmul.f32 0.5, %v3716_v24  ;;  %3743 = vtanh.f32 %v319_v19  ;;  %v335_v19 = vld [vmem:[%s4660_s23 + $0x588] sm:$0xff] }
  0xcf   : > { %v3720_v32 = vpop.eup %3719  ;;  %2350 = vst [vmem:[%s4689_s18 + $0x480] sm:$0xff] %v2977_v25  ;;  %v2979_v33 = vadd.f32 -0.5, %v1328_v26  ;;  %v1330_v34 = vmul.f32 0.5, %v3718_v28  ;;  %3745 = vtanh.f32 %v320_v23  ;;  %v336_v23 = vld [vmem:[%s4660_s23 + $0x590] sm:$0xff] }
  0xd0   : > { %v3722_v36 = vpop.eup %3721  ;;  %2351 = vst [vmem:[%s4689_s18 + $0x488] sm:$0xff] %v2978_v29  ;;  %v2980_v37 = vadd.f32 -0.5, %v1329_v30  ;;  %v1331_v38 = vmul.f32 0.5, %v3720_v32  ;;  %3747 = vtanh.f32 %v321_v27  ;;  %v337_v27 = vld [vmem:[%s4660_s23 + $0x598] sm:$0xff] }
  0xd1   : > { %v3724_v40 = vpop.eup %3723  ;;  %2352 = vst [vmem:[%s4689_s18 + $0x490] sm:$0xff] %v2979_v33  ;;  %v2981_v41 = vadd.f32 -0.5, %v1330_v34  ;;  %v1332_v42 = vmul.f32 0.5, %v3722_v36  ;;  %3749 = vtanh.f32 %v322_v31  ;;  %v338_v31 = vld [vmem:[%s4660_s23 + $0x5a0] sm:$0xff] }
  0xd2   : > { %v3726_v44 = vpop.eup %3725  ;;  %2353 = vst [vmem:[%s4689_s18 + $0x498] sm:$0xff] %v2980_v37  ;;  %v2982_v45 = vadd.f32 -0.5, %v1331_v38  ;;  %v1333_v46 = vmul.f32 0.5, %v3724_v40  ;;  %3751 = vtanh.f32 %v323_v35  ;;  %v339_v35 = vld [vmem:[%s4660_s23 + $0x5a8] sm:$0xff] }
  0xd3   : > { %v3728_v48 = vpop.eup %3727  ;;  %2354 = vst [vmem:[%s4689_s18 + $0x4a0] sm:$0xff] %v2981_v41  ;;  %v2983_v49 = vadd.f32 -0.5, %v1332_v42  ;;  %v1334_v50 = vmul.f32 0.5, %v3726_v44  ;;  %3753 = vtanh.f32 %v324_v39  ;;  %v340_v39 = vld [vmem:[%s4660_s23 + $0x5b0] sm:$0xff] }
  0xd4   : > { %v3730_v52 = vpop.eup %3729  ;;  %2355 = vst [vmem:[%s4689_s18 + $0x4a8] sm:$0xff] %v2982_v45  ;;  %v2984_v53 = vadd.f32 -0.5, %v1333_v46  ;;  %v1335_v54 = vmul.f32 0.5, %v3728_v48  ;;  %3755 = vtanh.f32 %v325_v43  ;;  %v341_v43 = vld [vmem:[%s4660_s23 + $0x5b8] sm:$0xff] }
  0xd5   : > { %v3732_v56 = vpop.eup %3731  ;;  %2356 = vst [vmem:[%s4689_s18 + $0x4b0] sm:$0xff] %v2983_v49  ;;  %v2985_v57 = vadd.f32 -0.5, %v1334_v50  ;;  %v1336_v58 = vmul.f32 0.5, %v3730_v52  ;;  %3757 = vtanh.f32 %v326_v47  ;;  %v342_v47 = vld [vmem:[%s4660_s23 + $0x5c0] sm:$0xff] }
  0xd6   : > { %v3734_v60 = vpop.eup %3733  ;;  %2357 = vst [vmem:[%s4689_s18 + $0x4b8] sm:$0xff] %v2984_v53  ;;  %v2986_v61 = vadd.f32 -0.5, %v1335_v54  ;;  %v1337_v62 = vmul.f32 0.5, %v3732_v56  ;;  %3759 = vtanh.f32 %v327_v51  ;;  %v343_v51 = vld [vmem:[%s4660_s23 + $0x5c8] sm:$0xff] }
  0xd7   : > { %v3736_v0 = vpop.eup %3735  ;;  %2358 = vst [vmem:[%s4689_s18 + $0x4c0] sm:$0xff] %v2985_v57  ;;  %v2987_v1 = vadd.f32 -0.5, %v1336_v58  ;;  %v1338_v2 = vmul.f32 0.5, %v3734_v60  ;;  %3761 = vtanh.f32 %v328_v55  ;;  %v344_v55 = vld [vmem:[%s4660_s23 + $0x5d0] sm:$0xff] }
  0xd8   : > { %v3738_v4 = vpop.eup %3737  ;;  %2359 = vst [vmem:[%s4689_s18 + $0x4c8] sm:$0xff] %v2986_v61  ;;  %v2988_v5 = vadd.f32 -0.5, %v1337_v62  ;;  %v1339_v6 = vmul.f32 0.5, %v3736_v0  ;;  %3763 = vtanh.f32 %v329_v59  ;;  %v345_v59 = vld [vmem:[%s4660_s23 + $0x5d8] sm:$0xff] }
  0xd9   : > { %v3740_v8 = vpop.eup %3739  ;;  %2360 = vst [vmem:[%s4689_s18 + $0x4d0] sm:$0xff] %v2987_v1  ;;  %v2989_v9 = vadd.f32 -0.5, %v1338_v2  ;;  %v1340_v10 = vmul.f32 0.5, %v3738_v4  ;;  %3765 = vtanh.f32 %v330_v63  ;;  %v346_v63 = vld [vmem:[%s4660_s23 + $0x5e0] sm:$0xff] }
  0xda   : > { %v3742_v12 = vpop.eup %3741  ;;  %2361 = vst [vmem:[%s4689_s18 + $0x4d8] sm:$0xff] %v2988_v5  ;;  %v2990_v13 = vadd.f32 -0.5, %v1339_v6  ;;  %v1341_v14 = vmul.f32 0.5, %v3740_v8  ;;  %3767 = vtanh.f32 %v331_v3  ;;  %v347_v3 = vld [vmem:[%s4660_s23 + $0x5e8] sm:$0xff] }
  0xdb   : > { %v3744_v16 = vpop.eup %3743  ;;  %2362 = vst [vmem:[%s4689_s18 + $0x4e0] sm:$0xff] %v2989_v9  ;;  %v2991_v17 = vadd.f32 -0.5, %v1340_v10  ;;  %v1342_v18 = vmul.f32 0.5, %v3742_v12  ;;  %3769 = vtanh.f32 %v332_v7  ;;  %v348_v7 = vld [vmem:[%s4660_s23 + $0x5f0] sm:$0xff] }
  0xdc   : > { %v3746_v20 = vpop.eup %3745  ;;  %2363 = vst [vmem:[%s4689_s18 + $0x4e8] sm:$0xff] %v2990_v13  ;;  %v2992_v21 = vadd.f32 -0.5, %v1341_v14  ;;  %v1343_v22 = vmul.f32 0.5, %v3744_v16  ;;  %3771 = vtanh.f32 %v333_v11  ;;  %v349_v11 = vld [vmem:[%s4660_s23 + $0x5f8] sm:$0xff] }
  0xdd   : > { %v3748_v24 = vpop.eup %3747  ;;  %2364 = vst [vmem:[%s4689_s18 + $0x4f0] sm:$0xff] %v2991_v17  ;;  %v2993_v25 = vadd.f32 -0.5, %v1342_v18  ;;  %v1344_v26 = vmul.f32 0.5, %v3746_v20  ;;  %3773 = vtanh.f32 %v334_v15  ;;  %v350_v15 = vld [vmem:[%s4660_s23 + $0x600] sm:$0xff] }
  0xde   : > { %v3750_v28 = vpop.eup %3749  ;;  %2365 = vst [vmem:[%s4689_s18 + $0x4f8] sm:$0xff] %v2992_v21  ;;  %v2994_v29 = vadd.f32 -0.5, %v1343_v22  ;;  %v1345_v30 = vmul.f32 0.5, %v3748_v24  ;;  %3775 = vtanh.f32 %v335_v19  ;;  %v351_v19 = vld [vmem:[%s4660_s23 + $0x608] sm:$0xff] }
  0xdf   : > { %v3752_v32 = vpop.eup %3751  ;;  %2366 = vst [vmem:[%s4689_s18 + $0x500] sm:$0xff] %v2993_v25  ;;  %v2995_v33 = vadd.f32 -0.5, %v1344_v26  ;;  %v1346_v34 = vmul.f32 0.5, %v3750_v28  ;;  %3777 = vtanh.f32 %v336_v23  ;;  %v352_v23 = vld [vmem:[%s4660_s23 + $0x610] sm:$0xff] }
  0xe0   : > { %v3754_v36 = vpop.eup %3753  ;;  %2367 = vst [vmem:[%s4689_s18 + $0x508] sm:$0xff] %v2994_v29  ;;  %v2996_v37 = vadd.f32 -0.5, %v1345_v30  ;;  %v1347_v38 = vmul.f32 0.5, %v3752_v32  ;;  %3779 = vtanh.f32 %v337_v27  ;;  %v353_v27 = vld [vmem:[%s4660_s23 + $0x618] sm:$0xff] }
  0xe1   : > { %v3756_v40 = vpop.eup %3755  ;;  %2368 = vst [vmem:[%s4689_s18 + $0x510] sm:$0xff] %v2995_v33  ;;  %v2997_v41 = vadd.f32 -0.5, %v1346_v34  ;;  %v1348_v42 = vmul.f32 0.5, %v3754_v36  ;;  %3781 = vtanh.f32 %v338_v31  ;;  %v354_v31 = vld [vmem:[%s4660_s23 + $0x620] sm:$0xff] }
  0xe2   : > { %v3758_v44 = vpop.eup %3757  ;;  %2369 = vst [vmem:[%s4689_s18 + $0x518] sm:$0xff] %v2996_v37  ;;  %v2998_v45 = vadd.f32 -0.5, %v1347_v38  ;;  %v1349_v46 = vmul.f32 0.5, %v3756_v40  ;;  %3783 = vtanh.f32 %v339_v35  ;;  %v355_v35 = vld [vmem:[%s4660_s23 + $0x628] sm:$0xff] }
  0xe3   : > { %v3760_v48 = vpop.eup %3759  ;;  %2370 = vst [vmem:[%s4689_s18 + $0x520] sm:$0xff] %v2997_v41  ;;  %v2999_v49 = vadd.f32 -0.5, %v1348_v42  ;;  %v1350_v50 = vmul.f32 0.5, %v3758_v44  ;;  %3785 = vtanh.f32 %v340_v39  ;;  %v356_v39 = vld [vmem:[%s4660_s23 + $0x630] sm:$0xff] }
  0xe4   : > { %v3762_v52 = vpop.eup %3761  ;;  %2371 = vst [vmem:[%s4689_s18 + $0x528] sm:$0xff] %v2998_v45  ;;  %v3000_v53 = vadd.f32 -0.5, %v1349_v46  ;;  %v1351_v54 = vmul.f32 0.5, %v3760_v48  ;;  %3787 = vtanh.f32 %v341_v43  ;;  %v357_v43 = vld [vmem:[%s4660_s23 + $0x638] sm:$0xff] }
  0xe5   : > { %v3764_v56 = vpop.eup %3763  ;;  %2372 = vst [vmem:[%s4689_s18 + $0x530] sm:$0xff] %v2999_v49  ;;  %v3001_v57 = vadd.f32 -0.5, %v1350_v50  ;;  %v1352_v58 = vmul.f32 0.5, %v3762_v52  ;;  %3789 = vtanh.f32 %v342_v47  ;;  %v358_v47 = vld [vmem:[%s4660_s23 + $0x640] sm:$0xff] }
  0xe6   : > { %v3766_v60 = vpop.eup %3765  ;;  %2373 = vst [vmem:[%s4689_s18 + $0x538] sm:$0xff] %v3000_v53  ;;  %v3002_v61 = vadd.f32 -0.5, %v1351_v54  ;;  %v1353_v62 = vmul.f32 0.5, %v3764_v56  ;;  %3791 = vtanh.f32 %v343_v51  ;;  %v359_v51 = vld [vmem:[%s4660_s23 + $0x648] sm:$0xff] }
  0xe7   : > { %v3768_v0 = vpop.eup %3767  ;;  %2374 = vst [vmem:[%s4689_s18 + $0x540] sm:$0xff] %v3001_v57  ;;  %v3003_v1 = vadd.f32 -0.5, %v1352_v58  ;;  %v1354_v2 = vmul.f32 0.5, %v3766_v60  ;;  %3793 = vtanh.f32 %v344_v55  ;;  %v360_v55 = vld [vmem:[%s4660_s23 + $0x650] sm:$0xff] }
  0xe8   : > { %v3770_v4 = vpop.eup %3769  ;;  %2375 = vst [vmem:[%s4689_s18 + $0x548] sm:$0xff] %v3002_v61  ;;  %v3004_v5 = vadd.f32 -0.5, %v1353_v62  ;;  %v1355_v6 = vmul.f32 0.5, %v3768_v0  ;;  %3795 = vtanh.f32 %v345_v59  ;;  %v361_v59 = vld [vmem:[%s4660_s23 + $0x658] sm:$0xff] }
  0xe9   : > { %v3772_v8 = vpop.eup %3771  ;;  %2376 = vst [vmem:[%s4689_s18 + $0x550] sm:$0xff] %v3003_v1  ;;  %v3005_v9 = vadd.f32 -0.5, %v1354_v2  ;;  %v1356_v10 = vmul.f32 0.5, %v3770_v4  ;;  %3797 = vtanh.f32 %v346_v63  ;;  %v362_v63 = vld [vmem:[%s4660_s23 + $0x660] sm:$0xff] }
  0xea   : > { %v3774_v12 = vpop.eup %3773  ;;  %2377 = vst [vmem:[%s4689_s18 + $0x558] sm:$0xff] %v3004_v5  ;;  %v3006_v13 = vadd.f32 -0.5, %v1355_v6  ;;  %v1357_v14 = vmul.f32 0.5, %v3772_v8  ;;  %3799 = vtanh.f32 %v347_v3  ;;  %v363_v3 = vld [vmem:[%s4660_s23 + $0x668] sm:$0xff] }
  0xeb   : > { %v3776_v16 = vpop.eup %3775  ;;  %2378 = vst [vmem:[%s4689_s18 + $0x560] sm:$0xff] %v3005_v9  ;;  %v3007_v17 = vadd.f32 -0.5, %v1356_v10  ;;  %v1358_v18 = vmul.f32 0.5, %v3774_v12  ;;  %3801 = vtanh.f32 %v348_v7  ;;  %v364_v7 = vld [vmem:[%s4660_s23 + $0x670] sm:$0xff] }
  0xec   : > { %v3778_v20 = vpop.eup %3777  ;;  %2379 = vst [vmem:[%s4689_s18 + $0x568] sm:$0xff] %v3006_v13  ;;  %v3008_v21 = vadd.f32 -0.5, %v1357_v14  ;;  %v1359_v22 = vmul.f32 0.5, %v3776_v16  ;;  %3803 = vtanh.f32 %v349_v11  ;;  %v365_v11 = vld [vmem:[%s4660_s23 + $0x678] sm:$0xff] }
  0xed   : > { %v3780_v24 = vpop.eup %3779  ;;  %2380 = vst [vmem:[%s4689_s18 + $0x570] sm:$0xff] %v3007_v17  ;;  %v3009_v25 = vadd.f32 -0.5, %v1358_v18  ;;  %v1360_v26 = vmul.f32 0.5, %v3778_v20  ;;  %3805 = vtanh.f32 %v350_v15  ;;  %v366_v15 = vld [vmem:[%s4660_s23 + $0x680] sm:$0xff] }
  0xee   : > { %v3782_v28 = vpop.eup %3781  ;;  %2381 = vst [vmem:[%s4689_s18 + $0x578] sm:$0xff] %v3008_v21  ;;  %v3010_v29 = vadd.f32 -0.5, %v1359_v22  ;;  %v1361_v30 = vmul.f32 0.5, %v3780_v24  ;;  %3807 = vtanh.f32 %v351_v19  ;;  %v367_v19 = vld [vmem:[%s4660_s23 + $0x688] sm:$0xff] }
  0xef   : > { %v3784_v32 = vpop.eup %3783  ;;  %2382 = vst [vmem:[%s4689_s18 + $0x580] sm:$0xff] %v3009_v25  ;;  %v3011_v33 = vadd.f32 -0.5, %v1360_v26  ;;  %v1362_v34 = vmul.f32 0.5, %v3782_v28  ;;  %3809 = vtanh.f32 %v352_v23  ;;  %v368_v23 = vld [vmem:[%s4660_s23 + $0x690] sm:$0xff] }
  0xf0   : > { %v3786_v36 = vpop.eup %3785  ;;  %2383 = vst [vmem:[%s4689_s18 + $0x588] sm:$0xff] %v3010_v29  ;;  %v3012_v37 = vadd.f32 -0.5, %v1361_v30  ;;  %v1363_v38 = vmul.f32 0.5, %v3784_v32  ;;  %3811 = vtanh.f32 %v353_v27  ;;  %v369_v27 = vld [vmem:[%s4660_s23 + $0x698] sm:$0xff] }
  0xf1   : > { %v3788_v40 = vpop.eup %3787  ;;  %2384 = vst [vmem:[%s4689_s18 + $0x590] sm:$0xff] %v3011_v33  ;;  %v3013_v41 = vadd.f32 -0.5, %v1362_v34  ;;  %v1364_v42 = vmul.f32 0.5, %v3786_v36  ;;  %3813 = vtanh.f32 %v354_v31  ;;  %v370_v31 = vld [vmem:[%s4660_s23 + $0x6a0] sm:$0xff] }
  0xf2   : > { %v3790_v44 = vpop.eup %3789  ;;  %2385 = vst [vmem:[%s4689_s18 + $0x598] sm:$0xff] %v3012_v37  ;;  %v3014_v45 = vadd.f32 -0.5, %v1363_v38  ;;  %v1365_v46 = vmul.f32 0.5, %v3788_v40  ;;  %3815 = vtanh.f32 %v355_v35  ;;  %v371_v35 = vld [vmem:[%s4660_s23 + $0x6a8] sm:$0xff] }
  0xf3   : > { %v3792_v48 = vpop.eup %3791  ;;  %2386 = vst [vmem:[%s4689_s18 + $0x5a0] sm:$0xff] %v3013_v41  ;;  %v3015_v49 = vadd.f32 -0.5, %v1364_v42  ;;  %v1366_v50 = vmul.f32 0.5, %v3790_v44  ;;  %3817 = vtanh.f32 %v356_v39  ;;  %v372_v39 = vld [vmem:[%s4660_s23 + $0x6b0] sm:$0xff] }
  0xf4   : > { %v3794_v52 = vpop.eup %3793  ;;  %2387 = vst [vmem:[%s4689_s18 + $0x5a8] sm:$0xff] %v3014_v45  ;;  %v3016_v53 = vadd.f32 -0.5, %v1365_v46  ;;  %v1367_v54 = vmul.f32 0.5, %v3792_v48  ;;  %3819 = vtanh.f32 %v357_v43  ;;  %v373_v43 = vld [vmem:[%s4660_s23 + $0x6b8] sm:$0xff] }
  0xf5   : > { %v3796_v56 = vpop.eup %3795  ;;  %2388 = vst [vmem:[%s4689_s18 + $0x5b0] sm:$0xff] %v3015_v49  ;;  %v3017_v57 = vadd.f32 -0.5, %v1366_v50  ;;  %v1368_v58 = vmul.f32 0.5, %v3794_v52  ;;  %3821 = vtanh.f32 %v358_v47  ;;  %v374_v47 = vld [vmem:[%s4660_s23 + $0x6c0] sm:$0xff] }
  0xf6   : > { %v3798_v60 = vpop.eup %3797  ;;  %2389 = vst [vmem:[%s4689_s18 + $0x5b8] sm:$0xff] %v3016_v53  ;;  %v3018_v61 = vadd.f32 -0.5, %v1367_v54  ;;  %v1369_v62 = vmul.f32 0.5, %v3796_v56  ;;  %3823 = vtanh.f32 %v359_v51  ;;  %v375_v51 = vld [vmem:[%s4660_s23 + $0x6c8] sm:$0xff] }
  0xf7   : > { %v3800_v0 = vpop.eup %3799  ;;  %2390 = vst [vmem:[%s4689_s18 + $0x5c0] sm:$0xff] %v3017_v57  ;;  %v3019_v1 = vadd.f32 -0.5, %v1368_v58  ;;  %v1370_v2 = vmul.f32 0.5, %v3798_v60  ;;  %3825 = vtanh.f32 %v360_v55  ;;  %v376_v55 = vld [vmem:[%s4660_s23 + $0x6d0] sm:$0xff] }
  0xf8   : > { %v3802_v4 = vpop.eup %3801  ;;  %2391 = vst [vmem:[%s4689_s18 + $0x5c8] sm:$0xff] %v3018_v61  ;;  %v3020_v5 = vadd.f32 -0.5, %v1369_v62  ;;  %v1371_v6 = vmul.f32 0.5, %v3800_v0  ;;  %3827 = vtanh.f32 %v361_v59  ;;  %v377_v59 = vld [vmem:[%s4660_s23 + $0x6d8] sm:$0xff] }
  0xf9   : > { %v3804_v8 = vpop.eup %3803  ;;  %2392 = vst [vmem:[%s4689_s18 + $0x5d0] sm:$0xff] %v3019_v1  ;;  %v3021_v9 = vadd.f32 -0.5, %v1370_v2  ;;  %v1372_v10 = vmul.f32 0.5, %v3802_v4  ;;  %3829 = vtanh.f32 %v362_v63  ;;  %v378_v63 = vld [vmem:[%s4660_s23 + $0x6e0] sm:$0xff] }
  0xfa   : > { %v3806_v12 = vpop.eup %3805  ;;  %2393 = vst [vmem:[%s4689_s18 + $0x5d8] sm:$0xff] %v3020_v5  ;;  %v3022_v13 = vadd.f32 -0.5, %v1371_v6  ;;  %v1373_v14 = vmul.f32 0.5, %v3804_v8  ;;  %3831 = vtanh.f32 %v363_v3  ;;  %v379_v3 = vld [vmem:[%s4660_s23 + $0x6e8] sm:$0xff] }
  0xfb   : > { %v3808_v16 = vpop.eup %3807  ;;  %2394 = vst [vmem:[%s4689_s18 + $0x5e0] sm:$0xff] %v3021_v9  ;;  %v3023_v17 = vadd.f32 -0.5, %v1372_v10  ;;  %v1374_v18 = vmul.f32 0.5, %v3806_v12  ;;  %3833 = vtanh.f32 %v364_v7  ;;  %v380_v7 = vld [vmem:[%s4660_s23 + $0x6f0] sm:$0xff] }
  0xfc   : > { %v3810_v20 = vpop.eup %3809  ;;  %2395 = vst [vmem:[%s4689_s18 + $0x5e8] sm:$0xff] %v3022_v13  ;;  %v3024_v21 = vadd.f32 -0.5, %v1373_v14  ;;  %v1375_v22 = vmul.f32 0.5, %v3808_v16  ;;  %3835 = vtanh.f32 %v365_v11  ;;  %v381_v11 = vld [vmem:[%s4660_s23 + $0x6f8] sm:$0xff] }
  0xfd   : > { %v3812_v24 = vpop.eup %3811  ;;  %2396 = vst [vmem:[%s4689_s18 + $0x5f0] sm:$0xff] %v3023_v17  ;;  %v3025_v25 = vadd.f32 -0.5, %v1374_v18  ;;  %v1376_v26 = vmul.f32 0.5, %v3810_v20  ;;  %3837 = vtanh.f32 %v366_v15  ;;  %v382_v15 = vld [vmem:[%s4660_s23 + $0x700] sm:$0xff] }
  0xfe   : > { %v3814_v28 = vpop.eup %3813  ;;  %2397 = vst [vmem:[%s4689_s18 + $0x5f8] sm:$0xff] %v3024_v21  ;;  %v3026_v29 = vadd.f32 -0.5, %v1375_v22  ;;  %v1377_v30 = vmul.f32 0.5, %v3812_v24  ;;  %3839 = vtanh.f32 %v367_v19  ;;  %v383_v19 = vld [vmem:[%s4660_s23 + $0x708] sm:$0xff] }
  0xff   : > { %v3816_v32 = vpop.eup %3815  ;;  %2398 = vst [vmem:[%s4689_s18 + $0x600] sm:$0xff] %v3025_v25  ;;  %v3027_v33 = vadd.f32 -0.5, %v1376_v26  ;;  %v1378_v34 = vmul.f32 0.5, %v3814_v28  ;;  %3841 = vtanh.f32 %v368_v23  ;;  %v384_v23 = vld [vmem:[%s4660_s23 + $0x710] sm:$0xff] }
 0x100   : > { %v3818_v36 = vpop.eup %3817  ;;  %2399 = vst [vmem:[%s4689_s18 + $0x608] sm:$0xff] %v3026_v29  ;;  %v3028_v37 = vadd.f32 -0.5, %v1377_v30  ;;  %v1379_v38 = vmul.f32 0.5, %v3816_v32  ;;  %3843 = vtanh.f32 %v369_v27  ;;  %v385_v27 = vld [vmem:[%s4660_s23 + $0x718] sm:$0xff] }
 0x101   : > { %v3820_v40 = vpop.eup %3819  ;;  %2400 = vst [vmem:[%s4689_s18 + $0x610] sm:$0xff] %v3027_v33  ;;  %v3029_v41 = vadd.f32 -0.5, %v1378_v34  ;;  %v1380_v42 = vmul.f32 0.5, %v3818_v36  ;;  %3845 = vtanh.f32 %v370_v31  ;;  %v386_v31 = vld [vmem:[%s4660_s23 + $0x720] sm:$0xff] }
 0x102   : > { %v3822_v44 = vpop.eup %3821  ;;  %2401 = vst [vmem:[%s4689_s18 + $0x618] sm:$0xff] %v3028_v37  ;;  %v3030_v45 = vadd.f32 -0.5, %v1379_v38  ;;  %v1381_v46 = vmul.f32 0.5, %v3820_v40  ;;  %3847 = vtanh.f32 %v371_v35  ;;  %v387_v35 = vld [vmem:[%s4660_s23 + $0x728] sm:$0xff] }
 0x103   : > { %v3824_v48 = vpop.eup %3823  ;;  %2402 = vst [vmem:[%s4689_s18 + $0x620] sm:$0xff] %v3029_v41  ;;  %v3031_v49 = vadd.f32 -0.5, %v1380_v42  ;;  %v1382_v50 = vmul.f32 0.5, %v3822_v44  ;;  %3849 = vtanh.f32 %v372_v39  ;;  %v388_v39 = vld [vmem:[%s4660_s23 + $0x730] sm:$0xff] }
 0x104   : > { %v3826_v52 = vpop.eup %3825  ;;  %2403 = vst [vmem:[%s4689_s18 + $0x628] sm:$0xff] %v3030_v45  ;;  %v3032_v53 = vadd.f32 -0.5, %v1381_v46  ;;  %v1383_v54 = vmul.f32 0.5, %v3824_v48  ;;  %3851 = vtanh.f32 %v373_v43  ;;  %v389_v43 = vld [vmem:[%s4660_s23 + $0x738] sm:$0xff] }
 0x105   : > { %v3828_v56 = vpop.eup %3827  ;;  %2404 = vst [vmem:[%s4689_s18 + $0x630] sm:$0xff] %v3031_v49  ;;  %v3033_v57 = vadd.f32 -0.5, %v1382_v50  ;;  %v1384_v58 = vmul.f32 0.5, %v3826_v52  ;;  %3853 = vtanh.f32 %v374_v47  ;;  %v390_v47 = vld [vmem:[%s4660_s23 + $0x740] sm:$0xff] }
 0x106   : > { %v3830_v60 = vpop.eup %3829  ;;  %2405 = vst [vmem:[%s4689_s18 + $0x638] sm:$0xff] %v3032_v53  ;;  %v3034_v61 = vadd.f32 -0.5, %v1383_v54  ;;  %v1385_v62 = vmul.f32 0.5, %v3828_v56  ;;  %3855 = vtanh.f32 %v375_v51  ;;  %v391_v51 = vld [vmem:[%s4660_s23 + $0x748] sm:$0xff] }
 0x107   : > { %v3832_v0 = vpop.eup %3831  ;;  %2406 = vst [vmem:[%s4689_s18 + $0x640] sm:$0xff] %v3033_v57  ;;  %v3035_v1 = vadd.f32 -0.5, %v1384_v58  ;;  %v1386_v2 = vmul.f32 0.5, %v3830_v60  ;;  %3857 = vtanh.f32 %v376_v55  ;;  %v392_v55 = vld [vmem:[%s4660_s23 + $0x750] sm:$0xff] }
 0x108   : > { %v3834_v4 = vpop.eup %3833  ;;  %2407 = vst [vmem:[%s4689_s18 + $0x648] sm:$0xff] %v3034_v61  ;;  %v3036_v5 = vadd.f32 -0.5, %v1385_v62  ;;  %v1387_v6 = vmul.f32 0.5, %v3832_v0  ;;  %3859 = vtanh.f32 %v377_v59  ;;  %v393_v59 = vld [vmem:[%s4660_s23 + $0x758] sm:$0xff] }
 0x109   : > { %v3836_v8 = vpop.eup %3835  ;;  %2408 = vst [vmem:[%s4689_s18 + $0x650] sm:$0xff] %v3035_v1  ;;  %v3037_v9 = vadd.f32 -0.5, %v1386_v2  ;;  %v1388_v10 = vmul.f32 0.5, %v3834_v4  ;;  %3861 = vtanh.f32 %v378_v63  ;;  %v394_v63 = vld [vmem:[%s4660_s23 + $0x760] sm:$0xff] }
 0x10a   : > { %v3838_v12 = vpop.eup %3837  ;;  %2409 = vst [vmem:[%s4689_s18 + $0x658] sm:$0xff] %v3036_v5  ;;  %v3038_v13 = vadd.f32 -0.5, %v1387_v6  ;;  %v1389_v14 = vmul.f32 0.5, %v3836_v8  ;;  %3863 = vtanh.f32 %v379_v3  ;;  %v395_v3 = vld [vmem:[%s4660_s23 + $0x768] sm:$0xff] }
 0x10b   : > { %v3840_v16 = vpop.eup %3839  ;;  %2410 = vst [vmem:[%s4689_s18 + $0x660] sm:$0xff] %v3037_v9  ;;  %v3039_v17 = vadd.f32 -0.5, %v1388_v10  ;;  %v1390_v18 = vmul.f32 0.5, %v3838_v12  ;;  %3865 = vtanh.f32 %v380_v7  ;;  %v396_v7 = vld [vmem:[%s4660_s23 + $0x770] sm:$0xff] }
 0x10c   : > { %v3842_v20 = vpop.eup %3841  ;;  %2411 = vst [vmem:[%s4689_s18 + $0x668] sm:$0xff] %v3038_v13  ;;  %v3040_v21 = vadd.f32 -0.5, %v1389_v14  ;;  %v1391_v22 = vmul.f32 0.5, %v3840_v16  ;;  %3867 = vtanh.f32 %v381_v11  ;;  %v397_v11 = vld [vmem:[%s4660_s23 + $0x778] sm:$0xff] }
 0x10d   : > { %v3844_v24 = vpop.eup %3843  ;;  %2412 = vst [vmem:[%s4689_s18 + $0x670] sm:$0xff] %v3039_v17  ;;  %v3041_v25 = vadd.f32 -0.5, %v1390_v18  ;;  %v1392_v26 = vmul.f32 0.5, %v3842_v20  ;;  %3869 = vtanh.f32 %v382_v15  ;;  %v398_v15 = vld [vmem:[%s4660_s23 + $0x780] sm:$0xff] }
 0x10e   : > { %v3846_v28 = vpop.eup %3845  ;;  %2413 = vst [vmem:[%s4689_s18 + $0x678] sm:$0xff] %v3040_v21  ;;  %v3042_v29 = vadd.f32 -0.5, %v1391_v22  ;;  %v1393_v30 = vmul.f32 0.5, %v3844_v24  ;;  %3871 = vtanh.f32 %v383_v19  ;;  %v399_v19 = vld [vmem:[%s4660_s23 + $0x788] sm:$0xff] }
 0x10f   : > { %v3848_v32 = vpop.eup %3847  ;;  %2414 = vst [vmem:[%s4689_s18 + $0x680] sm:$0xff] %v3041_v25  ;;  %v3043_v33 = vadd.f32 -0.5, %v1392_v26  ;;  %v1394_v34 = vmul.f32 0.5, %v3846_v28  ;;  %3873 = vtanh.f32 %v384_v23  ;;  %v400_v23 = vld [vmem:[%s4660_s23 + $0x790] sm:$0xff] }
 0x110   : > { %v3850_v36 = vpop.eup %3849  ;;  %2415 = vst [vmem:[%s4689_s18 + $0x688] sm:$0xff] %v3042_v29  ;;  %v3044_v37 = vadd.f32 -0.5, %v1393_v30  ;;  %v1395_v38 = vmul.f32 0.5, %v3848_v32  ;;  %3875 = vtanh.f32 %v385_v27  ;;  %v401_v27 = vld [vmem:[%s4660_s23 + $0x798] sm:$0xff] }
 0x111   : > { %v3852_v40 = vpop.eup %3851  ;;  %2416 = vst [vmem:[%s4689_s18 + $0x690] sm:$0xff] %v3043_v33  ;;  %v3045_v41 = vadd.f32 -0.5, %v1394_v34  ;;  %v1396_v42 = vmul.f32 0.5, %v3850_v36  ;;  %3877 = vtanh.f32 %v386_v31  ;;  %v402_v31 = vld [vmem:[%s4660_s23 + $0x7a0] sm:$0xff] }
 0x112   : > { %v3854_v44 = vpop.eup %3853  ;;  %2417 = vst [vmem:[%s4689_s18 + $0x698] sm:$0xff] %v3044_v37  ;;  %v3046_v45 = vadd.f32 -0.5, %v1395_v38  ;;  %v1397_v46 = vmul.f32 0.5, %v3852_v40  ;;  %3879 = vtanh.f32 %v387_v35  ;;  %v403_v35 = vld [vmem:[%s4660_s23 + $0x7a8] sm:$0xff] }
 0x113   : > { %v3856_v48 = vpop.eup %3855  ;;  %2418 = vst [vmem:[%s4689_s18 + $0x6a0] sm:$0xff] %v3045_v41  ;;  %v3047_v49 = vadd.f32 -0.5, %v1396_v42  ;;  %v1398_v50 = vmul.f32 0.5, %v3854_v44  ;;  %3881 = vtanh.f32 %v388_v39  ;;  %v404_v39 = vld [vmem:[%s4660_s23 + $0x7b0] sm:$0xff] }
 0x114   : > { %v3858_v52 = vpop.eup %3857  ;;  %2419 = vst [vmem:[%s4689_s18 + $0x6a8] sm:$0xff] %v3046_v45  ;;  %v3048_v53 = vadd.f32 -0.5, %v1397_v46  ;;  %v1399_v54 = vmul.f32 0.5, %v3856_v48  ;;  %3883 = vtanh.f32 %v389_v43  ;;  %v405_v43 = vld [vmem:[%s4660_s23 + $0x7b8] sm:$0xff] }
 0x115   : > { %v3860_v56 = vpop.eup %3859  ;;  %2420 = vst [vmem:[%s4689_s18 + $0x6b0] sm:$0xff] %v3047_v49  ;;  %v3049_v57 = vadd.f32 -0.5, %v1398_v50  ;;  %v1400_v58 = vmul.f32 0.5, %v3858_v52  ;;  %3885 = vtanh.f32 %v390_v47  ;;  %v406_v47 = vld [vmem:[%s4660_s23 + $0x7c0] sm:$0xff] }
 0x116   : > { %v3862_v60 = vpop.eup %3861  ;;  %2421 = vst [vmem:[%s4689_s18 + $0x6b8] sm:$0xff] %v3048_v53  ;;  %v3050_v61 = vadd.f32 -0.5, %v1399_v54  ;;  %v1401_v62 = vmul.f32 0.5, %v3860_v56  ;;  %3887 = vtanh.f32 %v391_v51  ;;  %v407_v51 = vld [vmem:[%s4660_s23 + $0x7c8] sm:$0xff] }
 0x117   : > { %v3864_v0 = vpop.eup %3863  ;;  %2422 = vst [vmem:[%s4689_s18 + $0x6c0] sm:$0xff] %v3049_v57  ;;  %v3051_v1 = vadd.f32 -0.5, %v1400_v58  ;;  %v1402_v2 = vmul.f32 0.5, %v3862_v60  ;;  %3889 = vtanh.f32 %v392_v55  ;;  %v408_v55 = vld [vmem:[%s4660_s23 + $0x7d0] sm:$0xff] }
 0x118   : > { %v3866_v4 = vpop.eup %3865  ;;  %2423 = vst [vmem:[%s4689_s18 + $0x6c8] sm:$0xff] %v3050_v61  ;;  %v3052_v5 = vadd.f32 -0.5, %v1401_v62  ;;  %v1403_v6 = vmul.f32 0.5, %v3864_v0  ;;  %3891 = vtanh.f32 %v393_v59  ;;  %v409_v59 = vld [vmem:[%s4660_s23 + $0x7d8] sm:$0xff] }
 0x119   : > { %v3868_v8 = vpop.eup %3867  ;;  %2424 = vst [vmem:[%s4689_s18 + $0x6d0] sm:$0xff] %v3051_v1  ;;  %v3053_v9 = vadd.f32 -0.5, %v1402_v2  ;;  %v1404_v10 = vmul.f32 0.5, %v3866_v4  ;;  %3893 = vtanh.f32 %v394_v63  ;;  %v410_v63 = vld [vmem:[%s4660_s23 + $0x7e0] sm:$0xff] }
 0x11a   : > { %v3870_v12 = vpop.eup %3869  ;;  %2425 = vst [vmem:[%s4689_s18 + $0x6d8] sm:$0xff] %v3052_v5  ;;  %v3054_v13 = vadd.f32 -0.5, %v1403_v6  ;;  %v1405_v14 = vmul.f32 0.5, %v3868_v8  ;;  %3895 = vtanh.f32 %v395_v3  ;;  %v411_v3 = vld [vmem:[%s4660_s23 + $0x7e8] sm:$0xff] }
 0x11b   : > { %v3872_v16 = vpop.eup %3871  ;;  %2426 = vst [vmem:[%s4689_s18 + $0x6e0] sm:$0xff] %v3053_v9  ;;  %v3055_v17 = vadd.f32 -0.5, %v1404_v10  ;;  %v1406_v18 = vmul.f32 0.5, %v3870_v12  ;;  %3897 = vtanh.f32 %v396_v7  ;;  %v412_v7 = vld [vmem:[%s4660_s23 + $0x7f0] sm:$0xff] }
 0x11c   : > { %v3874_v20 = vpop.eup %3873  ;;  %2427 = vst [vmem:[%s4689_s18 + $0x6e8] sm:$0xff] %v3054_v13  ;;  %v3056_v21 = vadd.f32 -0.5, %v1405_v14  ;;  %v1407_v22 = vmul.f32 0.5, %v3872_v16  ;;  %3899 = vtanh.f32 %v397_v11  ;;  %v413_v11 = vld [vmem:[%s4660_s23 + $0x7f8] sm:$0xff] }
 0x11d   : > { %v3876_v24 = vpop.eup %3875  ;;  %2428 = vst [vmem:[%s4689_s18 + $0x6f0] sm:$0xff] %v3055_v17  ;;  %v3057_v25 = vadd.f32 -0.5, %v1406_v18  ;;  %v1408_v26 = vmul.f32 0.5, %v3874_v20  ;;  %3901 = vtanh.f32 %v398_v15  ;;  %v414_v15 = vld [vmem:[%s4660_s23 + $0x800] sm:$0xff] }
 0x11e   : > { %v3878_v28 = vpop.eup %3877  ;;  %2429 = vst [vmem:[%s4689_s18 + $0x6f8] sm:$0xff] %v3056_v21  ;;  %v3058_v29 = vadd.f32 -0.5, %v1407_v22  ;;  %v1409_v30 = vmul.f32 0.5, %v3876_v24  ;;  %3903 = vtanh.f32 %v399_v19  ;;  %v415_v19 = vld [vmem:[%s4660_s23 + $0x808] sm:$0xff] }
 0x11f   : > { %v3880_v32 = vpop.eup %3879  ;;  %2430 = vst [vmem:[%s4689_s18 + $0x700] sm:$0xff] %v3057_v25  ;;  %v3059_v33 = vadd.f32 -0.5, %v1408_v26  ;;  %v1410_v34 = vmul.f32 0.5, %v3878_v28  ;;  %3905 = vtanh.f32 %v400_v23  ;;  %v416_v23 = vld [vmem:[%s4660_s23 + $0x810] sm:$0xff] }
 0x120   : > { %v3882_v36 = vpop.eup %3881  ;;  %2431 = vst [vmem:[%s4689_s18 + $0x708] sm:$0xff] %v3058_v29  ;;  %v3060_v37 = vadd.f32 -0.5, %v1409_v30  ;;  %v1411_v38 = vmul.f32 0.5, %v3880_v32  ;;  %3907 = vtanh.f32 %v401_v27  ;;  %v417_v27 = vld [vmem:[%s4660_s23 + $0x818] sm:$0xff] }
 0x121   : > { %v3884_v40 = vpop.eup %3883  ;;  %2432 = vst [vmem:[%s4689_s18 + $0x710] sm:$0xff] %v3059_v33  ;;  %v3061_v41 = vadd.f32 -0.5, %v1410_v34  ;;  %v1412_v42 = vmul.f32 0.5, %v3882_v36  ;;  %3909 = vtanh.f32 %v402_v31  ;;  %v418_v31 = vld [vmem:[%s4660_s23 + $0x820] sm:$0xff] }
 0x122   : > { %v3886_v44 = vpop.eup %3885  ;;  %2433 = vst [vmem:[%s4689_s18 + $0x718] sm:$0xff] %v3060_v37  ;;  %v3062_v45 = vadd.f32 -0.5, %v1411_v38  ;;  %v1413_v46 = vmul.f32 0.5, %v3884_v40  ;;  %3911 = vtanh.f32 %v403_v35  ;;  %v419_v35 = vld [vmem:[%s4660_s23 + $0x828] sm:$0xff] }
 0x123   : > { %v3888_v48 = vpop.eup %3887  ;;  %2434 = vst [vmem:[%s4689_s18 + $0x720] sm:$0xff] %v3061_v41  ;;  %v3063_v49 = vadd.f32 -0.5, %v1412_v42  ;;  %v1414_v50 = vmul.f32 0.5, %v3886_v44  ;;  %3913 = vtanh.f32 %v404_v39  ;;  %v420_v39 = vld [vmem:[%s4660_s23 + $0x830] sm:$0xff] }
 0x124   : > { %v3890_v52 = vpop.eup %3889  ;;  %2435 = vst [vmem:[%s4689_s18 + $0x728] sm:$0xff] %v3062_v45  ;;  %v3064_v53 = vadd.f32 -0.5, %v1413_v46  ;;  %v1415_v54 = vmul.f32 0.5, %v3888_v48  ;;  %3915 = vtanh.f32 %v405_v43  ;;  %v421_v43 = vld [vmem:[%s4660_s23 + $0x838] sm:$0xff] }
 0x125   : > { %v3892_v56 = vpop.eup %3891  ;;  %2436 = vst [vmem:[%s4689_s18 + $0x730] sm:$0xff] %v3063_v49  ;;  %v3065_v57 = vadd.f32 -0.5, %v1414_v50  ;;  %v1416_v58 = vmul.f32 0.5, %v3890_v52  ;;  %3917 = vtanh.f32 %v406_v47  ;;  %v422_v47 = vld [vmem:[%s4660_s23 + $0x840] sm:$0xff] }
 0x126   : > { %v3894_v60 = vpop.eup %3893  ;;  %2437 = vst [vmem:[%s4689_s18 + $0x738] sm:$0xff] %v3064_v53  ;;  %v3066_v61 = vadd.f32 -0.5, %v1415_v54  ;;  %v1417_v62 = vmul.f32 0.5, %v3892_v56  ;;  %3919 = vtanh.f32 %v407_v51  ;;  %v423_v51 = vld [vmem:[%s4660_s23 + $0x848] sm:$0xff] }
 0x127   : > { %v3896_v0 = vpop.eup %3895  ;;  %2438 = vst [vmem:[%s4689_s18 + $0x740] sm:$0xff] %v3065_v57  ;;  %v3067_v1 = vadd.f32 -0.5, %v1416_v58  ;;  %v1418_v2 = vmul.f32 0.5, %v3894_v60  ;;  %3921 = vtanh.f32 %v408_v55  ;;  %v424_v55 = vld [vmem:[%s4660_s23 + $0x850] sm:$0xff] }
 0x128   : > { %v3898_v4 = vpop.eup %3897  ;;  %2439 = vst [vmem:[%s4689_s18 + $0x748] sm:$0xff] %v3066_v61  ;;  %v3068_v5 = vadd.f32 -0.5, %v1417_v62  ;;  %v1419_v6 = vmul.f32 0.5, %v3896_v0  ;;  %3923 = vtanh.f32 %v409_v59  ;;  %v425_v59 = vld [vmem:[%s4660_s23 + $0x858] sm:$0xff] }
 0x129   : > { %v3900_v8 = vpop.eup %3899  ;;  %2440 = vst [vmem:[%s4689_s18 + $0x750] sm:$0xff] %v3067_v1  ;;  %v3069_v9 = vadd.f32 -0.5, %v1418_v2  ;;  %v1420_v10 = vmul.f32 0.5, %v3898_v4  ;;  %3925 = vtanh.f32 %v410_v63  ;;  %v426_v63 = vld [vmem:[%s4660_s23 + $0x860] sm:$0xff] }
 0x12a   : > { %v3902_v12 = vpop.eup %3901  ;;  %2441 = vst [vmem:[%s4689_s18 + $0x758] sm:$0xff] %v3068_v5  ;;  %v3070_v13 = vadd.f32 -0.5, %v1419_v6  ;;  %v1421_v14 = vmul.f32 0.5, %v3900_v8  ;;  %3927 = vtanh.f32 %v411_v3  ;;  %v427_v3 = vld [vmem:[%s4660_s23 + $0x868] sm:$0xff] }
 0x12b   : > { %v3904_v16 = vpop.eup %3903  ;;  %2442 = vst [vmem:[%s4689_s18 + $0x760] sm:$0xff] %v3069_v9  ;;  %v3071_v17 = vadd.f32 -0.5, %v1420_v10  ;;  %v1422_v18 = vmul.f32 0.5, %v3902_v12  ;;  %3929 = vtanh.f32 %v412_v7  ;;  %v428_v7 = vld [vmem:[%s4660_s23 + $0x870] sm:$0xff] }
 0x12c   : > { %v3906_v20 = vpop.eup %3905  ;;  %2443 = vst [vmem:[%s4689_s18 + $0x768] sm:$0xff] %v3070_v13  ;;  %v3072_v21 = vadd.f32 -0.5, %v1421_v14  ;;  %v1423_v22 = vmul.f32 0.5, %v3904_v16  ;;  %3931 = vtanh.f32 %v413_v11  ;;  %v429_v11 = vld [vmem:[%s4660_s23 + $0x878] sm:$0xff] }
 0x12d   : > { %v3908_v24 = vpop.eup %3907  ;;  %2444 = vst [vmem:[%s4689_s18 + $0x770] sm:$0xff] %v3071_v17  ;;  %v3073_v25 = vadd.f32 -0.5, %v1422_v18  ;;  %v1424_v26 = vmul.f32 0.5, %v3906_v20  ;;  %3933 = vtanh.f32 %v414_v15  ;;  %v430_v15 = vld [vmem:[%s4660_s23 + $0x880] sm:$0xff] }
 0x12e   : > { %v3910_v28 = vpop.eup %3909  ;;  %2445 = vst [vmem:[%s4689_s18 + $0x778] sm:$0xff] %v3072_v21  ;;  %v3074_v29 = vadd.f32 -0.5, %v1423_v22  ;;  %v1425_v30 = vmul.f32 0.5, %v3908_v24  ;;  %3935 = vtanh.f32 %v415_v19  ;;  %v431_v19 = vld [vmem:[%s4660_s23 + $0x888] sm:$0xff] }
 0x12f   : > { %v3912_v32 = vpop.eup %3911  ;;  %2446 = vst [vmem:[%s4689_s18 + $0x780] sm:$0xff] %v3073_v25  ;;  %v3075_v33 = vadd.f32 -0.5, %v1424_v26  ;;  %v1426_v34 = vmul.f32 0.5, %v3910_v28  ;;  %3937 = vtanh.f32 %v416_v23  ;;  %v432_v23 = vld [vmem:[%s4660_s23 + $0x890] sm:$0xff] }
 0x130   : > { %v3914_v36 = vpop.eup %3913  ;;  %2447 = vst [vmem:[%s4689_s18 + $0x788] sm:$0xff] %v3074_v29  ;;  %v3076_v37 = vadd.f32 -0.5, %v1425_v30  ;;  %v1427_v38 = vmul.f32 0.5, %v3912_v32  ;;  %3939 = vtanh.f32 %v417_v27  ;;  %v433_v27 = vld [vmem:[%s4660_s23 + $0x898] sm:$0xff] }
 0x131   : > { %v3916_v40 = vpop.eup %3915  ;;  %2448 = vst [vmem:[%s4689_s18 + $0x790] sm:$0xff] %v3075_v33  ;;  %v3077_v41 = vadd.f32 -0.5, %v1426_v34  ;;  %v1428_v42 = vmul.f32 0.5, %v3914_v36  ;;  %3941 = vtanh.f32 %v418_v31  ;;  %v434_v31 = vld [vmem:[%s4660_s23 + $0x8a0] sm:$0xff] }
 0x132   : > { %v3918_v44 = vpop.eup %3917  ;;  %2449 = vst [vmem:[%s4689_s18 + $0x798] sm:$0xff] %v3076_v37  ;;  %v3078_v45 = vadd.f32 -0.5, %v1427_v38  ;;  %v1429_v46 = vmul.f32 0.5, %v3916_v40  ;;  %3943 = vtanh.f32 %v419_v35  ;;  %v435_v35 = vld [vmem:[%s4660_s23 + $0x8a8] sm:$0xff] }
 0x133   : > { %v3920_v48 = vpop.eup %3919  ;;  %2450 = vst [vmem:[%s4689_s18 + $0x7a0] sm:$0xff] %v3077_v41  ;;  %v3079_v49 = vadd.f32 -0.5, %v1428_v42  ;;  %v1430_v50 = vmul.f32 0.5, %v3918_v44  ;;  %3945 = vtanh.f32 %v420_v39  ;;  %v436_v39 = vld [vmem:[%s4660_s23 + $0x8b0] sm:$0xff] }
 0x134   : > { %v3922_v52 = vpop.eup %3921  ;;  %2451 = vst [vmem:[%s4689_s18 + $0x7a8] sm:$0xff] %v3078_v45  ;;  %v3080_v53 = vadd.f32 -0.5, %v1429_v46  ;;  %v1431_v54 = vmul.f32 0.5, %v3920_v48  ;;  %3947 = vtanh.f32 %v421_v43  ;;  %v437_v43 = vld [vmem:[%s4660_s23 + $0x8b8] sm:$0xff] }
 0x135   : > { %v3924_v56 = vpop.eup %3923  ;;  %2452 = vst [vmem:[%s4689_s18 + $0x7b0] sm:$0xff] %v3079_v49  ;;  %v3081_v57 = vadd.f32 -0.5, %v1430_v50  ;;  %v1432_v58 = vmul.f32 0.5, %v3922_v52  ;;  %3949 = vtanh.f32 %v422_v47  ;;  %v438_v47 = vld [vmem:[%s4660_s23 + $0x8c0] sm:$0xff] }
 0x136   : > { %v3926_v60 = vpop.eup %3925  ;;  %2453 = vst [vmem:[%s4689_s18 + $0x7b8] sm:$0xff] %v3080_v53  ;;  %v3082_v61 = vadd.f32 -0.5, %v1431_v54  ;;  %v1433_v62 = vmul.f32 0.5, %v3924_v56  ;;  %3951 = vtanh.f32 %v423_v51  ;;  %v439_v51 = vld [vmem:[%s4660_s23 + $0x8c8] sm:$0xff] }
 0x137   : > { %v3928_v0 = vpop.eup %3927  ;;  %2454 = vst [vmem:[%s4689_s18 + $0x7c0] sm:$0xff] %v3081_v57  ;;  %v3083_v1 = vadd.f32 -0.5, %v1432_v58  ;;  %v1434_v2 = vmul.f32 0.5, %v3926_v60  ;;  %3953 = vtanh.f32 %v424_v55  ;;  %v440_v55 = vld [vmem:[%s4660_s23 + $0x8d0] sm:$0xff] }
 0x138   : > { %v3930_v4 = vpop.eup %3929  ;;  %2455 = vst [vmem:[%s4689_s18 + $0x7c8] sm:$0xff] %v3082_v61  ;;  %v3084_v5 = vadd.f32 -0.5, %v1433_v62  ;;  %v1435_v6 = vmul.f32 0.5, %v3928_v0  ;;  %3955 = vtanh.f32 %v425_v59  ;;  %v441_v59 = vld [vmem:[%s4660_s23 + $0x8d8] sm:$0xff] }
 0x139   : > { %v3932_v8 = vpop.eup %3931  ;;  %2456 = vst [vmem:[%s4689_s18 + $0x7d0] sm:$0xff] %v3083_v1  ;;  %v3085_v9 = vadd.f32 -0.5, %v1434_v2  ;;  %v1436_v10 = vmul.f32 0.5, %v3930_v4  ;;  %3957 = vtanh.f32 %v426_v63  ;;  %v442_v63 = vld [vmem:[%s4660_s23 + $0x8e0] sm:$0xff] }
 0x13a   : > { %v3934_v12 = vpop.eup %3933  ;;  %2457 = vst [vmem:[%s4689_s18 + $0x7d8] sm:$0xff] %v3084_v5  ;;  %v3086_v13 = vadd.f32 -0.5, %v1435_v6  ;;  %v1437_v14 = vmul.f32 0.5, %v3932_v8  ;;  %3959 = vtanh.f32 %v427_v3  ;;  %v443_v3 = vld [vmem:[%s4660_s23 + $0x8e8] sm:$0xff] }
 0x13b   : > { %v3936_v16 = vpop.eup %3935  ;;  %2458 = vst [vmem:[%s4689_s18 + $0x7e0] sm:$0xff] %v3085_v9  ;;  %v3087_v17 = vadd.f32 -0.5, %v1436_v10  ;;  %v1438_v18 = vmul.f32 0.5, %v3934_v12  ;;  %3961 = vtanh.f32 %v428_v7  ;;  %v444_v7 = vld [vmem:[%s4660_s23 + $0x8f0] sm:$0xff] }
 0x13c   : > { %v3938_v20 = vpop.eup %3937  ;;  %2459 = vst [vmem:[%s4689_s18 + $0x7e8] sm:$0xff] %v3086_v13  ;;  %v3088_v21 = vadd.f32 -0.5, %v1437_v14  ;;  %v1439_v22 = vmul.f32 0.5, %v3936_v16  ;;  %3963 = vtanh.f32 %v429_v11  ;;  %v445_v11 = vld [vmem:[%s4660_s23 + $0x8f8] sm:$0xff] }
 0x13d   : > { %v3940_v24 = vpop.eup %3939  ;;  %2460 = vst [vmem:[%s4689_s18 + $0x7f0] sm:$0xff] %v3087_v17  ;;  %v3089_v25 = vadd.f32 -0.5, %v1438_v18  ;;  %v1440_v26 = vmul.f32 0.5, %v3938_v20  ;;  %3965 = vtanh.f32 %v430_v15  ;;  %v446_v15 = vld [vmem:[%s4660_s23 + $0x900] sm:$0xff] }
 0x13e   : > { %v3942_v28 = vpop.eup %3941  ;;  %2461 = vst [vmem:[%s4689_s18 + $0x7f8] sm:$0xff] %v3088_v21  ;;  %v3090_v29 = vadd.f32 -0.5, %v1439_v22  ;;  %v1441_v30 = vmul.f32 0.5, %v3940_v24  ;;  %3967 = vtanh.f32 %v431_v19  ;;  %v447_v19 = vld [vmem:[%s4660_s23 + $0x908] sm:$0xff] }
 0x13f   : > { %v3944_v32 = vpop.eup %3943  ;;  %2462 = vst [vmem:[%s4689_s18 + $0x800] sm:$0xff] %v3089_v25  ;;  %v3091_v33 = vadd.f32 -0.5, %v1440_v26  ;;  %v1442_v34 = vmul.f32 0.5, %v3942_v28  ;;  %3969 = vtanh.f32 %v432_v23  ;;  %v448_v23 = vld [vmem:[%s4660_s23 + $0x910] sm:$0xff] }
 0x140   : > { %v3946_v36 = vpop.eup %3945  ;;  %2463 = vst [vmem:[%s4689_s18 + $0x808] sm:$0xff] %v3090_v29  ;;  %v3092_v37 = vadd.f32 -0.5, %v1441_v30  ;;  %v1443_v38 = vmul.f32 0.5, %v3944_v32  ;;  %3971 = vtanh.f32 %v433_v27  ;;  %v449_v27 = vld [vmem:[%s4660_s23 + $0x918] sm:$0xff] }
 0x141   : > { %v3948_v40 = vpop.eup %3947  ;;  %2464 = vst [vmem:[%s4689_s18 + $0x810] sm:$0xff] %v3091_v33  ;;  %v3093_v41 = vadd.f32 -0.5, %v1442_v34  ;;  %v1444_v42 = vmul.f32 0.5, %v3946_v36  ;;  %3973 = vtanh.f32 %v434_v31  ;;  %v450_v31 = vld [vmem:[%s4660_s23 + $0x920] sm:$0xff] }
 0x142   : > { %v3950_v44 = vpop.eup %3949  ;;  %2465 = vst [vmem:[%s4689_s18 + $0x818] sm:$0xff] %v3092_v37  ;;  %v3094_v45 = vadd.f32 -0.5, %v1443_v38  ;;  %v1445_v46 = vmul.f32 0.5, %v3948_v40  ;;  %3975 = vtanh.f32 %v435_v35  ;;  %v451_v35 = vld [vmem:[%s4660_s23 + $0x928] sm:$0xff] }
 0x143   : > { %v3952_v48 = vpop.eup %3951  ;;  %2466 = vst [vmem:[%s4689_s18 + $0x820] sm:$0xff] %v3093_v41  ;;  %v3095_v49 = vadd.f32 -0.5, %v1444_v42  ;;  %v1446_v50 = vmul.f32 0.5, %v3950_v44  ;;  %3977 = vtanh.f32 %v436_v39  ;;  %v452_v39 = vld [vmem:[%s4660_s23 + $0x930] sm:$0xff] }
 0x144   : > { %v3954_v52 = vpop.eup %3953  ;;  %2467 = vst [vmem:[%s4689_s18 + $0x828] sm:$0xff] %v3094_v45  ;;  %v3096_v53 = vadd.f32 -0.5, %v1445_v46  ;;  %v1447_v54 = vmul.f32 0.5, %v3952_v48  ;;  %3979 = vtanh.f32 %v437_v43  ;;  %v453_v43 = vld [vmem:[%s4660_s23 + $0x938] sm:$0xff] }
 0x145   : > { %v3956_v56 = vpop.eup %3955  ;;  %2468 = vst [vmem:[%s4689_s18 + $0x830] sm:$0xff] %v3095_v49  ;;  %v3097_v57 = vadd.f32 -0.5, %v1446_v50  ;;  %v1448_v58 = vmul.f32 0.5, %v3954_v52  ;;  %3981 = vtanh.f32 %v438_v47  ;;  %v454_v47 = vld [vmem:[%s4660_s23 + $0x940] sm:$0xff] }
 0x146   : > { %v3958_v60 = vpop.eup %3957  ;;  %2469 = vst [vmem:[%s4689_s18 + $0x838] sm:$0xff] %v3096_v53  ;;  %v3098_v61 = vadd.f32 -0.5, %v1447_v54  ;;  %v1449_v62 = vmul.f32 0.5, %v3956_v56  ;;  %3983 = vtanh.f32 %v439_v51  ;;  %v455_v51 = vld [vmem:[%s4660_s23 + $0x948] sm:$0xff] }
 0x147   : > { %v3960_v0 = vpop.eup %3959  ;;  %2470 = vst [vmem:[%s4689_s18 + $0x840] sm:$0xff] %v3097_v57  ;;  %v3099_v1 = vadd.f32 -0.5, %v1448_v58  ;;  %v1450_v2 = vmul.f32 0.5, %v3958_v60  ;;  %3985 = vtanh.f32 %v440_v55  ;;  %v456_v55 = vld [vmem:[%s4660_s23 + $0x950] sm:$0xff] }
 0x148   : > { %v3962_v4 = vpop.eup %3961  ;;  %2471 = vst [vmem:[%s4689_s18 + $0x848] sm:$0xff] %v3098_v61  ;;  %v3100_v5 = vadd.f32 -0.5, %v1449_v62  ;;  %v1451_v6 = vmul.f32 0.5, %v3960_v0  ;;  %3987 = vtanh.f32 %v441_v59  ;;  %v457_v59 = vld [vmem:[%s4660_s23 + $0x958] sm:$0xff] }
 0x149   : > { %v3964_v8 = vpop.eup %3963  ;;  %2472 = vst [vmem:[%s4689_s18 + $0x850] sm:$0xff] %v3099_v1  ;;  %v3101_v9 = vadd.f32 -0.5, %v1450_v2  ;;  %v1452_v10 = vmul.f32 0.5, %v3962_v4  ;;  %3989 = vtanh.f32 %v442_v63  ;;  %v458_v63 = vld [vmem:[%s4660_s23 + $0x960] sm:$0xff] }
 0x14a   : > { %v3966_v12 = vpop.eup %3965  ;;  %2473 = vst [vmem:[%s4689_s18 + $0x858] sm:$0xff] %v3100_v5  ;;  %v3102_v13 = vadd.f32 -0.5, %v1451_v6  ;;  %v1453_v14 = vmul.f32 0.5, %v3964_v8  ;;  %3991 = vtanh.f32 %v443_v3  ;;  %v459_v3 = vld [vmem:[%s4660_s23 + $0x968] sm:$0xff] }
 0x14b   : > { %v3968_v16 = vpop.eup %3967  ;;  %2474 = vst [vmem:[%s4689_s18 + $0x860] sm:$0xff] %v3101_v9  ;;  %v3103_v17 = vadd.f32 -0.5, %v1452_v10  ;;  %v1454_v18 = vmul.f32 0.5, %v3966_v12  ;;  %3993 = vtanh.f32 %v444_v7  ;;  %v460_v7 = vld [vmem:[%s4660_s23 + $0x970] sm:$0xff] }
 0x14c   : > { %v3970_v20 = vpop.eup %3969  ;;  %2475 = vst [vmem:[%s4689_s18 + $0x868] sm:$0xff] %v3102_v13  ;;  %v3104_v21 = vadd.f32 -0.5, %v1453_v14  ;;  %v1455_v22 = vmul.f32 0.5, %v3968_v16  ;;  %3995 = vtanh.f32 %v445_v11  ;;  %v461_v11 = vld [vmem:[%s4660_s23 + $0x978] sm:$0xff] }
 0x14d   : > { %v3972_v24 = vpop.eup %3971  ;;  %2476 = vst [vmem:[%s4689_s18 + $0x870] sm:$0xff] %v3103_v17  ;;  %v3105_v25 = vadd.f32 -0.5, %v1454_v18  ;;  %v1456_v26 = vmul.f32 0.5, %v3970_v20  ;;  %3997 = vtanh.f32 %v446_v15  ;;  %v462_v15 = vld [vmem:[%s4660_s23 + $0x980] sm:$0xff] }
 0x14e   : > { %v3974_v28 = vpop.eup %3973  ;;  %2477 = vst [vmem:[%s4689_s18 + $0x878] sm:$0xff] %v3104_v21  ;;  %v3106_v29 = vadd.f32 -0.5, %v1455_v22  ;;  %v1457_v30 = vmul.f32 0.5, %v3972_v24  ;;  %3999 = vtanh.f32 %v447_v19  ;;  %v463_v19 = vld [vmem:[%s4660_s23 + $0x988] sm:$0xff] }
 0x14f   : > { %v3976_v32 = vpop.eup %3975  ;;  %2478 = vst [vmem:[%s4689_s18 + $0x880] sm:$0xff] %v3105_v25  ;;  %v3107_v33 = vadd.f32 -0.5, %v1456_v26  ;;  %v1458_v34 = vmul.f32 0.5, %v3974_v28  ;;  %4001 = vtanh.f32 %v448_v23  ;;  %v464_v23 = vld [vmem:[%s4660_s23 + $0x990] sm:$0xff] }
 0x150   : > { %v3978_v36 = vpop.eup %3977  ;;  %2479 = vst [vmem:[%s4689_s18 + $0x888] sm:$0xff] %v3106_v29  ;;  %v3108_v37 = vadd.f32 -0.5, %v1457_v30  ;;  %v1459_v38 = vmul.f32 0.5, %v3976_v32  ;;  %4003 = vtanh.f32 %v449_v27  ;;  %v465_v27 = vld [vmem:[%s4660_s23 + $0x998] sm:$0xff] }
 0x151   : > { %v3980_v40 = vpop.eup %3979  ;;  %2480 = vst [vmem:[%s4689_s18 + $0x890] sm:$0xff] %v3107_v33  ;;  %v3109_v41 = vadd.f32 -0.5, %v1458_v34  ;;  %v1460_v42 = vmul.f32 0.5, %v3978_v36  ;;  %4005 = vtanh.f32 %v450_v31  ;;  %v466_v31 = vld [vmem:[%s4660_s23 + $0x9a0] sm:$0xff] }
 0x152   : > { %v3982_v44 = vpop.eup %3981  ;;  %2481 = vst [vmem:[%s4689_s18 + $0x898] sm:$0xff] %v3108_v37  ;;  %v3110_v45 = vadd.f32 -0.5, %v1459_v38  ;;  %v1461_v46 = vmul.f32 0.5, %v3980_v40  ;;  %4007 = vtanh.f32 %v451_v35  ;;  %v467_v35 = vld [vmem:[%s4660_s23 + $0x9a8] sm:$0xff] }
 0x153   : > { %v3984_v48 = vpop.eup %3983  ;;  %2482 = vst [vmem:[%s4689_s18 + $0x8a0] sm:$0xff] %v3109_v41  ;;  %v3111_v49 = vadd.f32 -0.5, %v1460_v42  ;;  %v1462_v50 = vmul.f32 0.5, %v3982_v44  ;;  %4009 = vtanh.f32 %v452_v39  ;;  %v468_v39 = vld [vmem:[%s4660_s23 + $0x9b0] sm:$0xff] }
 0x154   : > { %v3986_v52 = vpop.eup %3985  ;;  %2483 = vst [vmem:[%s4689_s18 + $0x8a8] sm:$0xff] %v3110_v45  ;;  %v3112_v53 = vadd.f32 -0.5, %v1461_v46  ;;  %v1463_v54 = vmul.f32 0.5, %v3984_v48  ;;  %4011 = vtanh.f32 %v453_v43  ;;  %v469_v43 = vld [vmem:[%s4660_s23 + $0x9b8] sm:$0xff] }
 0x155   : > { %v3988_v56 = vpop.eup %3987  ;;  %2484 = vst [vmem:[%s4689_s18 + $0x8b0] sm:$0xff] %v3111_v49  ;;  %v3113_v57 = vadd.f32 -0.5, %v1462_v50  ;;  %v1464_v58 = vmul.f32 0.5, %v3986_v52  ;;  %4013 = vtanh.f32 %v454_v47  ;;  %v470_v47 = vld [vmem:[%s4660_s23 + $0x9c0] sm:$0xff] }
 0x156   : > { %v3990_v60 = vpop.eup %3989  ;;  %2485 = vst [vmem:[%s4689_s18 + $0x8b8] sm:$0xff] %v3112_v53  ;;  %v3114_v61 = vadd.f32 -0.5, %v1463_v54  ;;  %v1465_v62 = vmul.f32 0.5, %v3988_v56  ;;  %4015 = vtanh.f32 %v455_v51  ;;  %v471_v51 = vld [vmem:[%s4660_s23 + $0x9c8] sm:$0xff] }
 0x157   : > { %v3992_v0 = vpop.eup %3991  ;;  %2486 = vst [vmem:[%s4689_s18 + $0x8c0] sm:$0xff] %v3113_v57  ;;  %v3115_v1 = vadd.f32 -0.5, %v1464_v58  ;;  %v1466_v2 = vmul.f32 0.5, %v3990_v60  ;;  %4017 = vtanh.f32 %v456_v55  ;;  %v472_v55 = vld [vmem:[%s4660_s23 + $0x9d0] sm:$0xff] }
 0x158   : > { %v3994_v4 = vpop.eup %3993  ;;  %2487 = vst [vmem:[%s4689_s18 + $0x8c8] sm:$0xff] %v3114_v61  ;;  %v3116_v5 = vadd.f32 -0.5, %v1465_v62  ;;  %v1467_v6 = vmul.f32 0.5, %v3992_v0  ;;  %4019 = vtanh.f32 %v457_v59  ;;  %v473_v59 = vld [vmem:[%s4660_s23 + $0x9d8] sm:$0xff] }
 0x159   : > { %v3996_v8 = vpop.eup %3995  ;;  %2488 = vst [vmem:[%s4689_s18 + $0x8d0] sm:$0xff] %v3115_v1  ;;  %v3117_v9 = vadd.f32 -0.5, %v1466_v2  ;;  %v1468_v10 = vmul.f32 0.5, %v3994_v4  ;;  %4021 = vtanh.f32 %v458_v63  ;;  %v474_v63 = vld [vmem:[%s4660_s23 + $0x9e0] sm:$0xff] }
 0x15a   : > { %v3998_v12 = vpop.eup %3997  ;;  %2489 = vst [vmem:[%s4689_s18 + $0x8d8] sm:$0xff] %v3116_v5  ;;  %v3118_v13 = vadd.f32 -0.5, %v1467_v6  ;;  %v1469_v14 = vmul.f32 0.5, %v3996_v8  ;;  %4023 = vtanh.f32 %v459_v3  ;;  %v475_v3 = vld [vmem:[%s4660_s23 + $0x9e8] sm:$0xff] }
 0x15b   : > { %v4000_v16 = vpop.eup %3999  ;;  %2490 = vst [vmem:[%s4689_s18 + $0x8e0] sm:$0xff] %v3117_v9  ;;  %v3119_v17 = vadd.f32 -0.5, %v1468_v10  ;;  %v1470_v18 = vmul.f32 0.5, %v3998_v12  ;;  %4025 = vtanh.f32 %v460_v7  ;;  %v476_v7 = vld [vmem:[%s4660_s23 + $0x9f0] sm:$0xff] }
 0x15c   : > { %v4002_v20 = vpop.eup %4001  ;;  %2491 = vst [vmem:[%s4689_s18 + $0x8e8] sm:$0xff] %v3118_v13  ;;  %v3120_v21 = vadd.f32 -0.5, %v1469_v14  ;;  %v1471_v22 = vmul.f32 0.5, %v4000_v16  ;;  %4027 = vtanh.f32 %v461_v11  ;;  %v477_v11 = vld [vmem:[%s4660_s23 + $0x9f8] sm:$0xff] }
 0x15d   : > { %v4004_v24 = vpop.eup %4003  ;;  %2492 = vst [vmem:[%s4689_s18 + $0x8f0] sm:$0xff] %v3119_v17  ;;  %v3121_v25 = vadd.f32 -0.5, %v1470_v18  ;;  %v1472_v26 = vmul.f32 0.5, %v4002_v20  ;;  %4029 = vtanh.f32 %v462_v15  ;;  %v478_v15 = vld [vmem:[%s4660_s23 + $0xa00] sm:$0xff] }
 0x15e   : > { %v4006_v28 = vpop.eup %4005  ;;  %2493 = vst [vmem:[%s4689_s18 + $0x8f8] sm:$0xff] %v3120_v21  ;;  %v3122_v29 = vadd.f32 -0.5, %v1471_v22  ;;  %v1473_v30 = vmul.f32 0.5, %v4004_v24  ;;  %4031 = vtanh.f32 %v463_v19  ;;  %v479_v19 = vld [vmem:[%s4660_s23 + $0xa08] sm:$0xff] }
 0x15f   : > { %v4008_v32 = vpop.eup %4007  ;;  %2494 = vst [vmem:[%s4689_s18 + $0x900] sm:$0xff] %v3121_v25  ;;  %v3123_v33 = vadd.f32 -0.5, %v1472_v26  ;;  %v1474_v34 = vmul.f32 0.5, %v4006_v28  ;;  %4033 = vtanh.f32 %v464_v23  ;;  %v480_v23 = vld [vmem:[%s4660_s23 + $0xa10] sm:$0xff] }
 0x160   : > { %v4010_v36 = vpop.eup %4009  ;;  %2495 = vst [vmem:[%s4689_s18 + $0x908] sm:$0xff] %v3122_v29  ;;  %v3124_v37 = vadd.f32 -0.5, %v1473_v30  ;;  %v1475_v38 = vmul.f32 0.5, %v4008_v32  ;;  %4035 = vtanh.f32 %v465_v27  ;;  %v481_v27 = vld [vmem:[%s4660_s23 + $0xa18] sm:$0xff] }
 0x161   : > { %v4012_v40 = vpop.eup %4011  ;;  %2496 = vst [vmem:[%s4689_s18 + $0x910] sm:$0xff] %v3123_v33  ;;  %v3125_v41 = vadd.f32 -0.5, %v1474_v34  ;;  %v1476_v42 = vmul.f32 0.5, %v4010_v36  ;;  %4037 = vtanh.f32 %v466_v31  ;;  %v482_v31 = vld [vmem:[%s4660_s23 + $0xa20] sm:$0xff] }
 0x162   : > { %v4014_v44 = vpop.eup %4013  ;;  %2497 = vst [vmem:[%s4689_s18 + $0x918] sm:$0xff] %v3124_v37  ;;  %v3126_v45 = vadd.f32 -0.5, %v1475_v38  ;;  %v1477_v46 = vmul.f32 0.5, %v4012_v40  ;;  %4039 = vtanh.f32 %v467_v35  ;;  %v483_v35 = vld [vmem:[%s4660_s23 + $0xa28] sm:$0xff] }
 0x163   : > { %v4016_v48 = vpop.eup %4015  ;;  %2498 = vst [vmem:[%s4689_s18 + $0x920] sm:$0xff] %v3125_v41  ;;  %v3127_v49 = vadd.f32 -0.5, %v1476_v42  ;;  %v1478_v50 = vmul.f32 0.5, %v4014_v44  ;;  %4041 = vtanh.f32 %v468_v39  ;;  %v484_v39 = vld [vmem:[%s4660_s23 + $0xa30] sm:$0xff] }
 0x164   : > { %v4018_v52 = vpop.eup %4017  ;;  %2499 = vst [vmem:[%s4689_s18 + $0x928] sm:$0xff] %v3126_v45  ;;  %v3128_v53 = vadd.f32 -0.5, %v1477_v46  ;;  %v1479_v54 = vmul.f32 0.5, %v4016_v48  ;;  %4043 = vtanh.f32 %v469_v43  ;;  %v485_v43 = vld [vmem:[%s4660_s23 + $0xa38] sm:$0xff] }
 0x165   : > { %v4020_v56 = vpop.eup %4019  ;;  %2500 = vst [vmem:[%s4689_s18 + $0x930] sm:$0xff] %v3127_v49  ;;  %v3129_v57 = vadd.f32 -0.5, %v1478_v50  ;;  %v1480_v58 = vmul.f32 0.5, %v4018_v52  ;;  %4045 = vtanh.f32 %v470_v47  ;;  %v486_v47 = vld [vmem:[%s4660_s23 + $0xa40] sm:$0xff] }
 0x166   : > { %v4022_v60 = vpop.eup %4021  ;;  %2501 = vst [vmem:[%s4689_s18 + $0x938] sm:$0xff] %v3128_v53  ;;  %v3130_v61 = vadd.f32 -0.5, %v1479_v54  ;;  %v1481_v62 = vmul.f32 0.5, %v4020_v56  ;;  %4047 = vtanh.f32 %v471_v51  ;;  %v487_v51 = vld [vmem:[%s4660_s23 + $0xa48] sm:$0xff] }
 0x167   : > { %v4024_v0 = vpop.eup %4023  ;;  %2502 = vst [vmem:[%s4689_s18 + $0x940] sm:$0xff] %v3129_v57  ;;  %v3131_v1 = vadd.f32 -0.5, %v1480_v58  ;;  %v1482_v2 = vmul.f32 0.5, %v4022_v60  ;;  %4049 = vtanh.f32 %v472_v55  ;;  %v488_v55 = vld [vmem:[%s4660_s23 + $0xa50] sm:$0xff] }
 0x168   : > { %v4026_v4 = vpop.eup %4025  ;;  %2503 = vst [vmem:[%s4689_s18 + $0x948] sm:$0xff] %v3130_v61  ;;  %v3132_v5 = vadd.f32 -0.5, %v1481_v62  ;;  %v1483_v6 = vmul.f32 0.5, %v4024_v0  ;;  %4051 = vtanh.f32 %v473_v59  ;;  %v489_v59 = vld [vmem:[%s4660_s23 + $0xa58] sm:$0xff] }
 0x169   : > { %v4028_v8 = vpop.eup %4027  ;;  %2504 = vst [vmem:[%s4689_s18 + $0x950] sm:$0xff] %v3131_v1  ;;  %v3133_v9 = vadd.f32 -0.5, %v1482_v2  ;;  %v1484_v10 = vmul.f32 0.5, %v4026_v4  ;;  %4053 = vtanh.f32 %v474_v63  ;;  %v490_v63 = vld [vmem:[%s4660_s23 + $0xa60] sm:$0xff] }
 0x16a   : > { %v4030_v12 = vpop.eup %4029  ;;  %2505 = vst [vmem:[%s4689_s18 + $0x958] sm:$0xff] %v3132_v5  ;;  %v3134_v13 = vadd.f32 -0.5, %v1483_v6  ;;  %v1485_v14 = vmul.f32 0.5, %v4028_v8  ;;  %4055 = vtanh.f32 %v475_v3  ;;  %v491_v3 = vld [vmem:[%s4660_s23 + $0xa68] sm:$0xff] }
 0x16b   : > { %v4032_v16 = vpop.eup %4031  ;;  %2506 = vst [vmem:[%s4689_s18 + $0x960] sm:$0xff] %v3133_v9  ;;  %v3135_v17 = vadd.f32 -0.5, %v1484_v10  ;;  %v1486_v18 = vmul.f32 0.5, %v4030_v12  ;;  %4057 = vtanh.f32 %v476_v7  ;;  %v492_v7 = vld [vmem:[%s4660_s23 + $0xa70] sm:$0xff] }
 0x16c   : > { %v4034_v20 = vpop.eup %4033  ;;  %2507 = vst [vmem:[%s4689_s18 + $0x968] sm:$0xff] %v3134_v13  ;;  %v3136_v21 = vadd.f32 -0.5, %v1485_v14  ;;  %v1487_v22 = vmul.f32 0.5, %v4032_v16  ;;  %4059 = vtanh.f32 %v477_v11  ;;  %v493_v11 = vld [vmem:[%s4660_s23 + $0xa78] sm:$0xff] }
 0x16d   : > { %v4036_v24 = vpop.eup %4035  ;;  %2508 = vst [vmem:[%s4689_s18 + $0x970] sm:$0xff] %v3135_v17  ;;  %v3137_v25 = vadd.f32 -0.5, %v1486_v18  ;;  %v1488_v26 = vmul.f32 0.5, %v4034_v20  ;;  %4061 = vtanh.f32 %v478_v15  ;;  %v494_v15 = vld [vmem:[%s4660_s23 + $0xa80] sm:$0xff] }
 0x16e   : > { %v4038_v28 = vpop.eup %4037  ;;  %2509 = vst [vmem:[%s4689_s18 + $0x978] sm:$0xff] %v3136_v21  ;;  %v3138_v29 = vadd.f32 -0.5, %v1487_v22  ;;  %v1489_v30 = vmul.f32 0.5, %v4036_v24  ;;  %4063 = vtanh.f32 %v479_v19  ;;  %v495_v19 = vld [vmem:[%s4660_s23 + $0xa88] sm:$0xff] }
 0x16f   : > { %v4040_v32 = vpop.eup %4039  ;;  %2510 = vst [vmem:[%s4689_s18 + $0x980] sm:$0xff] %v3137_v25  ;;  %v3139_v33 = vadd.f32 -0.5, %v1488_v26  ;;  %v1490_v34 = vmul.f32 0.5, %v4038_v28  ;;  %4065 = vtanh.f32 %v480_v23  ;;  %v496_v23 = vld [vmem:[%s4660_s23 + $0xa90] sm:$0xff] }
 0x170   : > { %v4042_v36 = vpop.eup %4041  ;;  %2511 = vst [vmem:[%s4689_s18 + $0x988] sm:$0xff] %v3138_v29  ;;  %v3140_v37 = vadd.f32 -0.5, %v1489_v30  ;;  %v1491_v38 = vmul.f32 0.5, %v4040_v32  ;;  %4067 = vtanh.f32 %v481_v27  ;;  %v497_v27 = vld [vmem:[%s4660_s23 + $0xa98] sm:$0xff] }
 0x171   : > { %v4044_v40 = vpop.eup %4043  ;;  %2512 = vst [vmem:[%s4689_s18 + $0x990] sm:$0xff] %v3139_v33  ;;  %v3141_v41 = vadd.f32 -0.5, %v1490_v34  ;;  %v1492_v42 = vmul.f32 0.5, %v4042_v36  ;;  %4069 = vtanh.f32 %v482_v31  ;;  %v498_v31 = vld [vmem:[%s4660_s23 + $0xaa0] sm:$0xff] }
 0x172   : > { %v4046_v44 = vpop.eup %4045  ;;  %2513 = vst [vmem:[%s4689_s18 + $0x998] sm:$0xff] %v3140_v37  ;;  %v3142_v45 = vadd.f32 -0.5, %v1491_v38  ;;  %v1493_v46 = vmul.f32 0.5, %v4044_v40  ;;  %4071 = vtanh.f32 %v483_v35  ;;  %v499_v35 = vld [vmem:[%s4660_s23 + $0xaa8] sm:$0xff] }
 0x173   : > { %v4048_v48 = vpop.eup %4047  ;;  %2514 = vst [vmem:[%s4689_s18 + $0x9a0] sm:$0xff] %v3141_v41  ;;  %v3143_v49 = vadd.f32 -0.5, %v1492_v42  ;;  %v1494_v50 = vmul.f32 0.5, %v4046_v44  ;;  %4073 = vtanh.f32 %v484_v39  ;;  %v500_v39 = vld [vmem:[%s4660_s23 + $0xab0] sm:$0xff] }
 0x174   : > { %v4050_v52 = vpop.eup %4049  ;;  %2515 = vst [vmem:[%s4689_s18 + $0x9a8] sm:$0xff] %v3142_v45  ;;  %v3144_v53 = vadd.f32 -0.5, %v1493_v46  ;;  %v1495_v54 = vmul.f32 0.5, %v4048_v48  ;;  %4075 = vtanh.f32 %v485_v43  ;;  %v501_v43 = vld [vmem:[%s4660_s23 + $0xab8] sm:$0xff] }
 0x175   : > { %v4052_v56 = vpop.eup %4051  ;;  %2516 = vst [vmem:[%s4689_s18 + $0x9b0] sm:$0xff] %v3143_v49  ;;  %v3145_v57 = vadd.f32 -0.5, %v1494_v50  ;;  %v1496_v58 = vmul.f32 0.5, %v4050_v52  ;;  %4077 = vtanh.f32 %v486_v47  ;;  %v502_v47 = vld [vmem:[%s4660_s23 + $0xac0] sm:$0xff] }
 0x176   : > { %v4054_v60 = vpop.eup %4053  ;;  %2517 = vst [vmem:[%s4689_s18 + $0x9b8] sm:$0xff] %v3144_v53  ;;  %v3146_v61 = vadd.f32 -0.5, %v1495_v54  ;;  %v1497_v62 = vmul.f32 0.5, %v4052_v56  ;;  %4079 = vtanh.f32 %v487_v51  ;;  %v503_v51 = vld [vmem:[%s4660_s23 + $0xac8] sm:$0xff] }
 0x177   : > { %v4056_v0 = vpop.eup %4055  ;;  %2518 = vst [vmem:[%s4689_s18 + $0x9c0] sm:$0xff] %v3145_v57  ;;  %v3147_v1 = vadd.f32 -0.5, %v1496_v58  ;;  %v1498_v2 = vmul.f32 0.5, %v4054_v60  ;;  %4081 = vtanh.f32 %v488_v55  ;;  %v504_v55 = vld [vmem:[%s4660_s23 + $0xad0] sm:$0xff] }
 0x178   : > { %v4058_v4 = vpop.eup %4057  ;;  %2519 = vst [vmem:[%s4689_s18 + $0x9c8] sm:$0xff] %v3146_v61  ;;  %v3148_v5 = vadd.f32 -0.5, %v1497_v62  ;;  %v1499_v6 = vmul.f32 0.5, %v4056_v0  ;;  %4083 = vtanh.f32 %v489_v59  ;;  %v505_v59 = vld [vmem:[%s4660_s23 + $0xad8] sm:$0xff] }
 0x179   : > { %v4060_v8 = vpop.eup %4059  ;;  %2520 = vst [vmem:[%s4689_s18 + $0x9d0] sm:$0xff] %v3147_v1  ;;  %v3149_v9 = vadd.f32 -0.5, %v1498_v2  ;;  %v1500_v10 = vmul.f32 0.5, %v4058_v4  ;;  %4085 = vtanh.f32 %v490_v63  ;;  %v506_v63 = vld [vmem:[%s4660_s23 + $0xae0] sm:$0xff] }
 0x17a   : > { %v4062_v12 = vpop.eup %4061  ;;  %2521 = vst [vmem:[%s4689_s18 + $0x9d8] sm:$0xff] %v3148_v5  ;;  %v3150_v13 = vadd.f32 -0.5, %v1499_v6  ;;  %v1501_v14 = vmul.f32 0.5, %v4060_v8  ;;  %4087 = vtanh.f32 %v491_v3  ;;  %v507_v3 = vld [vmem:[%s4660_s23 + $0xae8] sm:$0xff] }
 0x17b   : > { %v4064_v16 = vpop.eup %4063  ;;  %2522 = vst [vmem:[%s4689_s18 + $0x9e0] sm:$0xff] %v3149_v9  ;;  %v3151_v17 = vadd.f32 -0.5, %v1500_v10  ;;  %v1502_v18 = vmul.f32 0.5, %v4062_v12  ;;  %4089 = vtanh.f32 %v492_v7  ;;  %v508_v7 = vld [vmem:[%s4660_s23 + $0xaf0] sm:$0xff] }
 0x17c   : > { %v4066_v20 = vpop.eup %4065  ;;  %2523 = vst [vmem:[%s4689_s18 + $0x9e8] sm:$0xff] %v3150_v13  ;;  %v3152_v21 = vadd.f32 -0.5, %v1501_v14  ;;  %v1503_v22 = vmul.f32 0.5, %v4064_v16  ;;  %4091 = vtanh.f32 %v493_v11  ;;  %v509_v11 = vld [vmem:[%s4660_s23 + $0xaf8] sm:$0xff] }
 0x17d   : > { %v4068_v24 = vpop.eup %4067  ;;  %2524 = vst [vmem:[%s4689_s18 + $0x9f0] sm:$0xff] %v3151_v17  ;;  %v3153_v25 = vadd.f32 -0.5, %v1502_v18  ;;  %v1504_v26 = vmul.f32 0.5, %v4066_v20  ;;  %4093 = vtanh.f32 %v494_v15  ;;  %v510_v15 = vld [vmem:[%s4660_s23 + $0xb00] sm:$0xff] }
 0x17e   : > { %v4070_v28 = vpop.eup %4069  ;;  %2525 = vst [vmem:[%s4689_s18 + $0x9f8] sm:$0xff] %v3152_v21  ;;  %v3154_v29 = vadd.f32 -0.5, %v1503_v22  ;;  %v1505_v30 = vmul.f32 0.5, %v4068_v24  ;;  %4095 = vtanh.f32 %v495_v19  ;;  %v511_v19 = vld [vmem:[%s4660_s23 + $0xb08] sm:$0xff] }
 0x17f   : > { %v4072_v32 = vpop.eup %4071  ;;  %2526 = vst [vmem:[%s4689_s18 + $0xa00] sm:$0xff] %v3153_v25  ;;  %v3155_v33 = vadd.f32 -0.5, %v1504_v26  ;;  %v1506_v34 = vmul.f32 0.5, %v4070_v28  ;;  %4097 = vtanh.f32 %v496_v23  ;;  %v512_v23 = vld [vmem:[%s4660_s23 + $0xb10] sm:$0xff] }
 0x180   : > { %v4074_v36 = vpop.eup %4073  ;;  %2527 = vst [vmem:[%s4689_s18 + $0xa08] sm:$0xff] %v3154_v29  ;;  %v3156_v37 = vadd.f32 -0.5, %v1505_v30  ;;  %v1507_v38 = vmul.f32 0.5, %v4072_v32  ;;  %4099 = vtanh.f32 %v497_v27  ;;  %v513_v27 = vld [vmem:[%s4660_s23 + $0xb18] sm:$0xff] }
 0x181   : > { %v4076_v40 = vpop.eup %4075  ;;  %2528 = vst [vmem:[%s4689_s18 + $0xa10] sm:$0xff] %v3155_v33  ;;  %v3157_v41 = vadd.f32 -0.5, %v1506_v34  ;;  %v1508_v42 = vmul.f32 0.5, %v4074_v36  ;;  %4101 = vtanh.f32 %v498_v31  ;;  %v514_v31 = vld [vmem:[%s4660_s23 + $0xb20] sm:$0xff] }
 0x182   : > { %v4078_v44 = vpop.eup %4077  ;;  %2529 = vst [vmem:[%s4689_s18 + $0xa18] sm:$0xff] %v3156_v37  ;;  %v3158_v45 = vadd.f32 -0.5, %v1507_v38  ;;  %v1509_v46 = vmul.f32 0.5, %v4076_v40  ;;  %4103 = vtanh.f32 %v499_v35  ;;  %v515_v35 = vld [vmem:[%s4660_s23 + $0xb28] sm:$0xff] }
 0x183   : > { %v4080_v48 = vpop.eup %4079  ;;  %2530 = vst [vmem:[%s4689_s18 + $0xa20] sm:$0xff] %v3157_v41  ;;  %v3159_v49 = vadd.f32 -0.5, %v1508_v42  ;;  %v1510_v50 = vmul.f32 0.5, %v4078_v44  ;;  %4105 = vtanh.f32 %v500_v39  ;;  %v516_v39 = vld [vmem:[%s4660_s23 + $0xb30] sm:$0xff] }
 0x184   : > { %v4082_v52 = vpop.eup %4081  ;;  %2531 = vst [vmem:[%s4689_s18 + $0xa28] sm:$0xff] %v3158_v45  ;;  %v3160_v53 = vadd.f32 -0.5, %v1509_v46  ;;  %v1511_v54 = vmul.f32 0.5, %v4080_v48  ;;  %4107 = vtanh.f32 %v501_v43  ;;  %v517_v43 = vld [vmem:[%s4660_s23 + $0xb38] sm:$0xff] }
 0x185   : > { %v4084_v56 = vpop.eup %4083  ;;  %2532 = vst [vmem:[%s4689_s18 + $0xa30] sm:$0xff] %v3159_v49  ;;  %v3161_v57 = vadd.f32 -0.5, %v1510_v50  ;;  %v1512_v58 = vmul.f32 0.5, %v4082_v52  ;;  %4109 = vtanh.f32 %v502_v47  ;;  %v518_v47 = vld [vmem:[%s4660_s23 + $0xb40] sm:$0xff] }
 0x186   : > { %v4086_v60 = vpop.eup %4085  ;;  %2533 = vst [vmem:[%s4689_s18 + $0xa38] sm:$0xff] %v3160_v53  ;;  %v3162_v61 = vadd.f32 -0.5, %v1511_v54  ;;  %v1513_v62 = vmul.f32 0.5, %v4084_v56  ;;  %4111 = vtanh.f32 %v503_v51  ;;  %v519_v51 = vld [vmem:[%s4660_s23 + $0xb48] sm:$0xff] }
 0x187   : > { %v4088_v0 = vpop.eup %4087  ;;  %2534 = vst [vmem:[%s4689_s18 + $0xa40] sm:$0xff] %v3161_v57  ;;  %v3163_v1 = vadd.f32 -0.5, %v1512_v58  ;;  %v1514_v2 = vmul.f32 0.5, %v4086_v60  ;;  %4113 = vtanh.f32 %v504_v55  ;;  %v520_v55 = vld [vmem:[%s4660_s23 + $0xb50] sm:$0xff] }
 0x188   : > { %v4090_v4 = vpop.eup %4089  ;;  %2535 = vst [vmem:[%s4689_s18 + $0xa48] sm:$0xff] %v3162_v61  ;;  %v3164_v5 = vadd.f32 -0.5, %v1513_v62  ;;  %v1515_v6 = vmul.f32 0.5, %v4088_v0  ;;  %4115 = vtanh.f32 %v505_v59  ;;  %v521_v59 = vld [vmem:[%s4660_s23 + $0xb58] sm:$0xff] }
 0x189   : > { %v4092_v8 = vpop.eup %4091  ;;  %2536 = vst [vmem:[%s4689_s18 + $0xa50] sm:$0xff] %v3163_v1  ;;  %v3165_v9 = vadd.f32 -0.5, %v1514_v2  ;;  %v1516_v10 = vmul.f32 0.5, %v4090_v4  ;;  %4117 = vtanh.f32 %v506_v63  ;;  %v522_v63 = vld [vmem:[%s4660_s23 + $0xb60] sm:$0xff] }
 0x18a   : > { %v4094_v12 = vpop.eup %4093  ;;  %2537 = vst [vmem:[%s4689_s18 + $0xa58] sm:$0xff] %v3164_v5  ;;  %v3166_v13 = vadd.f32 -0.5, %v1515_v6  ;;  %v1517_v14 = vmul.f32 0.5, %v4092_v8  ;;  %4119 = vtanh.f32 %v507_v3  ;;  %v523_v3 = vld [vmem:[%s4660_s23 + $0xb68] sm:$0xff] }
 0x18b   : > { %v4096_v16 = vpop.eup %4095  ;;  %2538 = vst [vmem:[%s4689_s18 + $0xa60] sm:$0xff] %v3165_v9  ;;  %v3167_v17 = vadd.f32 -0.5, %v1516_v10  ;;  %v1518_v18 = vmul.f32 0.5, %v4094_v12  ;;  %4121 = vtanh.f32 %v508_v7  ;;  %v524_v7 = vld [vmem:[%s4660_s23 + $0xb70] sm:$0xff] }
 0x18c   : > { %v4098_v20 = vpop.eup %4097  ;;  %2539 = vst [vmem:[%s4689_s18 + $0xa68] sm:$0xff] %v3166_v13  ;;  %v3168_v21 = vadd.f32 -0.5, %v1517_v14  ;;  %v1519_v22 = vmul.f32 0.5, %v4096_v16  ;;  %4123 = vtanh.f32 %v509_v11  ;;  %v525_v11 = vld [vmem:[%s4660_s23 + $0xb78] sm:$0xff] }
 0x18d   : > { %v4100_v24 = vpop.eup %4099  ;;  %2540 = vst [vmem:[%s4689_s18 + $0xa70] sm:$0xff] %v3167_v17  ;;  %v3169_v25 = vadd.f32 -0.5, %v1518_v18  ;;  %v1520_v26 = vmul.f32 0.5, %v4098_v20  ;;  %4125 = vtanh.f32 %v510_v15  ;;  %v526_v15 = vld [vmem:[%s4660_s23 + $0xb80] sm:$0xff] }
 0x18e   : > { %v4102_v28 = vpop.eup %4101  ;;  %2541 = vst [vmem:[%s4689_s18 + $0xa78] sm:$0xff] %v3168_v21  ;;  %v3170_v29 = vadd.f32 -0.5, %v1519_v22  ;;  %v1521_v30 = vmul.f32 0.5, %v4100_v24  ;;  %4127 = vtanh.f32 %v511_v19  ;;  %v527_v19 = vld [vmem:[%s4660_s23 + $0xb88] sm:$0xff] }
 0x18f   : > { %v4104_v32 = vpop.eup %4103  ;;  %2542 = vst [vmem:[%s4689_s18 + $0xa80] sm:$0xff] %v3169_v25  ;;  %v3171_v33 = vadd.f32 -0.5, %v1520_v26  ;;  %v1522_v34 = vmul.f32 0.5, %v4102_v28  ;;  %4129 = vtanh.f32 %v512_v23  ;;  %v528_v23 = vld [vmem:[%s4660_s23 + $0xb90] sm:$0xff] }
 0x190   : > { %v4106_v36 = vpop.eup %4105  ;;  %2543 = vst [vmem:[%s4689_s18 + $0xa88] sm:$0xff] %v3170_v29  ;;  %v3172_v37 = vadd.f32 -0.5, %v1521_v30  ;;  %v1523_v38 = vmul.f32 0.5, %v4104_v32  ;;  %4131 = vtanh.f32 %v513_v27  ;;  %v529_v27 = vld [vmem:[%s4660_s23 + $0xb98] sm:$0xff] }
 0x191   : > { %v4108_v40 = vpop.eup %4107  ;;  %2544 = vst [vmem:[%s4689_s18 + $0xa90] sm:$0xff] %v3171_v33  ;;  %v3173_v41 = vadd.f32 -0.5, %v1522_v34  ;;  %v1524_v42 = vmul.f32 0.5, %v4106_v36  ;;  %4133 = vtanh.f32 %v514_v31  ;;  %v530_v31 = vld [vmem:[%s4660_s23 + $0xba0] sm:$0xff] }
 0x192   : > { %v4110_v44 = vpop.eup %4109  ;;  %2545 = vst [vmem:[%s4689_s18 + $0xa98] sm:$0xff] %v3172_v37  ;;  %v3174_v45 = vadd.f32 -0.5, %v1523_v38  ;;  %v1525_v46 = vmul.f32 0.5, %v4108_v40  ;;  %4135 = vtanh.f32 %v515_v35  ;;  %v531_v35 = vld [vmem:[%s4660_s23 + $0xba8] sm:$0xff] }
 0x193   : > { %v4112_v48 = vpop.eup %4111  ;;  %2546 = vst [vmem:[%s4689_s18 + $0xaa0] sm:$0xff] %v3173_v41  ;;  %v3175_v49 = vadd.f32 -0.5, %v1524_v42  ;;  %v1526_v50 = vmul.f32 0.5, %v4110_v44  ;;  %4137 = vtanh.f32 %v516_v39  ;;  %v532_v39 = vld [vmem:[%s4660_s23 + $0xbb0] sm:$0xff] }
 0x194   : > { %v4114_v52 = vpop.eup %4113  ;;  %2547 = vst [vmem:[%s4689_s18 + $0xaa8] sm:$0xff] %v3174_v45  ;;  %v3176_v53 = vadd.f32 -0.5, %v1525_v46  ;;  %v1527_v54 = vmul.f32 0.5, %v4112_v48  ;;  %4139 = vtanh.f32 %v517_v43  ;;  %v533_v43 = vld [vmem:[%s4660_s23 + $0xbb8] sm:$0xff] }
 0x195   : > { %v4116_v56 = vpop.eup %4115  ;;  %2548 = vst [vmem:[%s4689_s18 + $0xab0] sm:$0xff] %v3175_v49  ;;  %v3177_v57 = vadd.f32 -0.5, %v1526_v50  ;;  %v1528_v58 = vmul.f32 0.5, %v4114_v52  ;;  %4141 = vtanh.f32 %v518_v47  ;;  %v534_v47 = vld [vmem:[%s4660_s23 + $0xbc0] sm:$0xff] }
 0x196   : > { %v4118_v60 = vpop.eup %4117  ;;  %2549 = vst [vmem:[%s4689_s18 + $0xab8] sm:$0xff] %v3176_v53  ;;  %v3178_v61 = vadd.f32 -0.5, %v1527_v54  ;;  %v1529_v62 = vmul.f32 0.5, %v4116_v56  ;;  %4143 = vtanh.f32 %v519_v51  ;;  %v535_v51 = vld [vmem:[%s4660_s23 + $0xbc8] sm:$0xff] }
 0x197   : > { %v4120_v0 = vpop.eup %4119  ;;  %2550 = vst [vmem:[%s4689_s18 + $0xac0] sm:$0xff] %v3177_v57  ;;  %v3179_v1 = vadd.f32 -0.5, %v1528_v58  ;;  %v1530_v2 = vmul.f32 0.5, %v4118_v60  ;;  %4145 = vtanh.f32 %v520_v55  ;;  %v536_v55 = vld [vmem:[%s4660_s23 + $0xbd0] sm:$0xff] }
 0x198   : > { %v4122_v4 = vpop.eup %4121  ;;  %2551 = vst [vmem:[%s4689_s18 + $0xac8] sm:$0xff] %v3178_v61  ;;  %v3180_v5 = vadd.f32 -0.5, %v1529_v62  ;;  %v1531_v6 = vmul.f32 0.5, %v4120_v0  ;;  %4147 = vtanh.f32 %v521_v59  ;;  %v537_v59 = vld [vmem:[%s4660_s23 + $0xbd8] sm:$0xff] }
 0x199   : > { %v4124_v8 = vpop.eup %4123  ;;  %2552 = vst [vmem:[%s4689_s18 + $0xad0] sm:$0xff] %v3179_v1  ;;  %v3181_v9 = vadd.f32 -0.5, %v1530_v2  ;;  %v1532_v10 = vmul.f32 0.5, %v4122_v4  ;;  %4149 = vtanh.f32 %v522_v63  ;;  %v538_v63 = vld [vmem:[%s4660_s23 + $0xbe0] sm:$0xff] }
 0x19a   : > { %v4126_v12 = vpop.eup %4125  ;;  %2553 = vst [vmem:[%s4689_s18 + $0xad8] sm:$0xff] %v3180_v5  ;;  %v3182_v13 = vadd.f32 -0.5, %v1531_v6  ;;  %v1533_v14 = vmul.f32 0.5, %v4124_v8  ;;  %4151 = vtanh.f32 %v523_v3  ;;  %v539_v3 = vld [vmem:[%s4660_s23 + $0xbe8] sm:$0xff] }
 0x19b   : > { %v4128_v16 = vpop.eup %4127  ;;  %2554 = vst [vmem:[%s4689_s18 + $0xae0] sm:$0xff] %v3181_v9  ;;  %v3183_v17 = vadd.f32 -0.5, %v1532_v10  ;;  %v1534_v18 = vmul.f32 0.5, %v4126_v12  ;;  %4153 = vtanh.f32 %v524_v7  ;;  %v540_v7 = vld [vmem:[%s4660_s23 + $0xbf0] sm:$0xff] }
 0x19c   : > { %v4130_v20 = vpop.eup %4129  ;;  %2555 = vst [vmem:[%s4689_s18 + $0xae8] sm:$0xff] %v3182_v13  ;;  %v3184_v21 = vadd.f32 -0.5, %v1533_v14  ;;  %v1535_v22 = vmul.f32 0.5, %v4128_v16  ;;  %4155 = vtanh.f32 %v525_v11  ;;  %v541_v11 = vld [vmem:[%s4660_s23 + $0xbf8] sm:$0xff] }
 0x19d   : > { %v4132_v24 = vpop.eup %4131  ;;  %2556 = vst [vmem:[%s4689_s18 + $0xaf0] sm:$0xff] %v3183_v17  ;;  %v3185_v25 = vadd.f32 -0.5, %v1534_v18  ;;  %v1536_v26 = vmul.f32 0.5, %v4130_v20  ;;  %4157 = vtanh.f32 %v526_v15  ;;  %v542_v15 = vld [vmem:[%s4660_s23 + $0xc00] sm:$0xff] }
 0x19e   : > { %v4134_v28 = vpop.eup %4133  ;;  %2557 = vst [vmem:[%s4689_s18 + $0xaf8] sm:$0xff] %v3184_v21  ;;  %v3186_v29 = vadd.f32 -0.5, %v1535_v22  ;;  %v1537_v30 = vmul.f32 0.5, %v4132_v24  ;;  %4159 = vtanh.f32 %v527_v19  ;;  %v543_v19 = vld [vmem:[%s4660_s23 + $0xc08] sm:$0xff] }
 0x19f   : > { %v4136_v32 = vpop.eup %4135  ;;  %2558 = vst [vmem:[%s4689_s18 + $0xb00] sm:$0xff] %v3185_v25  ;;  %v3187_v33 = vadd.f32 -0.5, %v1536_v26  ;;  %v1538_v34 = vmul.f32 0.5, %v4134_v28  ;;  %4161 = vtanh.f32 %v528_v23  ;;  %v544_v23 = vld [vmem:[%s4660_s23 + $0xc10] sm:$0xff] }
 0x1a0   : > { %v4138_v36 = vpop.eup %4137  ;;  %2559 = vst [vmem:[%s4689_s18 + $0xb08] sm:$0xff] %v3186_v29  ;;  %v3188_v37 = vadd.f32 -0.5, %v1537_v30  ;;  %v1539_v38 = vmul.f32 0.5, %v4136_v32  ;;  %4163 = vtanh.f32 %v529_v27  ;;  %v545_v27 = vld [vmem:[%s4660_s23 + $0xc18] sm:$0xff] }
 0x1a1   : > { %v4140_v40 = vpop.eup %4139  ;;  %2560 = vst [vmem:[%s4689_s18 + $0xb10] sm:$0xff] %v3187_v33  ;;  %v3189_v41 = vadd.f32 -0.5, %v1538_v34  ;;  %v1540_v42 = vmul.f32 0.5, %v4138_v36  ;;  %4165 = vtanh.f32 %v530_v31  ;;  %v546_v31 = vld [vmem:[%s4660_s23 + $0xc20] sm:$0xff] }
 0x1a2   : > { %v4142_v44 = vpop.eup %4141  ;;  %2561 = vst [vmem:[%s4689_s18 + $0xb18] sm:$0xff] %v3188_v37  ;;  %v3190_v45 = vadd.f32 -0.5, %v1539_v38  ;;  %v1541_v46 = vmul.f32 0.5, %v4140_v40  ;;  %4167 = vtanh.f32 %v531_v35  ;;  %v547_v35 = vld [vmem:[%s4660_s23 + $0xc28] sm:$0xff] }
 0x1a3   : > { %v4144_v48 = vpop.eup %4143  ;;  %2562 = vst [vmem:[%s4689_s18 + $0xb20] sm:$0xff] %v3189_v41  ;;  %v3191_v49 = vadd.f32 -0.5, %v1540_v42  ;;  %v1542_v50 = vmul.f32 0.5, %v4142_v44  ;;  %4169 = vtanh.f32 %v532_v39  ;;  %v548_v39 = vld [vmem:[%s4660_s23 + $0xc30] sm:$0xff] }
 0x1a4   : > { %v4146_v52 = vpop.eup %4145  ;;  %2563 = vst [vmem:[%s4689_s18 + $0xb28] sm:$0xff] %v3190_v45  ;;  %v3192_v53 = vadd.f32 -0.5, %v1541_v46  ;;  %v1543_v54 = vmul.f32 0.5, %v4144_v48  ;;  %4171 = vtanh.f32 %v533_v43  ;;  %v549_v43 = vld [vmem:[%s4660_s23 + $0xc38] sm:$0xff] }
 0x1a5   : > { %v4148_v56 = vpop.eup %4147  ;;  %2564 = vst [vmem:[%s4689_s18 + $0xb30] sm:$0xff] %v3191_v49  ;;  %v3193_v57 = vadd.f32 -0.5, %v1542_v50  ;;  %v1544_v58 = vmul.f32 0.5, %v4146_v52  ;;  %4173 = vtanh.f32 %v534_v47  ;;  %v550_v47 = vld [vmem:[%s4660_s23 + $0xc40] sm:$0xff] }
 0x1a6   : > { %v4150_v60 = vpop.eup %4149  ;;  %2565 = vst [vmem:[%s4689_s18 + $0xb38] sm:$0xff] %v3192_v53  ;;  %v3194_v61 = vadd.f32 -0.5, %v1543_v54  ;;  %v1545_v62 = vmul.f32 0.5, %v4148_v56  ;;  %4175 = vtanh.f32 %v535_v51  ;;  %v551_v51 = vld [vmem:[%s4660_s23 + $0xc48] sm:$0xff] }
 0x1a7   : > { %v4152_v0 = vpop.eup %4151  ;;  %2566 = vst [vmem:[%s4689_s18 + $0xb40] sm:$0xff] %v3193_v57  ;;  %v3195_v1 = vadd.f32 -0.5, %v1544_v58  ;;  %v1546_v2 = vmul.f32 0.5, %v4150_v60  ;;  %4177 = vtanh.f32 %v536_v55  ;;  %v552_v55 = vld [vmem:[%s4660_s23 + $0xc50] sm:$0xff] }
 0x1a8   : > { %v4154_v4 = vpop.eup %4153  ;;  %2567 = vst [vmem:[%s4689_s18 + $0xb48] sm:$0xff] %v3194_v61  ;;  %v3196_v5 = vadd.f32 -0.5, %v1545_v62  ;;  %v1547_v6 = vmul.f32 0.5, %v4152_v0  ;;  %4179 = vtanh.f32 %v537_v59  ;;  %v553_v59 = vld [vmem:[%s4660_s23 + $0xc58] sm:$0xff] }
 0x1a9   : > { %v4156_v8 = vpop.eup %4155  ;;  %2568 = vst [vmem:[%s4689_s18 + $0xb50] sm:$0xff] %v3195_v1  ;;  %v3197_v9 = vadd.f32 -0.5, %v1546_v2  ;;  %v1548_v10 = vmul.f32 0.5, %v4154_v4  ;;  %4181 = vtanh.f32 %v538_v63  ;;  %v554_v63 = vld [vmem:[%s4660_s23 + $0xc60] sm:$0xff] }
 0x1aa   : > { %v4158_v12 = vpop.eup %4157  ;;  %2569 = vst [vmem:[%s4689_s18 + $0xb58] sm:$0xff] %v3196_v5  ;;  %v3198_v13 = vadd.f32 -0.5, %v1547_v6  ;;  %v1549_v14 = vmul.f32 0.5, %v4156_v8  ;;  %4183 = vtanh.f32 %v539_v3  ;;  %v555_v3 = vld [vmem:[%s4660_s23 + $0xc68] sm:$0xff] }
 0x1ab   : > { %v4160_v16 = vpop.eup %4159  ;;  %2570 = vst [vmem:[%s4689_s18 + $0xb60] sm:$0xff] %v3197_v9  ;;  %v3199_v17 = vadd.f32 -0.5, %v1548_v10  ;;  %v1550_v18 = vmul.f32 0.5, %v4158_v12  ;;  %4185 = vtanh.f32 %v540_v7  ;;  %v556_v7 = vld [vmem:[%s4660_s23 + $0xc70] sm:$0xff] }
 0x1ac   : > { %v4162_v20 = vpop.eup %4161  ;;  %2571 = vst [vmem:[%s4689_s18 + $0xb68] sm:$0xff] %v3198_v13  ;;  %v3200_v21 = vadd.f32 -0.5, %v1549_v14  ;;  %v1551_v22 = vmul.f32 0.5, %v4160_v16  ;;  %4187 = vtanh.f32 %v541_v11  ;;  %v557_v11 = vld [vmem:[%s4660_s23 + $0xc78] sm:$0xff] }
 0x1ad   : > { %v4164_v24 = vpop.eup %4163  ;;  %2572 = vst [vmem:[%s4689_s18 + $0xb70] sm:$0xff] %v3199_v17  ;;  %v3201_v25 = vadd.f32 -0.5, %v1550_v18  ;;  %v1552_v26 = vmul.f32 0.5, %v4162_v20  ;;  %4189 = vtanh.f32 %v542_v15  ;;  %v558_v15 = vld [vmem:[%s4660_s23 + $0xc80] sm:$0xff] }
 0x1ae   : > { %v4166_v28 = vpop.eup %4165  ;;  %2573 = vst [vmem:[%s4689_s18 + $0xb78] sm:$0xff] %v3200_v21  ;;  %v3202_v29 = vadd.f32 -0.5, %v1551_v22  ;;  %v1553_v30 = vmul.f32 0.5, %v4164_v24  ;;  %4191 = vtanh.f32 %v543_v19  ;;  %v559_v19 = vld [vmem:[%s4660_s23 + $0xc88] sm:$0xff] }
 0x1af   : > { %v4168_v32 = vpop.eup %4167  ;;  %2574 = vst [vmem:[%s4689_s18 + $0xb80] sm:$0xff] %v3201_v25  ;;  %v3203_v33 = vadd.f32 -0.5, %v1552_v26  ;;  %v1554_v34 = vmul.f32 0.5, %v4166_v28  ;;  %4193 = vtanh.f32 %v544_v23  ;;  %v560_v23 = vld [vmem:[%s4660_s23 + $0xc90] sm:$0xff] }
 0x1b0   : > { %v4170_v36 = vpop.eup %4169  ;;  %2575 = vst [vmem:[%s4689_s18 + $0xb88] sm:$0xff] %v3202_v29  ;;  %v3204_v37 = vadd.f32 -0.5, %v1553_v30  ;;  %v1555_v38 = vmul.f32 0.5, %v4168_v32  ;;  %4195 = vtanh.f32 %v545_v27  ;;  %v561_v27 = vld [vmem:[%s4660_s23 + $0xc98] sm:$0xff] }
 0x1b1   : > { %v4172_v40 = vpop.eup %4171  ;;  %2576 = vst [vmem:[%s4689_s18 + $0xb90] sm:$0xff] %v3203_v33  ;;  %v3205_v41 = vadd.f32 -0.5, %v1554_v34  ;;  %v1556_v42 = vmul.f32 0.5, %v4170_v36  ;;  %4197 = vtanh.f32 %v546_v31  ;;  %v562_v31 = vld [vmem:[%s4660_s23 + $0xca0] sm:$0xff] }
 0x1b2   : > { %v4174_v44 = vpop.eup %4173  ;;  %2577 = vst [vmem:[%s4689_s18 + $0xb98] sm:$0xff] %v3204_v37  ;;  %v3206_v45 = vadd.f32 -0.5, %v1555_v38  ;;  %v1557_v46 = vmul.f32 0.5, %v4172_v40  ;;  %4199 = vtanh.f32 %v547_v35  ;;  %v563_v35 = vld [vmem:[%s4660_s23 + $0xca8] sm:$0xff] }
 0x1b3   : > { %v4176_v48 = vpop.eup %4175  ;;  %2578 = vst [vmem:[%s4689_s18 + $0xba0] sm:$0xff] %v3205_v41  ;;  %v3207_v49 = vadd.f32 -0.5, %v1556_v42  ;;  %v1558_v50 = vmul.f32 0.5, %v4174_v44  ;;  %4201 = vtanh.f32 %v548_v39  ;;  %v564_v39 = vld [vmem:[%s4660_s23 + $0xcb0] sm:$0xff] }
 0x1b4   : > { %v4178_v52 = vpop.eup %4177  ;;  %2579 = vst [vmem:[%s4689_s18 + $0xba8] sm:$0xff] %v3206_v45  ;;  %v3208_v53 = vadd.f32 -0.5, %v1557_v46  ;;  %v1559_v54 = vmul.f32 0.5, %v4176_v48  ;;  %4203 = vtanh.f32 %v549_v43  ;;  %v565_v43 = vld [vmem:[%s4660_s23 + $0xcb8] sm:$0xff] }
 0x1b5   : > { %v4180_v56 = vpop.eup %4179  ;;  %2580 = vst [vmem:[%s4689_s18 + $0xbb0] sm:$0xff] %v3207_v49  ;;  %v3209_v57 = vadd.f32 -0.5, %v1558_v50  ;;  %v1560_v58 = vmul.f32 0.5, %v4178_v52  ;;  %4205 = vtanh.f32 %v550_v47  ;;  %v566_v47 = vld [vmem:[%s4660_s23 + $0xcc0] sm:$0xff] }
 0x1b6   : > { %v4182_v60 = vpop.eup %4181  ;;  %2581 = vst [vmem:[%s4689_s18 + $0xbb8] sm:$0xff] %v3208_v53  ;;  %v3210_v61 = vadd.f32 -0.5, %v1559_v54  ;;  %v1561_v62 = vmul.f32 0.5, %v4180_v56  ;;  %4207 = vtanh.f32 %v551_v51  ;;  %v567_v51 = vld [vmem:[%s4660_s23 + $0xcc8] sm:$0xff] }
 0x1b7   : > { %v4184_v0 = vpop.eup %4183  ;;  %2582 = vst [vmem:[%s4689_s18 + $0xbc0] sm:$0xff] %v3209_v57  ;;  %v3211_v1 = vadd.f32 -0.5, %v1560_v58  ;;  %v1562_v2 = vmul.f32 0.5, %v4182_v60  ;;  %4209 = vtanh.f32 %v552_v55  ;;  %v568_v55 = vld [vmem:[%s4660_s23 + $0xcd0] sm:$0xff] }
 0x1b8   : > { %v4186_v4 = vpop.eup %4185  ;;  %2583 = vst [vmem:[%s4689_s18 + $0xbc8] sm:$0xff] %v3210_v61  ;;  %v3212_v5 = vadd.f32 -0.5, %v1561_v62  ;;  %v1563_v6 = vmul.f32 0.5, %v4184_v0  ;;  %4211 = vtanh.f32 %v553_v59  ;;  %v569_v59 = vld [vmem:[%s4660_s23 + $0xcd8] sm:$0xff] }
 0x1b9   : > { %v4188_v8 = vpop.eup %4187  ;;  %2584 = vst [vmem:[%s4689_s18 + $0xbd0] sm:$0xff] %v3211_v1  ;;  %v3213_v9 = vadd.f32 -0.5, %v1562_v2  ;;  %v1564_v10 = vmul.f32 0.5, %v4186_v4  ;;  %4213 = vtanh.f32 %v554_v63  ;;  %v570_v63 = vld [vmem:[%s4660_s23 + $0xce0] sm:$0xff] }
 0x1ba   : > { %v4190_v12 = vpop.eup %4189  ;;  %2585 = vst [vmem:[%s4689_s18 + $0xbd8] sm:$0xff] %v3212_v5  ;;  %v3214_v13 = vadd.f32 -0.5, %v1563_v6  ;;  %v1565_v14 = vmul.f32 0.5, %v4188_v8  ;;  %4215 = vtanh.f32 %v555_v3  ;;  %v571_v3 = vld [vmem:[%s4660_s23 + $0xce8] sm:$0xff] }
 0x1bb   : > { %v4192_v16 = vpop.eup %4191  ;;  %2586 = vst [vmem:[%s4689_s18 + $0xbe0] sm:$0xff] %v3213_v9  ;;  %v3215_v17 = vadd.f32 -0.5, %v1564_v10  ;;  %v1566_v18 = vmul.f32 0.5, %v4190_v12  ;;  %4217 = vtanh.f32 %v556_v7  ;;  %v572_v7 = vld [vmem:[%s4660_s23 + $0xcf0] sm:$0xff] }
 0x1bc   : > { %v4194_v20 = vpop.eup %4193  ;;  %2587 = vst [vmem:[%s4689_s18 + $0xbe8] sm:$0xff] %v3214_v13  ;;  %v3216_v21 = vadd.f32 -0.5, %v1565_v14  ;;  %v1567_v22 = vmul.f32 0.5, %v4192_v16  ;;  %4219 = vtanh.f32 %v557_v11  ;;  %v573_v11 = vld [vmem:[%s4660_s23 + $0xcf8] sm:$0xff] }
 0x1bd   : > { %v4196_v24 = vpop.eup %4195  ;;  %2588 = vst [vmem:[%s4689_s18 + $0xbf0] sm:$0xff] %v3215_v17  ;;  %v3217_v25 = vadd.f32 -0.5, %v1566_v18  ;;  %v1568_v26 = vmul.f32 0.5, %v4194_v20  ;;  %4221 = vtanh.f32 %v558_v15  ;;  %v574_v15 = vld [vmem:[%s4660_s23 + $0xd00] sm:$0xff] }
 0x1be   : > { %v4198_v28 = vpop.eup %4197  ;;  %2589 = vst [vmem:[%s4689_s18 + $0xbf8] sm:$0xff] %v3216_v21  ;;  %v3218_v29 = vadd.f32 -0.5, %v1567_v22  ;;  %v1569_v30 = vmul.f32 0.5, %v4196_v24  ;;  %4223 = vtanh.f32 %v559_v19  ;;  %v575_v19 = vld [vmem:[%s4660_s23 + $0xd08] sm:$0xff] }
 0x1bf   : > { %v4200_v32 = vpop.eup %4199  ;;  %2590 = vst [vmem:[%s4689_s18 + $0xc00] sm:$0xff] %v3217_v25  ;;  %v3219_v33 = vadd.f32 -0.5, %v1568_v26  ;;  %v1570_v34 = vmul.f32 0.5, %v4198_v28  ;;  %4225 = vtanh.f32 %v560_v23  ;;  %v576_v23 = vld [vmem:[%s4660_s23 + $0xd10] sm:$0xff] }
 0x1c0   : > { %v4202_v36 = vpop.eup %4201  ;;  %2591 = vst [vmem:[%s4689_s18 + $0xc08] sm:$0xff] %v3218_v29  ;;  %v3220_v37 = vadd.f32 -0.5, %v1569_v30  ;;  %v1571_v38 = vmul.f32 0.5, %v4200_v32  ;;  %4227 = vtanh.f32 %v561_v27  ;;  %v577_v27 = vld [vmem:[%s4660_s23 + $0xd18] sm:$0xff] }
 0x1c1   : > { %v4204_v40 = vpop.eup %4203  ;;  %2592 = vst [vmem:[%s4689_s18 + $0xc10] sm:$0xff] %v3219_v33  ;;  %v3221_v41 = vadd.f32 -0.5, %v1570_v34  ;;  %v1572_v42 = vmul.f32 0.5, %v4202_v36  ;;  %4229 = vtanh.f32 %v562_v31  ;;  %v578_v31 = vld [vmem:[%s4660_s23 + $0xd20] sm:$0xff] }
 0x1c2   : > { %v4206_v44 = vpop.eup %4205  ;;  %2593 = vst [vmem:[%s4689_s18 + $0xc18] sm:$0xff] %v3220_v37  ;;  %v3222_v45 = vadd.f32 -0.5, %v1571_v38  ;;  %v1573_v46 = vmul.f32 0.5, %v4204_v40  ;;  %4231 = vtanh.f32 %v563_v35  ;;  %v579_v35 = vld [vmem:[%s4660_s23 + $0xd28] sm:$0xff] }
 0x1c3   : > { %v4208_v48 = vpop.eup %4207  ;;  %2594 = vst [vmem:[%s4689_s18 + $0xc20] sm:$0xff] %v3221_v41  ;;  %v3223_v49 = vadd.f32 -0.5, %v1572_v42  ;;  %v1574_v50 = vmul.f32 0.5, %v4206_v44  ;;  %4233 = vtanh.f32 %v564_v39  ;;  %v580_v39 = vld [vmem:[%s4660_s23 + $0xd30] sm:$0xff] }
 0x1c4   : > { %v4210_v52 = vpop.eup %4209  ;;  %2595 = vst [vmem:[%s4689_s18 + $0xc28] sm:$0xff] %v3222_v45  ;;  %v3224_v53 = vadd.f32 -0.5, %v1573_v46  ;;  %v1575_v54 = vmul.f32 0.5, %v4208_v48  ;;  %4235 = vtanh.f32 %v565_v43  ;;  %v581_v43 = vld [vmem:[%s4660_s23 + $0xd38] sm:$0xff] }
 0x1c5   : > { %v4212_v56 = vpop.eup %4211  ;;  %2596 = vst [vmem:[%s4689_s18 + $0xc30] sm:$0xff] %v3223_v49  ;;  %v3225_v57 = vadd.f32 -0.5, %v1574_v50  ;;  %v1576_v58 = vmul.f32 0.5, %v4210_v52  ;;  %4237 = vtanh.f32 %v566_v47  ;;  %v582_v47 = vld [vmem:[%s4660_s23 + $0xd40] sm:$0xff] }
 0x1c6   : > { %v4214_v60 = vpop.eup %4213  ;;  %2597 = vst [vmem:[%s4689_s18 + $0xc38] sm:$0xff] %v3224_v53  ;;  %v3226_v61 = vadd.f32 -0.5, %v1575_v54  ;;  %v1577_v62 = vmul.f32 0.5, %v4212_v56  ;;  %4239 = vtanh.f32 %v567_v51  ;;  %v583_v51 = vld [vmem:[%s4660_s23 + $0xd48] sm:$0xff] }
 0x1c7   : > { %v4216_v0 = vpop.eup %4215  ;;  %2598 = vst [vmem:[%s4689_s18 + $0xc40] sm:$0xff] %v3225_v57  ;;  %v3227_v1 = vadd.f32 -0.5, %v1576_v58  ;;  %v1578_v2 = vmul.f32 0.5, %v4214_v60  ;;  %4241 = vtanh.f32 %v568_v55  ;;  %v584_v55 = vld [vmem:[%s4660_s23 + $0xd50] sm:$0xff] }
 0x1c8   : > { %v4218_v4 = vpop.eup %4217  ;;  %2599 = vst [vmem:[%s4689_s18 + $0xc48] sm:$0xff] %v3226_v61  ;;  %v3228_v5 = vadd.f32 -0.5, %v1577_v62  ;;  %v1579_v6 = vmul.f32 0.5, %v4216_v0  ;;  %4243 = vtanh.f32 %v569_v59  ;;  %v585_v59 = vld [vmem:[%s4660_s23 + $0xd58] sm:$0xff] }
 0x1c9   : > { %v4220_v8 = vpop.eup %4219  ;;  %2600 = vst [vmem:[%s4689_s18 + $0xc50] sm:$0xff] %v3227_v1  ;;  %v3229_v9 = vadd.f32 -0.5, %v1578_v2  ;;  %v1580_v10 = vmul.f32 0.5, %v4218_v4  ;;  %4245 = vtanh.f32 %v570_v63  ;;  %v586_v63 = vld [vmem:[%s4660_s23 + $0xd60] sm:$0xff] }
 0x1ca   : > { %v4222_v12 = vpop.eup %4221  ;;  %2601 = vst [vmem:[%s4689_s18 + $0xc58] sm:$0xff] %v3228_v5  ;;  %v3230_v13 = vadd.f32 -0.5, %v1579_v6  ;;  %v1581_v14 = vmul.f32 0.5, %v4220_v8  ;;  %4247 = vtanh.f32 %v571_v3  ;;  %v587_v3 = vld [vmem:[%s4660_s23 + $0xd68] sm:$0xff] }
 0x1cb   : > { %v4224_v16 = vpop.eup %4223  ;;  %2602 = vst [vmem:[%s4689_s18 + $0xc60] sm:$0xff] %v3229_v9  ;;  %v3231_v17 = vadd.f32 -0.5, %v1580_v10  ;;  %v1582_v18 = vmul.f32 0.5, %v4222_v12  ;;  %4249 = vtanh.f32 %v572_v7  ;;  %v588_v7 = vld [vmem:[%s4660_s23 + $0xd70] sm:$0xff] }
 0x1cc   : > { %v4226_v20 = vpop.eup %4225  ;;  %2603 = vst [vmem:[%s4689_s18 + $0xc68] sm:$0xff] %v3230_v13  ;;  %v3232_v21 = vadd.f32 -0.5, %v1581_v14  ;;  %v1583_v22 = vmul.f32 0.5, %v4224_v16  ;;  %4251 = vtanh.f32 %v573_v11  ;;  %v589_v11 = vld [vmem:[%s4660_s23 + $0xd78] sm:$0xff] }
 0x1cd   : > { %v4228_v24 = vpop.eup %4227  ;;  %2604 = vst [vmem:[%s4689_s18 + $0xc70] sm:$0xff] %v3231_v17  ;;  %v3233_v25 = vadd.f32 -0.5, %v1582_v18  ;;  %v1584_v26 = vmul.f32 0.5, %v4226_v20  ;;  %4253 = vtanh.f32 %v574_v15  ;;  %v590_v15 = vld [vmem:[%s4660_s23 + $0xd80] sm:$0xff] }
 0x1ce   : > { %v4230_v28 = vpop.eup %4229  ;;  %2605 = vst [vmem:[%s4689_s18 + $0xc78] sm:$0xff] %v3232_v21  ;;  %v3234_v29 = vadd.f32 -0.5, %v1583_v22  ;;  %v1585_v30 = vmul.f32 0.5, %v4228_v24  ;;  %4255 = vtanh.f32 %v575_v19  ;;  %v591_v19 = vld [vmem:[%s4660_s23 + $0xd88] sm:$0xff] }
 0x1cf   : > { %v4232_v32 = vpop.eup %4231  ;;  %2606 = vst [vmem:[%s4689_s18 + $0xc80] sm:$0xff] %v3233_v25  ;;  %v3235_v33 = vadd.f32 -0.5, %v1584_v26  ;;  %v1586_v34 = vmul.f32 0.5, %v4230_v28  ;;  %4257 = vtanh.f32 %v576_v23  ;;  %v592_v23 = vld [vmem:[%s4660_s23 + $0xd90] sm:$0xff] }
 0x1d0   : > { %v4234_v36 = vpop.eup %4233  ;;  %2607 = vst [vmem:[%s4689_s18 + $0xc88] sm:$0xff] %v3234_v29  ;;  %v3236_v37 = vadd.f32 -0.5, %v1585_v30  ;;  %v1587_v38 = vmul.f32 0.5, %v4232_v32  ;;  %4259 = vtanh.f32 %v577_v27  ;;  %v593_v27 = vld [vmem:[%s4660_s23 + $0xd98] sm:$0xff] }
 0x1d1   : > { %v4236_v40 = vpop.eup %4235  ;;  %2608 = vst [vmem:[%s4689_s18 + $0xc90] sm:$0xff] %v3235_v33  ;;  %v3237_v41 = vadd.f32 -0.5, %v1586_v34  ;;  %v1588_v42 = vmul.f32 0.5, %v4234_v36  ;;  %4261 = vtanh.f32 %v578_v31  ;;  %v594_v31 = vld [vmem:[%s4660_s23 + $0xda0] sm:$0xff] }
 0x1d2   : > { %v4238_v44 = vpop.eup %4237  ;;  %2609 = vst [vmem:[%s4689_s18 + $0xc98] sm:$0xff] %v3236_v37  ;;  %v3238_v45 = vadd.f32 -0.5, %v1587_v38  ;;  %v1589_v46 = vmul.f32 0.5, %v4236_v40  ;;  %4263 = vtanh.f32 %v579_v35  ;;  %v595_v35 = vld [vmem:[%s4660_s23 + $0xda8] sm:$0xff] }
 0x1d3   : > { %v4240_v48 = vpop.eup %4239  ;;  %2610 = vst [vmem:[%s4689_s18 + $0xca0] sm:$0xff] %v3237_v41  ;;  %v3239_v49 = vadd.f32 -0.5, %v1588_v42  ;;  %v1590_v50 = vmul.f32 0.5, %v4238_v44  ;;  %4265 = vtanh.f32 %v580_v39  ;;  %v596_v39 = vld [vmem:[%s4660_s23 + $0xdb0] sm:$0xff] }
 0x1d4   : > { %v4242_v52 = vpop.eup %4241  ;;  %2611 = vst [vmem:[%s4689_s18 + $0xca8] sm:$0xff] %v3238_v45  ;;  %v3240_v53 = vadd.f32 -0.5, %v1589_v46  ;;  %v1591_v54 = vmul.f32 0.5, %v4240_v48  ;;  %4267 = vtanh.f32 %v581_v43  ;;  %v597_v43 = vld [vmem:[%s4660_s23 + $0xdb8] sm:$0xff] }
 0x1d5   : > { %v4244_v56 = vpop.eup %4243  ;;  %2612 = vst [vmem:[%s4689_s18 + $0xcb0] sm:$0xff] %v3239_v49  ;;  %v3241_v57 = vadd.f32 -0.5, %v1590_v50  ;;  %v1592_v58 = vmul.f32 0.5, %v4242_v52  ;;  %4269 = vtanh.f32 %v582_v47  ;;  %v598_v47 = vld [vmem:[%s4660_s23 + $0xdc0] sm:$0xff] }
 0x1d6   : > { %v4246_v60 = vpop.eup %4245  ;;  %2613 = vst [vmem:[%s4689_s18 + $0xcb8] sm:$0xff] %v3240_v53  ;;  %v3242_v61 = vadd.f32 -0.5, %v1591_v54  ;;  %v1593_v62 = vmul.f32 0.5, %v4244_v56  ;;  %4271 = vtanh.f32 %v583_v51  ;;  %v599_v51 = vld [vmem:[%s4660_s23 + $0xdc8] sm:$0xff] }
 0x1d7   : > { %v4248_v0 = vpop.eup %4247  ;;  %2614 = vst [vmem:[%s4689_s18 + $0xcc0] sm:$0xff] %v3241_v57  ;;  %v3243_v1 = vadd.f32 -0.5, %v1592_v58  ;;  %v1594_v2 = vmul.f32 0.5, %v4246_v60  ;;  %4273 = vtanh.f32 %v584_v55  ;;  %v600_v55 = vld [vmem:[%s4660_s23 + $0xdd0] sm:$0xff] }
 0x1d8   : > { %v4250_v4 = vpop.eup %4249  ;;  %2615 = vst [vmem:[%s4689_s18 + $0xcc8] sm:$0xff] %v3242_v61  ;;  %v3244_v5 = vadd.f32 -0.5, %v1593_v62  ;;  %v1595_v6 = vmul.f32 0.5, %v4248_v0  ;;  %4275 = vtanh.f32 %v585_v59  ;;  %v601_v59 = vld [vmem:[%s4660_s23 + $0xdd8] sm:$0xff] }
 0x1d9   : > { %v4252_v8 = vpop.eup %4251  ;;  %2616 = vst [vmem:[%s4689_s18 + $0xcd0] sm:$0xff] %v3243_v1  ;;  %v3245_v9 = vadd.f32 -0.5, %v1594_v2  ;;  %v1596_v10 = vmul.f32 0.5, %v4250_v4  ;;  %4277 = vtanh.f32 %v586_v63  ;;  %v602_v63 = vld [vmem:[%s4660_s23 + $0xde0] sm:$0xff] }
 0x1da   : > { %v4254_v12 = vpop.eup %4253  ;;  %2617 = vst [vmem:[%s4689_s18 + $0xcd8] sm:$0xff] %v3244_v5  ;;  %v3246_v13 = vadd.f32 -0.5, %v1595_v6  ;;  %v1597_v14 = vmul.f32 0.5, %v4252_v8  ;;  %4279 = vtanh.f32 %v587_v3  ;;  %v603_v3 = vld [vmem:[%s4660_s23 + $0xde8] sm:$0xff] }
 0x1db   : > { %v4256_v16 = vpop.eup %4255  ;;  %2618 = vst [vmem:[%s4689_s18 + $0xce0] sm:$0xff] %v3245_v9  ;;  %v3247_v17 = vadd.f32 -0.5, %v1596_v10  ;;  %v1598_v18 = vmul.f32 0.5, %v4254_v12  ;;  %4281 = vtanh.f32 %v588_v7  ;;  %v604_v7 = vld [vmem:[%s4660_s23 + $0xdf0] sm:$0xff] }
 0x1dc   : > { %v4258_v20 = vpop.eup %4257  ;;  %2619 = vst [vmem:[%s4689_s18 + $0xce8] sm:$0xff] %v3246_v13  ;;  %v3248_v21 = vadd.f32 -0.5, %v1597_v14  ;;  %v1599_v22 = vmul.f32 0.5, %v4256_v16  ;;  %4283 = vtanh.f32 %v589_v11  ;;  %v605_v11 = vld [vmem:[%s4660_s23 + $0xdf8] sm:$0xff] }
 0x1dd   : > { %v4260_v24 = vpop.eup %4259  ;;  %2620 = vst [vmem:[%s4689_s18 + $0xcf0] sm:$0xff] %v3247_v17  ;;  %v3249_v25 = vadd.f32 -0.5, %v1598_v18  ;;  %v1600_v26 = vmul.f32 0.5, %v4258_v20  ;;  %4285 = vtanh.f32 %v590_v15  ;;  %v606_v15 = vld [vmem:[%s4660_s23 + $0xe00] sm:$0xff] }
 0x1de   : > { %v4262_v28 = vpop.eup %4261  ;;  %2621 = vst [vmem:[%s4689_s18 + $0xcf8] sm:$0xff] %v3248_v21  ;;  %v3250_v29 = vadd.f32 -0.5, %v1599_v22  ;;  %v1601_v30 = vmul.f32 0.5, %v4260_v24  ;;  %4287 = vtanh.f32 %v591_v19  ;;  %v607_v19 = vld [vmem:[%s4660_s23 + $0xe08] sm:$0xff] }
 0x1df   : > { %v4264_v32 = vpop.eup %4263  ;;  %2622 = vst [vmem:[%s4689_s18 + $0xd00] sm:$0xff] %v3249_v25  ;;  %v3251_v33 = vadd.f32 -0.5, %v1600_v26  ;;  %v1602_v34 = vmul.f32 0.5, %v4262_v28  ;;  %4289 = vtanh.f32 %v592_v23  ;;  %v608_v23 = vld [vmem:[%s4660_s23 + $0xe10] sm:$0xff] }
 0x1e0   : > { %v4266_v36 = vpop.eup %4265  ;;  %2623 = vst [vmem:[%s4689_s18 + $0xd08] sm:$0xff] %v3250_v29  ;;  %v3252_v37 = vadd.f32 -0.5, %v1601_v30  ;;  %v1603_v38 = vmul.f32 0.5, %v4264_v32  ;;  %4291 = vtanh.f32 %v593_v27  ;;  %v609_v27 = vld [vmem:[%s4660_s23 + $0xe18] sm:$0xff] }
 0x1e1   : > { %v4268_v40 = vpop.eup %4267  ;;  %2624 = vst [vmem:[%s4689_s18 + $0xd10] sm:$0xff] %v3251_v33  ;;  %v3253_v41 = vadd.f32 -0.5, %v1602_v34  ;;  %v1604_v42 = vmul.f32 0.5, %v4266_v36  ;;  %4293 = vtanh.f32 %v594_v31  ;;  %v610_v31 = vld [vmem:[%s4660_s23 + $0xe20] sm:$0xff] }
 0x1e2   : > { %v4270_v44 = vpop.eup %4269  ;;  %2625 = vst [vmem:[%s4689_s18 + $0xd18] sm:$0xff] %v3252_v37  ;;  %v3254_v45 = vadd.f32 -0.5, %v1603_v38  ;;  %v1605_v46 = vmul.f32 0.5, %v4268_v40  ;;  %4295 = vtanh.f32 %v595_v35  ;;  %v611_v35 = vld [vmem:[%s4660_s23 + $0xe28] sm:$0xff] }
 0x1e3   : > { %v4272_v48 = vpop.eup %4271  ;;  %2626 = vst [vmem:[%s4689_s18 + $0xd20] sm:$0xff] %v3253_v41  ;;  %v3255_v49 = vadd.f32 -0.5, %v1604_v42  ;;  %v1606_v50 = vmul.f32 0.5, %v4270_v44  ;;  %4297 = vtanh.f32 %v596_v39  ;;  %v612_v39 = vld [vmem:[%s4660_s23 + $0xe30] sm:$0xff] }
 0x1e4   : > { %v4274_v52 = vpop.eup %4273  ;;  %2627 = vst [vmem:[%s4689_s18 + $0xd28] sm:$0xff] %v3254_v45  ;;  %v3256_v53 = vadd.f32 -0.5, %v1605_v46  ;;  %v1607_v54 = vmul.f32 0.5, %v4272_v48  ;;  %4299 = vtanh.f32 %v597_v43  ;;  %v613_v43 = vld [vmem:[%s4660_s23 + $0xe38] sm:$0xff] }
 0x1e5   : > { %v4276_v56 = vpop.eup %4275  ;;  %2628 = vst [vmem:[%s4689_s18 + $0xd30] sm:$0xff] %v3255_v49  ;;  %v3257_v57 = vadd.f32 -0.5, %v1606_v50  ;;  %v1608_v58 = vmul.f32 0.5, %v4274_v52  ;;  %4301 = vtanh.f32 %v598_v47  ;;  %v614_v47 = vld [vmem:[%s4660_s23 + $0xe40] sm:$0xff] }
 0x1e6   : > { %v4278_v60 = vpop.eup %4277  ;;  %2629 = vst [vmem:[%s4689_s18 + $0xd38] sm:$0xff] %v3256_v53  ;;  %v3258_v61 = vadd.f32 -0.5, %v1607_v54  ;;  %v1609_v62 = vmul.f32 0.5, %v4276_v56  ;;  %4303 = vtanh.f32 %v599_v51  ;;  %v615_v51 = vld [vmem:[%s4660_s23 + $0xe48] sm:$0xff] }
 0x1e7   : > { %v4280_v0 = vpop.eup %4279  ;;  %2630 = vst [vmem:[%s4689_s18 + $0xd40] sm:$0xff] %v3257_v57  ;;  %v3259_v1 = vadd.f32 -0.5, %v1608_v58  ;;  %v1610_v2 = vmul.f32 0.5, %v4278_v60  ;;  %4305 = vtanh.f32 %v600_v55  ;;  %v616_v55 = vld [vmem:[%s4660_s23 + $0xe50] sm:$0xff] }
 0x1e8   : > { %v4282_v4 = vpop.eup %4281  ;;  %2631 = vst [vmem:[%s4689_s18 + $0xd48] sm:$0xff] %v3258_v61  ;;  %v3260_v5 = vadd.f32 -0.5, %v1609_v62  ;;  %v1611_v6 = vmul.f32 0.5, %v4280_v0  ;;  %4307 = vtanh.f32 %v601_v59  ;;  %v617_v59 = vld [vmem:[%s4660_s23 + $0xe58] sm:$0xff] }
 0x1e9   : > { %v4284_v8 = vpop.eup %4283  ;;  %2632 = vst [vmem:[%s4689_s18 + $0xd50] sm:$0xff] %v3259_v1  ;;  %v3261_v9 = vadd.f32 -0.5, %v1610_v2  ;;  %v1612_v10 = vmul.f32 0.5, %v4282_v4  ;;  %4309 = vtanh.f32 %v602_v63  ;;  %v618_v63 = vld [vmem:[%s4660_s23 + $0xe60] sm:$0xff] }
 0x1ea   : > { %v4286_v12 = vpop.eup %4285  ;;  %2633 = vst [vmem:[%s4689_s18 + $0xd58] sm:$0xff] %v3260_v5  ;;  %v3262_v13 = vadd.f32 -0.5, %v1611_v6  ;;  %v1613_v14 = vmul.f32 0.5, %v4284_v8  ;;  %4311 = vtanh.f32 %v603_v3  ;;  %v619_v3 = vld [vmem:[%s4660_s23 + $0xe68] sm:$0xff] }
 0x1eb   : > { %v4288_v16 = vpop.eup %4287  ;;  %2634 = vst [vmem:[%s4689_s18 + $0xd60] sm:$0xff] %v3261_v9  ;;  %v3263_v17 = vadd.f32 -0.5, %v1612_v10  ;;  %v1614_v18 = vmul.f32 0.5, %v4286_v12  ;;  %4313 = vtanh.f32 %v604_v7  ;;  %v620_v7 = vld [vmem:[%s4660_s23 + $0xe70] sm:$0xff] }
 0x1ec   : > { %v4290_v20 = vpop.eup %4289  ;;  %2635 = vst [vmem:[%s4689_s18 + $0xd68] sm:$0xff] %v3262_v13  ;;  %v3264_v21 = vadd.f32 -0.5, %v1613_v14  ;;  %v1615_v22 = vmul.f32 0.5, %v4288_v16  ;;  %4315 = vtanh.f32 %v605_v11  ;;  %v621_v11 = vld [vmem:[%s4660_s23 + $0xe78] sm:$0xff] }
 0x1ed   : > { %v4292_v24 = vpop.eup %4291  ;;  %2636 = vst [vmem:[%s4689_s18 + $0xd70] sm:$0xff] %v3263_v17  ;;  %v3265_v25 = vadd.f32 -0.5, %v1614_v18  ;;  %v1616_v26 = vmul.f32 0.5, %v4290_v20  ;;  %4317 = vtanh.f32 %v606_v15  ;;  %v622_v15 = vld [vmem:[%s4660_s23 + $0xe80] sm:$0xff] }
 0x1ee   : > { %v4294_v28 = vpop.eup %4293  ;;  %2637 = vst [vmem:[%s4689_s18 + $0xd78] sm:$0xff] %v3264_v21  ;;  %v3266_v29 = vadd.f32 -0.5, %v1615_v22  ;;  %v1617_v30 = vmul.f32 0.5, %v4292_v24  ;;  %4319 = vtanh.f32 %v607_v19  ;;  %v623_v19 = vld [vmem:[%s4660_s23 + $0xe88] sm:$0xff] }
 0x1ef   : > { %v4296_v32 = vpop.eup %4295  ;;  %2638 = vst [vmem:[%s4689_s18 + $0xd80] sm:$0xff] %v3265_v25  ;;  %v3267_v33 = vadd.f32 -0.5, %v1616_v26  ;;  %v1618_v34 = vmul.f32 0.5, %v4294_v28  ;;  %4321 = vtanh.f32 %v608_v23  ;;  %v624_v23 = vld [vmem:[%s4660_s23 + $0xe90] sm:$0xff] }
 0x1f0   : > { %v4298_v36 = vpop.eup %4297  ;;  %2639 = vst [vmem:[%s4689_s18 + $0xd88] sm:$0xff] %v3266_v29  ;;  %v3268_v37 = vadd.f32 -0.5, %v1617_v30  ;;  %v1619_v38 = vmul.f32 0.5, %v4296_v32  ;;  %4323 = vtanh.f32 %v609_v27  ;;  %v625_v27 = vld [vmem:[%s4660_s23 + $0xe98] sm:$0xff] }
 0x1f1   : > { %v4300_v40 = vpop.eup %4299  ;;  %2640 = vst [vmem:[%s4689_s18 + $0xd90] sm:$0xff] %v3267_v33  ;;  %v3269_v41 = vadd.f32 -0.5, %v1618_v34  ;;  %v1620_v42 = vmul.f32 0.5, %v4298_v36  ;;  %4325 = vtanh.f32 %v610_v31  ;;  %v626_v31 = vld [vmem:[%s4660_s23 + $0xea0] sm:$0xff] }
 0x1f2   : > { %v4302_v44 = vpop.eup %4301  ;;  %2641 = vst [vmem:[%s4689_s18 + $0xd98] sm:$0xff] %v3268_v37  ;;  %v3270_v45 = vadd.f32 -0.5, %v1619_v38  ;;  %v1621_v46 = vmul.f32 0.5, %v4300_v40  ;;  %4327 = vtanh.f32 %v611_v35  ;;  %v627_v35 = vld [vmem:[%s4660_s23 + $0xea8] sm:$0xff] }
 0x1f3   : > { %v4304_v48 = vpop.eup %4303  ;;  %2642 = vst [vmem:[%s4689_s18 + $0xda0] sm:$0xff] %v3269_v41  ;;  %v3271_v49 = vadd.f32 -0.5, %v1620_v42  ;;  %v1622_v50 = vmul.f32 0.5, %v4302_v44  ;;  %4329 = vtanh.f32 %v612_v39  ;;  %v628_v39 = vld [vmem:[%s4660_s23 + $0xeb0] sm:$0xff] }
 0x1f4   : > { %v4306_v52 = vpop.eup %4305  ;;  %2643 = vst [vmem:[%s4689_s18 + $0xda8] sm:$0xff] %v3270_v45  ;;  %v3272_v53 = vadd.f32 -0.5, %v1621_v46  ;;  %v1623_v54 = vmul.f32 0.5, %v4304_v48  ;;  %4331 = vtanh.f32 %v613_v43  ;;  %v629_v43 = vld [vmem:[%s4660_s23 + $0xeb8] sm:$0xff] }
 0x1f5   : > { %v4308_v56 = vpop.eup %4307  ;;  %2644 = vst [vmem:[%s4689_s18 + $0xdb0] sm:$0xff] %v3271_v49  ;;  %v3273_v57 = vadd.f32 -0.5, %v1622_v50  ;;  %v1624_v58 = vmul.f32 0.5, %v4306_v52  ;;  %4333 = vtanh.f32 %v614_v47  ;;  %v630_v47 = vld [vmem:[%s4660_s23 + $0xec0] sm:$0xff] }
 0x1f6   : > { %v4310_v60 = vpop.eup %4309  ;;  %2645 = vst [vmem:[%s4689_s18 + $0xdb8] sm:$0xff] %v3272_v53  ;;  %v3274_v61 = vadd.f32 -0.5, %v1623_v54  ;;  %v1625_v62 = vmul.f32 0.5, %v4308_v56  ;;  %4335 = vtanh.f32 %v615_v51  ;;  %v631_v51 = vld [vmem:[%s4660_s23 + $0xec8] sm:$0xff] }
 0x1f7   : > { %v4312_v0 = vpop.eup %4311  ;;  %2646 = vst [vmem:[%s4689_s18 + $0xdc0] sm:$0xff] %v3273_v57  ;;  %v3275_v1 = vadd.f32 -0.5, %v1624_v58  ;;  %v1626_v2 = vmul.f32 0.5, %v4310_v60  ;;  %4337 = vtanh.f32 %v616_v55  ;;  %v632_v55 = vld [vmem:[%s4660_s23 + $0xed0] sm:$0xff] }
 0x1f8   : > { %v4314_v4 = vpop.eup %4313  ;;  %2647 = vst [vmem:[%s4689_s18 + $0xdc8] sm:$0xff] %v3274_v61  ;;  %v3276_v5 = vadd.f32 -0.5, %v1625_v62  ;;  %v1627_v6 = vmul.f32 0.5, %v4312_v0  ;;  %4339 = vtanh.f32 %v617_v59  ;;  %v633_v59 = vld [vmem:[%s4660_s23 + $0xed8] sm:$0xff] }
 0x1f9   : > { %v4316_v8 = vpop.eup %4315  ;;  %2648 = vst [vmem:[%s4689_s18 + $0xdd0] sm:$0xff] %v3275_v1  ;;  %v3277_v9 = vadd.f32 -0.5, %v1626_v2  ;;  %v1628_v10 = vmul.f32 0.5, %v4314_v4  ;;  %4341 = vtanh.f32 %v618_v63  ;;  %v634_v63 = vld [vmem:[%s4660_s23 + $0xee0] sm:$0xff] }
 0x1fa   : > { %v4318_v12 = vpop.eup %4317  ;;  %2649 = vst [vmem:[%s4689_s18 + $0xdd8] sm:$0xff] %v3276_v5  ;;  %v3278_v13 = vadd.f32 -0.5, %v1627_v6  ;;  %v1629_v14 = vmul.f32 0.5, %v4316_v8  ;;  %4343 = vtanh.f32 %v619_v3  ;;  %v635_v3 = vld [vmem:[%s4660_s23 + $0xee8] sm:$0xff] }
 0x1fb   : > { %v4320_v16 = vpop.eup %4319  ;;  %2650 = vst [vmem:[%s4689_s18 + $0xde0] sm:$0xff] %v3277_v9  ;;  %v3279_v17 = vadd.f32 -0.5, %v1628_v10  ;;  %v1630_v18 = vmul.f32 0.5, %v4318_v12  ;;  %4345 = vtanh.f32 %v620_v7  ;;  %v636_v7 = vld [vmem:[%s4660_s23 + $0xef0] sm:$0xff] }
 0x1fc   : > { %v4322_v20 = vpop.eup %4321  ;;  %2651 = vst [vmem:[%s4689_s18 + $0xde8] sm:$0xff] %v3278_v13  ;;  %v3280_v21 = vadd.f32 -0.5, %v1629_v14  ;;  %v1631_v22 = vmul.f32 0.5, %v4320_v16  ;;  %4347 = vtanh.f32 %v621_v11  ;;  %v637_v11 = vld [vmem:[%s4660_s23 + $0xef8] sm:$0xff] }
 0x1fd   : > { %v4324_v24 = vpop.eup %4323  ;;  %2652 = vst [vmem:[%s4689_s18 + $0xdf0] sm:$0xff] %v3279_v17  ;;  %v3281_v25 = vadd.f32 -0.5, %v1630_v18  ;;  %v1632_v26 = vmul.f32 0.5, %v4322_v20  ;;  %4349 = vtanh.f32 %v622_v15  ;;  %v638_v15 = vld [vmem:[%s4660_s23 + $0xf00] sm:$0xff] }
 0x1fe   : > { %v4326_v28 = vpop.eup %4325  ;;  %2653 = vst [vmem:[%s4689_s18 + $0xdf8] sm:$0xff] %v3280_v21  ;;  %v3282_v29 = vadd.f32 -0.5, %v1631_v22  ;;  %v1633_v30 = vmul.f32 0.5, %v4324_v24  ;;  %4351 = vtanh.f32 %v623_v19  ;;  %v639_v19 = vld [vmem:[%s4660_s23 + $0xf08] sm:$0xff] }
 0x1ff   : > { %v4328_v32 = vpop.eup %4327  ;;  %2654 = vst [vmem:[%s4689_s18 + $0xe00] sm:$0xff] %v3281_v25  ;;  %v3283_v33 = vadd.f32 -0.5, %v1632_v26  ;;  %v1634_v34 = vmul.f32 0.5, %v4326_v28  ;;  %4353 = vtanh.f32 %v624_v23  ;;  %v640_v23 = vld [vmem:[%s4660_s23 + $0xf10] sm:$0xff] }
 0x200   : > { %v4330_v36 = vpop.eup %4329  ;;  %2655 = vst [vmem:[%s4689_s18 + $0xe08] sm:$0xff] %v3282_v29  ;;  %v3284_v37 = vadd.f32 -0.5, %v1633_v30  ;;  %v1635_v38 = vmul.f32 0.5, %v4328_v32  ;;  %4355 = vtanh.f32 %v625_v27  ;;  %v641_v27 = vld [vmem:[%s4660_s23 + $0xf18] sm:$0xff] }
 0x201   : > { %v4332_v40 = vpop.eup %4331  ;;  %2656 = vst [vmem:[%s4689_s18 + $0xe10] sm:$0xff] %v3283_v33  ;;  %v3285_v41 = vadd.f32 -0.5, %v1634_v34  ;;  %v1636_v42 = vmul.f32 0.5, %v4330_v36  ;;  %4357 = vtanh.f32 %v626_v31  ;;  %v642_v31 = vld [vmem:[%s4660_s23 + $0xf20] sm:$0xff] }
 0x202   : > { %v4334_v44 = vpop.eup %4333  ;;  %2657 = vst [vmem:[%s4689_s18 + $0xe18] sm:$0xff] %v3284_v37  ;;  %v3286_v45 = vadd.f32 -0.5, %v1635_v38  ;;  %v1637_v46 = vmul.f32 0.5, %v4332_v40  ;;  %4359 = vtanh.f32 %v627_v35  ;;  %v643_v35 = vld [vmem:[%s4660_s23 + $0xf28] sm:$0xff] }
 0x203   : > { %v4336_v48 = vpop.eup %4335  ;;  %2658 = vst [vmem:[%s4689_s18 + $0xe20] sm:$0xff] %v3285_v41  ;;  %v3287_v49 = vadd.f32 -0.5, %v1636_v42  ;;  %v1638_v50 = vmul.f32 0.5, %v4334_v44  ;;  %4361 = vtanh.f32 %v628_v39  ;;  %v644_v39 = vld [vmem:[%s4660_s23 + $0xf30] sm:$0xff] }
 0x204   : > { %v4338_v52 = vpop.eup %4337  ;;  %2659 = vst [vmem:[%s4689_s18 + $0xe28] sm:$0xff] %v3286_v45  ;;  %v3288_v53 = vadd.f32 -0.5, %v1637_v46  ;;  %v1639_v54 = vmul.f32 0.5, %v4336_v48  ;;  %4363 = vtanh.f32 %v629_v43  ;;  %v645_v43 = vld [vmem:[%s4660_s23 + $0xf38] sm:$0xff] }
 0x205   : > { %v4340_v56 = vpop.eup %4339  ;;  %2660 = vst [vmem:[%s4689_s18 + $0xe30] sm:$0xff] %v3287_v49  ;;  %v3289_v57 = vadd.f32 -0.5, %v1638_v50  ;;  %v1640_v58 = vmul.f32 0.5, %v4338_v52  ;;  %4365 = vtanh.f32 %v630_v47  ;;  %v646_v47 = vld [vmem:[%s4660_s23 + $0xf40] sm:$0xff] }
 0x206   : > { %v4342_v60 = vpop.eup %4341  ;;  %2661 = vst [vmem:[%s4689_s18 + $0xe38] sm:$0xff] %v3288_v53  ;;  %v3290_v61 = vadd.f32 -0.5, %v1639_v54  ;;  %v1641_v62 = vmul.f32 0.5, %v4340_v56  ;;  %4367 = vtanh.f32 %v631_v51  ;;  %v647_v51 = vld [vmem:[%s4660_s23 + $0xf48] sm:$0xff] }
 0x207   : > { %v4344_v0 = vpop.eup %4343  ;;  %2662 = vst [vmem:[%s4689_s18 + $0xe40] sm:$0xff] %v3289_v57  ;;  %v3291_v1 = vadd.f32 -0.5, %v1640_v58  ;;  %v1642_v2 = vmul.f32 0.5, %v4342_v60  ;;  %4369 = vtanh.f32 %v632_v55  ;;  %v648_v55 = vld [vmem:[%s4660_s23 + $0xf50] sm:$0xff] }
 0x208   : > { %v4346_v4 = vpop.eup %4345  ;;  %2663 = vst [vmem:[%s4689_s18 + $0xe48] sm:$0xff] %v3290_v61  ;;  %v3292_v5 = vadd.f32 -0.5, %v1641_v62  ;;  %v1643_v6 = vmul.f32 0.5, %v4344_v0  ;;  %4371 = vtanh.f32 %v633_v59  ;;  %v649_v59 = vld [vmem:[%s4660_s23 + $0xf58] sm:$0xff] }
 0x209   : > { %v4348_v8 = vpop.eup %4347  ;;  %2664 = vst [vmem:[%s4689_s18 + $0xe50] sm:$0xff] %v3291_v1  ;;  %v3293_v9 = vadd.f32 -0.5, %v1642_v2  ;;  %v1644_v10 = vmul.f32 0.5, %v4346_v4  ;;  %4373 = vtanh.f32 %v634_v63  ;;  %v650_v63 = vld [vmem:[%s4660_s23 + $0xf60] sm:$0xff] }
 0x20a   : > { %v4350_v12 = vpop.eup %4349  ;;  %2665 = vst [vmem:[%s4689_s18 + $0xe58] sm:$0xff] %v3292_v5  ;;  %v3294_v13 = vadd.f32 -0.5, %v1643_v6  ;;  %v1645_v14 = vmul.f32 0.5, %v4348_v8  ;;  %4375 = vtanh.f32 %v635_v3  ;;  %v651_v3 = vld [vmem:[%s4660_s23 + $0xf68] sm:$0xff] }
 0x20b   : > { %v4352_v16 = vpop.eup %4351  ;;  %2666 = vst [vmem:[%s4689_s18 + $0xe60] sm:$0xff] %v3293_v9  ;;  %v3295_v17 = vadd.f32 -0.5, %v1644_v10  ;;  %v1646_v18 = vmul.f32 0.5, %v4350_v12  ;;  %4377 = vtanh.f32 %v636_v7  ;;  %v652_v7 = vld [vmem:[%s4660_s23 + $0xf70] sm:$0xff] }
 0x20c   : > { %v4354_v20 = vpop.eup %4353  ;;  %2667 = vst [vmem:[%s4689_s18 + $0xe68] sm:$0xff] %v3294_v13  ;;  %v3296_v21 = vadd.f32 -0.5, %v1645_v14  ;;  %v1647_v22 = vmul.f32 0.5, %v4352_v16  ;;  %4379 = vtanh.f32 %v637_v11  ;;  %v653_v11 = vld [vmem:[%s4660_s23 + $0xf78] sm:$0xff] }
 0x20d   : > { %v4356_v24 = vpop.eup %4355  ;;  %2668 = vst [vmem:[%s4689_s18 + $0xe70] sm:$0xff] %v3295_v17  ;;  %v3297_v25 = vadd.f32 -0.5, %v1646_v18  ;;  %v1648_v26 = vmul.f32 0.5, %v4354_v20  ;;  %4381 = vtanh.f32 %v638_v15  ;;  %v654_v15 = vld [vmem:[%s4660_s23 + $0xf80] sm:$0xff] }
 0x20e   : > { %v4358_v28 = vpop.eup %4357  ;;  %2669 = vst [vmem:[%s4689_s18 + $0xe78] sm:$0xff] %v3296_v21  ;;  %v3298_v29 = vadd.f32 -0.5, %v1647_v22  ;;  %v1649_v30 = vmul.f32 0.5, %v4356_v24  ;;  %4383 = vtanh.f32 %v639_v19  ;;  %v655_v19 = vld [vmem:[%s4660_s23 + $0xf88] sm:$0xff] }
 0x20f   : > { %v4360_v32 = vpop.eup %4359  ;;  %2670 = vst [vmem:[%s4689_s18 + $0xe80] sm:$0xff] %v3297_v25  ;;  %v3299_v33 = vadd.f32 -0.5, %v1648_v26  ;;  %v1650_v34 = vmul.f32 0.5, %v4358_v28  ;;  %4385 = vtanh.f32 %v640_v23  ;;  %v656_v23 = vld [vmem:[%s4660_s23 + $0xf90] sm:$0xff] }
 0x210   : > { %v4362_v36 = vpop.eup %4361  ;;  %2671 = vst [vmem:[%s4689_s18 + $0xe88] sm:$0xff] %v3298_v29  ;;  %v3300_v37 = vadd.f32 -0.5, %v1649_v30  ;;  %v1651_v38 = vmul.f32 0.5, %v4360_v32  ;;  %4387 = vtanh.f32 %v641_v27  ;;  %v657_v27 = vld [vmem:[%s4660_s23 + $0xf98] sm:$0xff] }
 0x211   : > { %v4364_v40 = vpop.eup %4363  ;;  %2672 = vst [vmem:[%s4689_s18 + $0xe90] sm:$0xff] %v3299_v33  ;;  %v3301_v41 = vadd.f32 -0.5, %v1650_v34  ;;  %v1652_v42 = vmul.f32 0.5, %v4362_v36  ;;  %4389 = vtanh.f32 %v642_v31  ;;  %v658_v31 = vld [vmem:[%s4660_s23 + $0xfa0] sm:$0xff] }
 0x212   : > { %v4366_v44 = vpop.eup %4365  ;;  %2673 = vst [vmem:[%s4689_s18 + $0xe98] sm:$0xff] %v3300_v37  ;;  %v3302_v45 = vadd.f32 -0.5, %v1651_v38  ;;  %v1653_v46 = vmul.f32 0.5, %v4364_v40  ;;  %4391 = vtanh.f32 %v643_v35  ;;  %v659_v35 = vld [vmem:[%s4660_s23 + $0xfa8] sm:$0xff] }
 0x213   : > { %v4368_v48 = vpop.eup %4367  ;;  %2674 = vst [vmem:[%s4689_s18 + $0xea0] sm:$0xff] %v3301_v41  ;;  %v3303_v49 = vadd.f32 -0.5, %v1652_v42  ;;  %v1654_v50 = vmul.f32 0.5, %v4366_v44  ;;  %4393 = vtanh.f32 %v644_v39  ;;  %v660_v39 = vld [vmem:[%s4660_s23 + $0xfb0] sm:$0xff] }
 0x214   : > { %v4370_v52 = vpop.eup %4369  ;;  %2675 = vst [vmem:[%s4689_s18 + $0xea8] sm:$0xff] %v3302_v45  ;;  %v3304_v53 = vadd.f32 -0.5, %v1653_v46  ;;  %v1655_v54 = vmul.f32 0.5, %v4368_v48  ;;  %4395 = vtanh.f32 %v645_v43  ;;  %v661_v43 = vld [vmem:[%s4660_s23 + $0xfb8] sm:$0xff] }
 0x215   : > { %v4372_v56 = vpop.eup %4371  ;;  %2676 = vst [vmem:[%s4689_s18 + $0xeb0] sm:$0xff] %v3303_v49  ;;  %v3305_v57 = vadd.f32 -0.5, %v1654_v50  ;;  %v1656_v58 = vmul.f32 0.5, %v4370_v52  ;;  %4397 = vtanh.f32 %v646_v47  ;;  %v662_v47 = vld [vmem:[%s4660_s23 + $0xfc0] sm:$0xff] }
 0x216   : > { %v4374_v60 = vpop.eup %4373  ;;  %2677 = vst [vmem:[%s4689_s18 + $0xeb8] sm:$0xff] %v3304_v53  ;;  %v3306_v61 = vadd.f32 -0.5, %v1655_v54  ;;  %v1657_v62 = vmul.f32 0.5, %v4372_v56  ;;  %4399 = vtanh.f32 %v647_v51  ;;  %v663_v51 = vld [vmem:[%s4660_s23 + $0xfc8] sm:$0xff] }
 0x217   : > { %v4376_v0 = vpop.eup %4375  ;;  %2678 = vst [vmem:[%s4689_s18 + $0xec0] sm:$0xff] %v3305_v57  ;;  %v3307_v1 = vadd.f32 -0.5, %v1656_v58  ;;  %v1658_v2 = vmul.f32 0.5, %v4374_v60  ;;  %4401 = vtanh.f32 %v648_v55  ;;  %v664_v55 = vld [vmem:[%s4660_s23 + $0xfd0] sm:$0xff] }
 0x218   : > { %v4378_v4 = vpop.eup %4377  ;;  %2679 = vst [vmem:[%s4689_s18 + $0xec8] sm:$0xff] %v3306_v61  ;;  %v3308_v5 = vadd.f32 -0.5, %v1657_v62  ;;  %v1659_v6 = vmul.f32 0.5, %v4376_v0  ;;  %4403 = vtanh.f32 %v649_v59  ;;  %v665_v59 = vld [vmem:[%s4660_s23 + $0xfd8] sm:$0xff] }
 0x219   : > { %v4380_v8 = vpop.eup %4379  ;;  %2680 = vst [vmem:[%s4689_s18 + $0xed0] sm:$0xff] %v3307_v1  ;;  %v3309_v9 = vadd.f32 -0.5, %v1658_v2  ;;  %v1660_v10 = vmul.f32 0.5, %v4378_v4  ;;  %4405 = vtanh.f32 %v650_v63  ;;  %v666_v63 = vld [vmem:[%s4660_s23 + $0xfe0] sm:$0xff] }
 0x21a   : > { %v4382_v12 = vpop.eup %4381  ;;  %2681 = vst [vmem:[%s4689_s18 + $0xed8] sm:$0xff] %v3308_v5  ;;  %v3310_v13 = vadd.f32 -0.5, %v1659_v6  ;;  %v1661_v14 = vmul.f32 0.5, %v4380_v8  ;;  %4407 = vtanh.f32 %v651_v3  ;;  %v667_v3 = vld [vmem:[%s4660_s23 + $0xfe8] sm:$0xff] }
 0x21b   : > { %v4384_v16 = vpop.eup %4383  ;;  %2682 = vst [vmem:[%s4689_s18 + $0xee0] sm:$0xff] %v3309_v9  ;;  %v3311_v17 = vadd.f32 -0.5, %v1660_v10  ;;  %v1662_v18 = vmul.f32 0.5, %v4382_v12  ;;  %4409 = vtanh.f32 %v652_v7  ;;  %v668_v7 = vld [vmem:[%s4660_s23 + $0xff0] sm:$0xff] }
 0x21c   : > { %v4386_v20 = vpop.eup %4385  ;;  %2683 = vst [vmem:[%s4689_s18 + $0xee8] sm:$0xff] %v3310_v13  ;;  %v3312_v21 = vadd.f32 -0.5, %v1661_v14  ;;  %v1663_v22 = vmul.f32 0.5, %v4384_v16  ;;  %4411 = vtanh.f32 %v653_v11  ;;  %v669_v11 = vld [vmem:[%s4660_s23 + $0xff8] sm:$0xff] }
 0x21d   : > { %v4388_v24 = vpop.eup %4387  ;;  %2684 = vst [vmem:[%s4689_s18 + $0xef0] sm:$0xff] %v3311_v17  ;;  %v3313_v25 = vadd.f32 -0.5, %v1662_v18  ;;  %v1664_v26 = vmul.f32 0.5, %v4386_v20  ;;  %4413 = vtanh.f32 %v654_v15 }
 0x21e   : > { %v4390_v28 = vpop.eup %4389  ;;  %2685 = vst [vmem:[%s4689_s18 + $0xef8] sm:$0xff] %v3312_v21  ;;  %v3314_v29 = vadd.f32 -0.5, %v1663_v22  ;;  %v1665_v30 = vmul.f32 0.5, %v4388_v24  ;;  %4415 = vtanh.f32 %v655_v19 }
 0x21f   : > { %v4392_v32 = vpop.eup %4391  ;;  %2686 = vst [vmem:[%s4689_s18 + $0xf00] sm:$0xff] %v3313_v25  ;;  %v3315_v33 = vadd.f32 -0.5, %v1664_v26  ;;  %v1666_v34 = vmul.f32 0.5, %v4390_v28  ;;  %4417 = vtanh.f32 %v656_v23 }
 0x220   : > { %v4394_v36 = vpop.eup %4393  ;;  %2687 = vst [vmem:[%s4689_s18 + $0xf08] sm:$0xff] %v3314_v29  ;;  %v3316_v37 = vadd.f32 -0.5, %v1665_v30  ;;  %v1667_v38 = vmul.f32 0.5, %v4392_v32  ;;  %4419 = vtanh.f32 %v657_v27 }
 0x221   : > { %v4396_v40 = vpop.eup %4395  ;;  %2688 = vst [vmem:[%s4689_s18 + $0xf10] sm:$0xff] %v3315_v33  ;;  %v3317_v41 = vadd.f32 -0.5, %v1666_v34  ;;  %v1668_v42 = vmul.f32 0.5, %v4394_v36  ;;  %4421 = vtanh.f32 %v658_v31 }
 0x222   : > { %v4398_v44 = vpop.eup %4397  ;;  %2689 = vst [vmem:[%s4689_s18 + $0xf18] sm:$0xff] %v3316_v37  ;;  %v3318_v45 = vadd.f32 -0.5, %v1667_v38  ;;  %v1669_v46 = vmul.f32 0.5, %v4396_v40  ;;  %4423 = vtanh.f32 %v659_v35 }
 0x223   : > { %v4400_v48 = vpop.eup %4399  ;;  %2690 = vst [vmem:[%s4689_s18 + $0xf20] sm:$0xff] %v3317_v41  ;;  %v3319_v49 = vadd.f32 -0.5, %v1668_v42  ;;  %v1670_v50 = vmul.f32 0.5, %v4398_v44  ;;  %4425 = vtanh.f32 %v660_v39 }
 0x224   : > { %v4402_v52 = vpop.eup %4401  ;;  %2691 = vst [vmem:[%s4689_s18 + $0xf28] sm:$0xff] %v3318_v45  ;;  %v3320_v53 = vadd.f32 -0.5, %v1669_v46  ;;  %v1671_v54 = vmul.f32 0.5, %v4400_v48  ;;  %4427 = vtanh.f32 %v661_v43 }
 0x225   : > { %v4404_v56 = vpop.eup %4403  ;;  %2692 = vst [vmem:[%s4689_s18 + $0xf30] sm:$0xff] %v3319_v49  ;;  %v3321_v57 = vadd.f32 -0.5, %v1670_v50  ;;  %v1672_v58 = vmul.f32 0.5, %v4402_v52  ;;  %4429 = vtanh.f32 %v662_v47 }
 0x226   : > { %v4406_v60 = vpop.eup %4405  ;;  %2693 = vst [vmem:[%s4689_s18 + $0xf38] sm:$0xff] %v3320_v53  ;;  %v3322_v61 = vadd.f32 -0.5, %v1671_v54  ;;  %v1673_v62 = vmul.f32 0.5, %v4404_v56  ;;  %4431 = vtanh.f32 %v663_v51 }
 0x227   : > { %v4408_v0 = vpop.eup %4407  ;;  %2694 = vst [vmem:[%s4689_s18 + $0xf40] sm:$0xff] %v3321_v57  ;;  %v3323_v1 = vadd.f32 -0.5, %v1672_v58  ;;  %v1674_v2 = vmul.f32 0.5, %v4406_v60  ;;  %4433 = vtanh.f32 %v664_v55 }
 0x228   : > { %v4410_v4 = vpop.eup %4409  ;;  %2695 = vst [vmem:[%s4689_s18 + $0xf48] sm:$0xff] %v3322_v61  ;;  %v3324_v5 = vadd.f32 -0.5, %v1673_v62  ;;  %v1675_v6 = vmul.f32 0.5, %v4408_v0  ;;  %4435 = vtanh.f32 %v665_v59 }
 0x229   : > { %v4412_v8 = vpop.eup %4411  ;;  %2696 = vst [vmem:[%s4689_s18 + $0xf50] sm:$0xff] %v3323_v1  ;;  %v3325_v9 = vadd.f32 -0.5, %v1674_v2  ;;  %v1676_v10 = vmul.f32 0.5, %v4410_v4  ;;  %4437 = vtanh.f32 %v666_v63 }
 0x22a   : > { %v4414_v12 = vpop.eup %4413  ;;  %2697 = vst [vmem:[%s4689_s18 + $0xf58] sm:$0xff] %v3324_v5  ;;  %v3326_v13 = vadd.f32 -0.5, %v1675_v6  ;;  %v1677_v14 = vmul.f32 0.5, %v4412_v8  ;;  %4439 = vtanh.f32 %v667_v3 }
 0x22b   : > { %v4416_v15 = vpop.eup %4415  ;;  %2698 = vst [vmem:[%s4689_s18 + $0xf60] sm:$0xff] %v3325_v9  ;;  %v3327_v16 = vadd.f32 -0.5, %v1676_v10  ;;  %v1678_v17 = vmul.f32 0.5, %v4414_v12  ;;  %4441 = vtanh.f32 %v668_v7 }
 0x22c   : > { %v4418_v18 = vpop.eup %4417  ;;  %2699 = vst [vmem:[%s4689_s18 + $0xf68] sm:$0xff] %v3326_v13  ;;  %v3328_v19 = vadd.f32 -0.5, %v1677_v14  ;;  %v1679_v20 = vmul.f32 0.5, %v4416_v15  ;;  %4443 = vtanh.f32 %v669_v11 }
 0x22d   : > { %v4420_v21 = vpop.eup %4419  ;;  %2700 = vst [vmem:[%s4689_s18 + $0xf70] sm:$0xff] %v3327_v16  ;;  %v3329_v22 = vadd.f32 -0.5, %v1678_v17  ;;  %v1680_v23 = vmul.f32 0.5, %v4418_v18 }
 0x22e   : > { %v4422_v24 = vpop.eup %4421  ;;  %2701 = vst [vmem:[%s4689_s18 + $0xf78] sm:$0xff] %v3328_v19  ;;  %v3330_v25 = vadd.f32 -0.5, %v1679_v20  ;;  %v1681_v26 = vmul.f32 0.5, %v4420_v21 }
 0x22f   : > { %v4424_v27 = vpop.eup %4423  ;;  %2702 = vst [vmem:[%s4689_s18 + $0xf80] sm:$0xff] %v3329_v22  ;;  %v3331_v28 = vadd.f32 -0.5, %v1680_v23  ;;  %v1682_v29 = vmul.f32 0.5, %v4422_v24 }
 0x230   : > { %v4426_v30 = vpop.eup %4425  ;;  %2703 = vst [vmem:[%s4689_s18 + $0xf88] sm:$0xff] %v3330_v25  ;;  %v3332_v31 = vadd.f32 -0.5, %v1681_v26  ;;  %v1683_v32 = vmul.f32 0.5, %v4424_v27 }
 0x231   : > { %v4428_v33 = vpop.eup %4427  ;;  %2704 = vst [vmem:[%s4689_s18 + $0xf90] sm:$0xff] %v3331_v28  ;;  %v3333_v34 = vadd.f32 -0.5, %v1682_v29  ;;  %v1684_v35 = vmul.f32 0.5, %v4426_v30 }
 0x232   : > { %v4430_v36 = vpop.eup %4429  ;;  %2705 = vst [vmem:[%s4689_s18 + $0xf98] sm:$0xff] %v3332_v31  ;;  %v3334_v37 = vadd.f32 -0.5, %v1683_v32  ;;  %v1685_v38 = vmul.f32 0.5, %v4428_v33 }
 0x233   : > { %v4432_v39 = vpop.eup %4431  ;;  %2706 = vst [vmem:[%s4689_s18 + $0xfa0] sm:$0xff] %v3333_v34  ;;  %v3335_v40 = vadd.f32 -0.5, %v1684_v35  ;;  %v1686_v41 = vmul.f32 0.5, %v4430_v36 }
 0x234   : > { %v4434_v42 = vpop.eup %4433  ;;  %2707 = vst [vmem:[%s4689_s18 + $0xfa8] sm:$0xff] %v3334_v37  ;;  %v3336_v43 = vadd.f32 -0.5, %v1685_v38  ;;  %v1687_v44 = vmul.f32 0.5, %v4432_v39 }
 0x235   : > { %v4436_v45 = vpop.eup %4435  ;;  %2708 = vst [vmem:[%s4689_s18 + $0xfb0] sm:$0xff] %v3335_v40  ;;  %v3337_v46 = vadd.f32 -0.5, %v1686_v41  ;;  %v1688_v47 = vmul.f32 0.5, %v4434_v42 }
 0x236   : > { %v4438_v48 = vpop.eup %4437  ;;  %2709 = vst [vmem:[%s4689_s18 + $0xfb8] sm:$0xff] %v3336_v43  ;;  %v3338_v49 = vadd.f32 -0.5, %v1687_v44  ;;  %v1689_v50 = vmul.f32 0.5, %v4436_v45 }
 0x237   : > { %v4440_v51 = vpop.eup %4439  ;;  %2710 = vst [vmem:[%s4689_s18 + $0xfc0] sm:$0xff] %v3337_v46  ;;  %v3339_v52 = vadd.f32 -0.5, %v1688_v47  ;;  %v1690_v53 = vmul.f32 0.5, %v4438_v48 }
 0x238   : > { %v4442_v54 = vpop.eup %4441  ;;  %2711 = vst [vmem:[%s4689_s18 + $0xfc8] sm:$0xff] %v3338_v49  ;;  %v3340_v55 = vadd.f32 -0.5, %v1689_v50  ;;  %v1691_v56 = vmul.f32 0.5, %v4440_v51 }
 0x239   : > { %v4444_v57 = vpop.eup %4443  ;;  %2712 = vst [vmem:[%s4689_s18 + $0xfd0] sm:$0xff] %v3339_v52  ;;  %v3341_v58 = vadd.f32 -0.5, %v1690_v53  ;;  %v1692_v59 = vmul.f32 0.5, %v4442_v54 }
 0x23a   : > { %2713 = vst [vmem:[%s4689_s18 + $0xfd8] sm:$0xff] %v3340_v55  ;;  %v3342_v60 = vadd.f32 -0.5, %v1691_v56  ;;  %v1693_v61 = vmul.f32 0.5, %v4444_v57 }
 0x23b   : > { %2714 = vst [vmem:[%s4689_s18 + $0xfe0] sm:$0xff] %v3341_v58  ;;  %v3343_v62 = vadd.f32 -0.5, %v1692_v59 }
 0x23c   : > { %2715 = vst [vmem:[%s4689_s18 + $0xfe8] sm:$0xff] %v3342_v60  ;;  %v3344_v63 = vadd.f32 -0.5, %v1693_v61 }
 0x23d   : > { %2716 = vst [vmem:[%s4689_s18 + $0xff0] sm:$0xff] %v3343_v62 }
 0x23e   : > { %2717 = vst [vmem:[%s4689_s18 + $0xff8] sm:$0xff] %v3344_v63 }
 0x23f   : > { %4486 = shalt.err (!%p4483_p6)
}
 0x240   : > { %s4487_s4 = scalar_lea.hbm %s5696_s28, 65536  ;;  %s4491_s13 = scalar_lea.hbm %s5749_s1, 262144 }
 0x241   : > { %p4488_p7 = scmp.ne.s32.totalorder %s5696_s28, %s4487_s4  ;;  %p4492_p12 = scmp.lt.s32.totalorder %s5696_s28, %s5749_s1 }
 0x242   : > { %p4493_p1 = scmp.lt.s32.totalorder %s4491_s13, %s4487_s4 }
 0x243   : > { %p4489_p10 = pnand %p4488_p7, %p4622_p9 }
 0x244   : > { %p4494_p8 = por %p4493_p1, %p4492_p12 }
 0x245   : > { %p4490_p4 = pneg %p4489_p10 }
 0x247   : > { %p4495_p13 = pnand %p4494_p8, %p4490_p4 }
 0x249   : > { %4498 = shalt.err (!%p4495_p13)
}
 0x24a   : > { %s4559_s22 = smov 256   ;;  %s4560_s23 = smov 16  }
 0x24b   : > { %3357 = dma.vmem_to_hbm [thread:$0]  (%p4622_p9), %s5698_s25, 65536, %s5696_s28, %s2719_s9, %s4559_s22, %s4559_s22, %s4560_s23  }
 0x24c PF: > { %p3368_p0 = scmp.ge.s32.totalorder %s4553_s11, 2  ;;  %s2750_s18 = sand.u32 1, %s4533_s6  }
 0x24d   : > { %s2751_s24 = scalar_lea.sflag [#allocation4], %s2750_s18 }
 0x24e   : > { %p3364_p2 = pnand %p3368_p0, %p4629_p11 }
 0x250   : > { %p3365_p3 = pneg %p3364_p2 }
 0x252   : > { %4528 = dma.done.wait (%p3365_p3), %s2751_s24, 65536  }
 0x253   : > { %4530 = vsyncadd (%p3365_p3), %s2751_s24, 4294901760  ;;  %s17_s11 = sadd.s32 1, %s4553_s11   ;;  %s5755_s6 = smov %s4537_s7 }
 0x254   : > { %p14_p5 = scmp.ge.s32.totalorder %s17_s11, 6   ;;  %s5756_s7 = smov %s4541_s8 }
 0x255   : > { %s5757_s8 = smov %s4627_s20  ;;  %s5758_s9 = smov %s4549_s10 }
 0x256   : > { %s5759_s10 = smov %s5761_s14  ;;  %16 = sbr.rel (!%p14_p5) target bundleno = 6 (0x6), region = 69 }
 0x25b   :  { %2756 = vsyncpa [#allocation3], 1 }
 0x25c   :  { %2758 = vsyncpa [#allocation3 + $0x1], 1 }
 0x25d   :  { %2759 = vsyncpa [#allocation4], 1 }
 0x25e   :  { %2761 = vsyncpa [#allocation4 + $0x1], 1 }

</bundles_post_ra>
